<compile_context>
chip_gen: v7x
topology: tpu7x:2x2x1
jax: 0.10.0
libtpu: 0.0.40
codegen_flags: <defaults>
</compile_context>

<pallas_src>
import functools
import math

import jax
import jax.numpy as jnp
from jax.experimental import pallas as pl
from jax.experimental.pallas import tpu as pltpu

CPAD = 8  # channels padded to one f32 sublane tile (real channels = 3)


# ----------------------------- Pallas kernel --------------------------------
def _dm_sampler_kernel(x0_ref,     # VMEM (1, CPAD, HW)    initial sample (batch b)
                       noise_ref,  # VMEM (1, T, CPAD, HW) per-step gaussian noise
                       mask_ref,   # VMEM (9, 1, HW)       conv zero-pad masks
                       w1p_ref,    # VMEM (F, 9*CPAD)      conv1 weights, packed, bf16
                       b1_ref,     # VMEM (F, 1)           conv1 bias
                       wt_ref,     # VMEM (F, 1)           time-embedding weights
                       w2p_ref,    # VMEM (9*CPAD, F)      conv2 weights, packed, bf16
                       b2_ref,     # VMEM (CPAD, 1)        conv2 bias
                       out_ref,    # VMEM (1, CPAD, HW)    final sample
                       *, coefs, shifts):
    x = x0_ref[0]                         # (CPAD, HW) f32, carried across steps
    w1p = w1p_ref[...]                    # (F, 72) bf16
    w2p = w2p_ref[...]                    # (72, F) bf16
    b1 = b1_ref[...]                      # (F, 1)
    wt = wt_ref[...]                      # (F, 1)
    b2 = b2_ref[...]                      # (CPAD, 1)

    # Whole reverse-diffusion loop fused in-kernel (static unroll, T small).
    for step, (c1, c2, sigma, t_norm) in enumerate(coefs):
        # ---- conv1: 3x3 "same" conv (3 -> F) as ONE K=72 MXU contraction ----
        # Shift x along the lane (spatial) axis on the XLU + zero-pad mask,
        # stack the 9 taps (each an aligned 8-sublane group), one jnp.dot.
        taps = []
        for k, s in enumerate(shifts):
            if s == 0:
                taps.append(x)
            else:
                taps.append(pltpu.roll(x, shift=s, axis=1) * mask_ref[k])
        x_stack = jnp.concatenate(taps, axis=0).astype(jnp.bfloat16)   # (72, HW)
        h1 = jnp.dot(w1p, x_stack, preferred_element_type=jnp.float32)  # (F, HW)
        h1 = jnp.maximum(h1 + b1 + t_norm * wt, 0.0)

        # ---- conv2: 3x3 "same" conv (F -> 3), weights-first ------------------
        # One (72, F) @ (F, HW) MXU pass, then 9 cheap 8-sublane-aligned
        # masked rolls (shift/mask commute with the channel matmul).
        t2 = jnp.dot(w2p, h1.astype(jnp.bfloat16),
                     preferred_element_type=jnp.float32)                # (72, HW)
        acc = None
        for k, s in enumerate(shifts):
            tk = t2[k * CPAD:(k + 1) * CPAD, :]        # aligned 8-row view
            if s != 0:
                tk = pltpu.roll(tk, shift=s, axis=1) * mask_ref[k]
            acc = tk if acc is None else acc + tk
        pred_noise = acc + b2                                           # (CPAD, HW)

        # ---- DDPM reverse update (exact DMGenerator.forward formula) --------
        x = c1 * (x - c2 * pred_noise) + sigma * noise_ref[0, step]

    out_ref[0] = x


@functools.partial(jax.jit, static_argnames=("coefs", "shifts"))
def dm_sample(x0, noise, masks, w1p, b1, wt, w2p, b2, *, coefs, shifts):
    B, CP, HW = x0.shape
    T = noise.shape[1]
    F = w1p.shape[0]
    KC = w1p.shape[1]            # 9 * CPAD = 72
    kernel = functools.partial(_dm_sampler_kernel, coefs=coefs, shifts=shifts)
    return pl.pallas_call(
        kernel,
        out_shape=jax.ShapeDtypeStruct((B, CP, HW), jnp.float32),
        grid=(B,),
        in_specs=[
            pl.BlockSpec((1, CP, HW), lambda b: (b, 0, 0)),        # x0
            pl.BlockSpec((1, T, CP, HW), lambda b: (b, 0, 0, 0)),  # noise (one DMA / batch)
            pl.BlockSpec((9, 1, HW), lambda b: (0, 0, 0)),         # masks
            pl.BlockSpec((F, KC), lambda b: (0, 0)),               # w1 packed
            pl.BlockSpec((F, 1), lambda b: (0, 0)),                # b1
            pl.BlockSpec((F, 1), lambda b: (0, 0)),                # w_time
            pl.BlockSpec((KC, F), lambda b: (0, 0)),               # w2 packed
            pl.BlockSpec((CP, 1), lambda b: (0, 0)),               # b2
        ],
        out_specs=pl.BlockSpec((1, CP, HW), lambda b: (b, 0, 0)),
        compiler_params=pltpu.CompilerParams(
            dimension_semantics=("parallel",)),      # batch -> megacore on v7x
    )(x0, noise, masks, w1p, b1, wt, w2p, b2)


# ------------------------------ glue (plain JAX) ----------------------------
def make_tap_masks(H, W):
    """Per-tap zero-pad masks (9,1,HW) and lane-roll amounts for a 3x3 conv."""
    HW = H * W
    ys, xs = jnp.meshgrid(jnp.arange(H), jnp.arange(W), indexing="ij")
    masks, shifts = [], []
    for dy in (-1, 0, 1):          # k = (dy+1)*3 + (dx+1) matches weight taps
        for dx in (-1, 0, 1):
            valid = ((ys + dy >= 0) & (ys + dy < H) &
                     (xs + dx >= 0) & (xs + dx < W))
            masks.append(valid.reshape(1, HW).astype(jnp.float32))
            # out[i] = x[i + dy*W + dx]  <=>  roll by -(dy*W + dx)
            shifts.append(int((-(dy * W + dx)) % HW))
    return jnp.stack(masks), tuple(shifts)            # (9,1,HW), tuple[int]


class DMGeneratorPallas:
    def __init__(self, num_timesteps=8, img_size=16, hidden=32,
                 key=jax.random.PRNGKey(42)):
        self.img_size = img_size
        self.num_timesteps = num_timesteps
        # diffusion schedule (same as the PyTorch module)
        self.betas = jnp.linspace(1e-4, 0.02, num_timesteps).astype(jnp.float32)
        self.alphas = 1.0 - self.betas
        self.alphas_cumprod = jnp.cumprod(self.alphas)

        # deterministic synthetic UNet parameters, packed for one-pass matmuls
        C = 3
        k1, k2, k3 = jax.random.split(key, 3)
        w1 = (0.1 * jax.random.normal(k1, (3, 3, C, hidden))).astype(jnp.float32)
        w1_taps = w1.reshape(9, C, hidden)                              # (9,C,F)
        w1_pad = jnp.zeros((9, CPAD, hidden), jnp.float32).at[:, :C, :].set(w1_taps)
        self.w1p = jnp.transpose(
            w1_pad.reshape(9 * CPAD, hidden)).astype(jnp.bfloat16)      # (F,72)
        self.b1 = jnp.zeros((hidden, 1), jnp.float32)
        self.w_time = (0.1 * jax.random.normal(k2, (hidden, 1))).astype(jnp.float32)
        w2 = (0.1 * jax.random.normal(k3, (3, 3, hidden, C))).astype(jnp.float32)
        w2_taps = jnp.transpose(w2.reshape(9, hidden, C), (0, 2, 1))    # (9,C,F)
        w2_pad = jnp.zeros((9, CPAD, hidden), jnp.float32).at[:, :C, :].set(w2_taps)
        self.w2p = w2_pad.reshape(9 * CPAD, hidden).astype(jnp.bfloat16)  # (72,F)
        self.b2 = jnp.zeros((CPAD, 1), jnp.float32)

        self.masks, self.shifts = make_tap_masks(img_size, img_size)

        # Static per-step coefficient table (c1, c2, sigma, t/T); grid step s
        # corresponds to diffusion timestep t = T-1-s.  Baked as constants.
        coefs = []
        for s in range(num_timesteps):
            t = num_timesteps - 1 - s
            alpha = float(self.alphas[t])
            c1 = 1.0 / math.sqrt(alpha)
            if t > 0:
                c2 = (1.0 - alpha) / math.sqrt(
                    1.0 - float(self.alphas_cumprod[t - 1]))
                sigma = float(self.betas[t])              # matches the spec
            else:
                c2, sigma = 0.0, 0.0
            coefs.append((c1, float(c2), sigma, float(t) / num_timesteps))
        self.coefs = tuple(coefs)

    def __call__(self, z, key):
        B = z.shape[0]
        H = W = self.img_size
        HW = H * W
        C = 3
        T = self.num_timesteps

        # x = z.view(B,-1,1,1).repeat(1,1,H,W)[:, :3]  -> carried as (B,CPAD,HW)
        z_flat = z.reshape(B, -1)[:, :C].astype(jnp.float32)
        x0 = jnp.zeros((B, CPAD, HW), jnp.float32)
        x0 = x0.at[:, :C, :].set(jnp.broadcast_to(z_flat[:, :, None], (B, C, HW)))

        # Per-step gaussian noise (zero at t == 0), laid out (B, T, CPAD, HW)
        noises = []
        for s in range(T):
            t = T - 1 - s
            if t > 0:
                key, sub = jax.random.split(key)
                n = jax.random.normal(sub, (B, C, HW), jnp.float32)
            else:
                n = jnp.zeros((B, C, HW), jnp.float32)
            noises.append(n)
        noise = jnp.stack(noises, axis=0)                        # (T,B,C,HW)
        noise = jnp.concatenate(
            [noise, jnp.zeros((T, B, CPAD - C, HW), jnp.float32)], axis=2)
        noise = jnp.transpose(noise, (1, 0, 2, 3))               # (B,T,CPAD,HW)

        out = dm_sample(x0, noise, self.masks, self.w1p, self.b1, self.w_time,
                        self.w2p, self.b2, coefs=self.coefs, shifts=self.shifts)
        return out[:, :C, :].reshape(B, C, H, W)                 # PyTorch NCHW


if __name__ == "__main__":
    key = jax.random.PRNGKey(0)
    k_z, k_noise, k_params = jax.random.split(key, 3)

    B, latent = 2, 8
    img_size, hidden, T = 16, 32, 8
    z = jax.random.normal(k_z, (B, latent), jnp.float32)

    gen = DMGeneratorPallas(num_timesteps=T, img_size=img_size,
                            hidden=hidden, key=k_params)
    out = gen(z, k_noise)
    out = jax.block_until_ready(out)
    assert out.shape == (B, 3, img_size, img_size)
    assert bool(jnp.all(jnp.isfinite(out)))
    print("KERNEL_OK")
</pallas_src>

<mosaic_0001>
module attributes {stable_mosaic.version = 11 : i64} {
  func.func @_dm_sampler_kernel(%arg0: i32, %arg1: memref<1x8x256xf32, #tpu.memory_space<vmem>>, %arg2: memref<1x8x8x256xf32, #tpu.memory_space<vmem>>, %arg3: memref<9x1x256xf32, #tpu.memory_space<vmem>>, %arg4: memref<32x72xbf16, #tpu.memory_space<vmem>>, %arg5: memref<32x1xf32, #tpu.memory_space<vmem>>, %arg6: memref<32x1xf32, #tpu.memory_space<vmem>>, %arg7: memref<72x32xbf16, #tpu.memory_space<vmem>>, %arg8: memref<8x1xf32, #tpu.memory_space<vmem>>, %arg9: memref<1x8x256xf32, #tpu.memory_space<vmem>>) attributes {dimension_semantics = [#tpu.dimension_semantics<parallel>], iteration_bounds = array<i64: 2>, scalar_prefetch = 0 : i64, scratch_operands = 0 : i64, tpu.core_type = #tpu.core_type<tc>, window_params = [{transform_indices = @transform_0, window_bounds = array<i64: 1, 8, 256>}, {transform_indices = @transform_1, window_bounds = array<i64: 1, 8, 8, 256>}, {pipeline_mode = #tpu.pipeline_mode<synchronous>, transform_indices = @transform_2, window_bounds = array<i64: 9, 1, 256>}, {pipeline_mode = #tpu.pipeline_mode<synchronous>, transform_indices = @transform_3, window_bounds = array<i64: 32, 72>}, {pipeline_mode = #tpu.pipeline_mode<synchronous>, transform_indices = @transform_4, window_bounds = array<i64: 32, 1>}, {pipeline_mode = #tpu.pipeline_mode<synchronous>, transform_indices = @transform_5, window_bounds = array<i64: 32, 1>}, {pipeline_mode = #tpu.pipeline_mode<synchronous>, transform_indices = @transform_6, window_bounds = array<i64: 72, 32>}, {pipeline_mode = #tpu.pipeline_mode<synchronous>, transform_indices = @transform_7, window_bounds = array<i64: 8, 1>}, {transform_indices = @transform_8, window_bounds = array<i64: 1, 8, 256>}]} {
    %c0 = arith.constant 0 : index
    %c0_0 = arith.constant 0 : index
    %c0_1 = arith.constant 0 : index
    %0 = vector.load %arg1[%c0, %c0_0, %c0_1] : memref<1x8x256xf32, #tpu.memory_space<vmem>>, vector<1x8x256xf32>
    %1 = vector.shape_cast %0 : vector<1x8x256xf32> to vector<8x256xf32>
    %c0_2 = arith.constant 0 : index
    %c0_3 = arith.constant 0 : index
    %2 = vector.load %arg4[%c0_2, %c0_3] : memref<32x72xbf16, #tpu.memory_space<vmem>>, vector<32x72xbf16>
    %c0_4 = arith.constant 0 : index
    %c0_5 = arith.constant 0 : index
    %3 = vector.load %arg7[%c0_4, %c0_5] : memref<72x32xbf16, #tpu.memory_space<vmem>>, vector<72x32xbf16>
    %c0_6 = arith.constant 0 : index
    %c0_7 = arith.constant 0 : index
    %4 = vector.load %arg5[%c0_6, %c0_7] : memref<32x1xf32, #tpu.memory_space<vmem>>, vector<32x1xf32>
    %c0_8 = arith.constant 0 : index
    %c0_9 = arith.constant 0 : index
    %5 = vector.load %arg6[%c0_8, %c0_9] : memref<32x1xf32, #tpu.memory_space<vmem>>, vector<32x1xf32>
    %c0_10 = arith.constant 0 : index
    %c0_11 = arith.constant 0 : index
    %6 = vector.load %arg8[%c0_10, %c0_11] : memref<8x1xf32, #tpu.memory_space<vmem>>, vector<8x1xf32>
    %c17_i32 = arith.constant 17 : i32
    %7 = tpu.dynamic_rotate %1 by %c17_i32 dim 1 : vector<8x256xf32>, i32 -> vector<8x256xf32>
    %c0_12 = arith.constant 0 : index
    %c0_13 = arith.constant 0 : index
    %c0_14 = arith.constant 0 : index
    %8 = vector.load %arg3[%c0_12, %c0_13, %c0_14] : memref<9x1x256xf32, #tpu.memory_space<vmem>>, vector<1x1x256xf32>
    %9 = vector.shape_cast %8 : vector<1x1x256xf32> to vector<1x256xf32>
    %10 = vector.broadcast %9 : vector<1x256xf32> to vector<8x256xf32>
    %11 = arith.mulf %7, %10 : vector<8x256xf32>
    %c16_i32 = arith.constant 16 : i32
    %12 = tpu.dynamic_rotate %1 by %c16_i32 dim 1 : vector<8x256xf32>, i32 -> vector<8x256xf32>
    %c1 = arith.constant 1 : index
    %c0_15 = arith.constant 0 : index
    %c0_16 = arith.constant 0 : index
    %13 = vector.load %arg3[%c1, %c0_15, %c0_16] : memref<9x1x256xf32, #tpu.memory_space<vmem>>, vector<1x1x256xf32>
    %14 = vector.shape_cast %13 : vector<1x1x256xf32> to vector<1x256xf32>
    %15 = vector.broadcast %14 : vector<1x256xf32> to vector<8x256xf32>
    %16 = arith.mulf %12, %15 : vector<8x256xf32>
    %c15_i32 = arith.constant 15 : i32
    %17 = tpu.dynamic_rotate %1 by %c15_i32 dim 1 : vector<8x256xf32>, i32 -> vector<8x256xf32>
    %c2 = arith.constant 2 : index
    %c0_17 = arith.constant 0 : index
    %c0_18 = arith.constant 0 : index
    %18 = vector.load %arg3[%c2, %c0_17, %c0_18] : memref<9x1x256xf32, #tpu.memory_space<vmem>>, vector<1x1x256xf32>
    %19 = vector.shape_cast %18 : vector<1x1x256xf32> to vector<1x256xf32>
    %20 = vector.broadcast %19 : vector<1x256xf32> to vector<8x256xf32>
    %21 = arith.mulf %17, %20 : vector<8x256xf32>
    %c1_i32 = arith.constant 1 : i32
    %22 = tpu.dynamic_rotate %1 by %c1_i32 dim 1 : vector<8x256xf32>, i32 -> vector<8x256xf32>
    %c3 = arith.constant 3 : index
    %c0_19 = arith.constant 0 : index
    %c0_20 = arith.constant 0 : index
    %23 = vector.load %arg3[%c3, %c0_19, %c0_20] : memref<9x1x256xf32, #tpu.memory_space<vmem>>, vector<1x1x256xf32>
    %24 = vector.shape_cast %23 : vector<1x1x256xf32> to vector<1x256xf32>
    %25 = vector.broadcast %24 : vector<1x256xf32> to vector<8x256xf32>
    %26 = arith.mulf %22, %25 : vector<8x256xf32>
    %c255_i32 = arith.constant 255 : i32
    %27 = tpu.dynamic_rotate %1 by %c255_i32 dim 1 : vector<8x256xf32>, i32 -> vector<8x256xf32>
    %c5 = arith.constant 5 : index
    %c0_21 = arith.constant 0 : index
    %c0_22 = arith.constant 0 : index
    %28 = vector.load %arg3[%c5, %c0_21, %c0_22] : memref<9x1x256xf32, #tpu.memory_space<vmem>>, vector<1x1x256xf32>
    %29 = vector.shape_cast %28 : vector<1x1x256xf32> to vector<1x256xf32>
    %30 = vector.broadcast %29 : vector<1x256xf32> to vector<8x256xf32>
    %31 = arith.mulf %27, %30 : vector<8x256xf32>
    %c241_i32 = arith.constant 241 : i32
    %32 = tpu.dynamic_rotate %1 by %c241_i32 dim 1 : vector<8x256xf32>, i32 -> vector<8x256xf32>
    %c6 = arith.constant 6 : index
    %c0_23 = arith.constant 0 : index
    %c0_24 = arith.constant 0 : index
    %33 = vector.load %arg3[%c6, %c0_23, %c0_24] : memref<9x1x256xf32, #tpu.memory_space<vmem>>, vector<1x1x256xf32>
    %34 = vector.shape_cast %33 : vector<1x1x256xf32> to vector<1x256xf32>
    %35 = vector.broadcast %34 : vector<1x256xf32> to vector<8x256xf32>
    %36 = arith.mulf %32, %35 : vector<8x256xf32>
    %c240_i32 = arith.constant 240 : i32
    %37 = tpu.dynamic_rotate %1 by %c240_i32 dim 1 : vector<8x256xf32>, i32 -> vector<8x256xf32>
    %c7 = arith.constant 7 : index
    %c0_25 = arith.constant 0 : index
    %c0_26 = arith.constant 0 : index
    %38 = vector.load %arg3[%c7, %c0_25, %c0_26] : memref<9x1x256xf32, #tpu.memory_space<vmem>>, vector<1x1x256xf32>
    %39 = vector.shape_cast %38 : vector<1x1x256xf32> to vector<1x256xf32>
    %40 = vector.broadcast %39 : vector<1x256xf32> to vector<8x256xf32>
    %41 = arith.mulf %37, %40 : vector<8x256xf32>
    %c239_i32 = arith.constant 239 : i32
    %42 = tpu.dynamic_rotate %1 by %c239_i32 dim 1 : vector<8x256xf32>, i32 -> vector<8x256xf32>
    %c8 = arith.constant 8 : index
    %c0_27 = arith.constant 0 : index
    %c0_28 = arith.constant 0 : index
    %43 = vector.load %arg3[%c8, %c0_27, %c0_28] : memref<9x1x256xf32, #tpu.memory_space<vmem>>, vector<1x1x256xf32>
    %44 = vector.shape_cast %43 : vector<1x1x256xf32> to vector<1x256xf32>
    %45 = vector.broadcast %44 : vector<1x256xf32> to vector<8x256xf32>
    %46 = arith.mulf %42, %45 : vector<8x256xf32>
    %47 = tpu.concatenate %11, %16, %21, %26, %1, %31, %36, %41, %46 in 0 : vector<8x256xf32>, vector<8x256xf32>, vector<8x256xf32>, vector<8x256xf32>, vector<8x256xf32>, vector<8x256xf32>, vector<8x256xf32>, vector<8x256xf32>, vector<8x256xf32> -> vector<72x256xf32>
    %48 = arith.truncf %47 : vector<72x256xf32> to vector<72x256xbf16>
    %cst = arith.constant dense<0.000000e+00> : vector<32x256xf32>
    %49 = tpu.matmul %2, %48, %cst {dimension_numbers = #tpu.dot_dimension_numbers<[1], [0], [0], [1], [0, 0, 1, 1], [], []>} : vector<32x72xbf16>, vector<72x256xbf16>, vector<32x256xf32> -> vector<32x256xf32>
    %50 = vector.broadcast %4 : vector<32x1xf32> to vector<32x256xf32>
    %51 = arith.addf %49, %50 : vector<32x256xf32>
    %cst_29 = arith.constant 8.750000e-01 : f32
    %52 = vector.broadcast %cst_29 : f32 to vector<32x1xf32>
    %53 = arith.mulf %52, %5 : vector<32x1xf32>
    %54 = vector.broadcast %53 : vector<32x1xf32> to vector<32x256xf32>
    %55 = arith.addf %51, %54 : vector<32x256xf32>
    %cst_30 = arith.constant 0.000000e+00 : f32
    %56 = vector.broadcast %cst_30 : f32 to vector<32x256xf32>
    %57 = arith.maximumf %55, %56 : vector<32x256xf32>
    %58 = arith.truncf %57 : vector<32x256xf32> to vector<32x256xbf16>
    %cst_31 = arith.constant dense<0.000000e+00> : vector<72x256xf32>
    %59 = tpu.matmul %3, %58, %cst_31 {dimension_numbers = #tpu.dot_dimension_numbers<[1], [0], [0], [1], [0, 0, 1, 1], [], []>} : vector<72x32xbf16>, vector<32x256xbf16>, vector<72x256xf32> -> vector<72x256xf32>
    %60 = vector.extract_strided_slice %59 {offsets = [0, 0], sizes = [8, 256], strides = [1, 1]} : vector<72x256xf32> to vector<8x256xf32>
    %c17_i32_32 = arith.constant 17 : i32
    %61 = tpu.dynamic_rotate %60 by %c17_i32_32 dim 1 : vector<8x256xf32>, i32 -> vector<8x256xf32>
    %c0_33 = arith.constant 0 : index
    %c0_34 = arith.constant 0 : index
    %c0_35 = arith.constant 0 : index
    %62 = vector.load %arg3[%c0_33, %c0_34, %c0_35] : memref<9x1x256xf32, #tpu.memory_space<vmem>>, vector<1x1x256xf32>
    %63 = vector.shape_cast %62 : vector<1x1x256xf32> to vector<1x256xf32>
    %64 = vector.broadcast %63 : vector<1x256xf32> to vector<8x256xf32>
    %65 = arith.mulf %61, %64 : vector<8x256xf32>
    %66 = vector.extract_strided_slice %59 {offsets = [8, 0], sizes = [8, 256], strides = [1, 1]} : vector<72x256xf32> to vector<8x256xf32>
    %c16_i32_36 = arith.constant 16 : i32
    %67 = tpu.dynamic_rotate %66 by %c16_i32_36 dim 1 : vector<8x256xf32>, i32 -> vector<8x256xf32>
    %c1_37 = arith.constant 1 : index
    %c0_38 = arith.constant 0 : index
    %c0_39 = arith.constant 0 : index
    %68 = vector.load %arg3[%c1_37, %c0_38, %c0_39] : memref<9x1x256xf32, #tpu.memory_space<vmem>>, vector<1x1x256xf32>
    %69 = vector.shape_cast %68 : vector<1x1x256xf32> to vector<1x256xf32>
    %70 = vector.broadcast %69 : vector<1x256xf32> to vector<8x256xf32>
    %71 = arith.mulf %67, %70 : vector<8x256xf32>
    %72 = arith.addf %65, %71 : vector<8x256xf32>
    %73 = vector.extract_strided_slice %59 {offsets = [16, 0], sizes = [8, 256], strides = [1, 1]} : vector<72x256xf32> to vector<8x256xf32>
    %c15_i32_40 = arith.constant 15 : i32
    %74 = tpu.dynamic_rotate %73 by %c15_i32_40 dim 1 : vector<8x256xf32>, i32 -> vector<8x256xf32>
    %c2_41 = arith.constant 2 : index
    %c0_42 = arith.constant 0 : index
    %c0_43 = arith.constant 0 : index
    %75 = vector.load %arg3[%c2_41, %c0_42, %c0_43] : memref<9x1x256xf32, #tpu.memory_space<vmem>>, vector<1x1x256xf32>
    %76 = vector.shape_cast %75 : vector<1x1x256xf32> to vector<1x256xf32>
    %77 = vector.broadcast %76 : vector<1x256xf32> to vector<8x256xf32>
    %78 = arith.mulf %74, %77 : vector<8x256xf32>
    %79 = arith.addf %72, %78 : vector<8x256xf32>
    %80 = vector.extract_strided_slice %59 {offsets = [24, 0], sizes = [8, 256], strides = [1, 1]} : vector<72x256xf32> to vector<8x256xf32>
    %c1_i32_44 = arith.constant 1 : i32
    %81 = tpu.dynamic_rotate %80 by %c1_i32_44 dim 1 : vector<8x256xf32>, i32 -> vector<8x256xf32>
    %c3_45 = arith.constant 3 : index
    %c0_46 = arith.constant 0 : index
    %c0_47 = arith.constant 0 : index
    %82 = vector.load %arg3[%c3_45, %c0_46, %c0_47] : memref<9x1x256xf32, #tpu.memory_space<vmem>>, vector<1x1x256xf32>
    %83 = vector.shape_cast %82 : vector<1x1x256xf32> to vector<1x256xf32>
    %84 = vector.broadcast %83 : vector<1x256xf32> to vector<8x256xf32>
    %85 = arith.mulf %81, %84 : vector<8x256xf32>
    %86 = arith.addf %79, %85 : vector<8x256xf32>
    %87 = vector.extract_strided_slice %59 {offsets = [32, 0], sizes = [8, 256], strides = [1, 1]} : vector<72x256xf32> to vector<8x256xf32>
    %88 = arith.addf %86, %87 : vector<8x256xf32>
    %89 = vector.extract_strided_slice %59 {offsets = [40, 0], sizes = [8, 256], strides = [1, 1]} : vector<72x256xf32> to vector<8x256xf32>
    %c255_i32_48 = arith.constant 255 : i32
    %90 = tpu.dynamic_rotate %89 by %c255_i32_48 dim 1 : vector<8x256xf32>, i32 -> vector<8x256xf32>
    %c5_49 = arith.constant 5 : index
    %c0_50 = arith.constant 0 : index
    %c0_51 = arith.constant 0 : index
    %91 = vector.load %arg3[%c5_49, %c0_50, %c0_51] : memref<9x1x256xf32, #tpu.memory_space<vmem>>, vector<1x1x256xf32>
    %92 = vector.shape_cast %91 : vector<1x1x256xf32> to vector<1x256xf32>
    %93 = vector.broadcast %92 : vector<1x256xf32> to vector<8x256xf32>
    %94 = arith.mulf %90, %93 : vector<8x256xf32>
    %95 = arith.addf %88, %94 : vector<8x256xf32>
    %96 = vector.extract_strided_slice %59 {offsets = [48, 0], sizes = [8, 256], strides = [1, 1]} : vector<72x256xf32> to vector<8x256xf32>
    %c241_i32_52 = arith.constant 241 : i32
    %97 = tpu.dynamic_rotate %96 by %c241_i32_52 dim 1 : vector<8x256xf32>, i32 -> vector<8x256xf32>
    %c6_53 = arith.constant 6 : index
    %c0_54 = arith.constant 0 : index
    %c0_55 = arith.constant 0 : index
    %98 = vector.load %arg3[%c6_53, %c0_54, %c0_55] : memref<9x1x256xf32, #tpu.memory_space<vmem>>, vector<1x1x256xf32>
    %99 = vector.shape_cast %98 : vector<1x1x256xf32> to vector<1x256xf32>
    %100 = vector.broadcast %99 : vector<1x256xf32> to vector<8x256xf32>
    %101 = arith.mulf %97, %100 : vector<8x256xf32>
    %102 = arith.addf %95, %101 : vector<8x256xf32>
    %103 = vector.extract_strided_slice %59 {offsets = [56, 0], sizes = [8, 256], strides = [1, 1]} : vector<72x256xf32> to vector<8x256xf32>
    %c240_i32_56 = arith.constant 240 : i32
    %104 = tpu.dynamic_rotate %103 by %c240_i32_56 dim 1 : vector<8x256xf32>, i32 -> vector<8x256xf32>
    %c7_57 = arith.constant 7 : index
    %c0_58 = arith.constant 0 : index
    %c0_59 = arith.constant 0 : index
    %105 = vector.load %arg3[%c7_57, %c0_58, %c0_59] : memref<9x1x256xf32, #tpu.memory_space<vmem>>, vector<1x1x256xf32>
    %106 = vector.shape_cast %105 : vector<1x1x256xf32> to vector<1x256xf32>
    %107 = vector.broadcast %106 : vector<1x256xf32> to vector<8x256xf32>
    %108 = arith.mulf %104, %107 : vector<8x256xf32>
    %109 = arith.addf %102, %108 : vector<8x256xf32>
    %110 = vector.extract_strided_slice %59 {offsets = [64, 0], sizes = [8, 256], strides = [1, 1]} : vector<72x256xf32> to vector<8x256xf32>
    %c239_i32_60 = arith.constant 239 : i32
    %111 = tpu.dynamic_rotate %110 by %c239_i32_60 dim 1 : vector<8x256xf32>, i32 -> vector<8x256xf32>
    %c8_61 = arith.constant 8 : index
    %c0_62 = arith.constant 0 : index
    %c0_63 = arith.constant 0 : index
    %112 = vector.load %arg3[%c8_61, %c0_62, %c0_63] : memref<9x1x256xf32, #tpu.memory_space<vmem>>, vector<1x1x256xf32>
    %113 = vector.shape_cast %112 : vector<1x1x256xf32> to vector<1x256xf32>
    %114 = vector.broadcast %113 : vector<1x256xf32> to vector<8x256xf32>
    %115 = arith.mulf %111, %114 : vector<8x256xf32>
    %116 = arith.addf %109, %115 : vector<8x256xf32>
    %117 = vector.broadcast %6 : vector<8x1xf32> to vector<8x256xf32>
    %118 = arith.addf %116, %117 : vector<8x256xf32>
    %cst_64 = arith.constant 0.0823615342 : f32
    %119 = vector.broadcast %cst_64 : f32 to vector<8x256xf32>
    %120 = arith.mulf %119, %118 : vector<8x256xf32>
    %121 = arith.subf %1, %120 : vector<8x256xf32>
    %cst_65 = arith.constant 1.01015258 : f32
    %122 = vector.broadcast %cst_65 : f32 to vector<8x256xf32>
    %123 = arith.mulf %122, %121 : vector<8x256xf32>
    %c0_66 = arith.constant 0 : index
    %c0_67 = arith.constant 0 : index
    %c0_68 = arith.constant 0 : index
    %c0_69 = arith.constant 0 : index
    %124 = vector.load %arg2[%c0_66, %c0_67, %c0_68, %c0_69] : memref<1x8x8x256xf32, #tpu.memory_space<vmem>>, vector<1x1x8x256xf32>
    %125 = vector.shape_cast %124 : vector<1x1x8x256xf32> to vector<8x256xf32>
    %cst_70 = arith.constant 2.000000e-02 : f32
    %126 = vector.broadcast %cst_70 : f32 to vector<8x256xf32>
    %127 = arith.mulf %126, %125 : vector<8x256xf32>
    %128 = arith.addf %123, %127 : vector<8x256xf32>
    %c17_i32_71 = arith.constant 17 : i32
    %129 = tpu.dynamic_rotate %128 by %c17_i32_71 dim 1 : vector<8x256xf32>, i32 -> vector<8x256xf32>
    %c0_72 = arith.constant 0 : index
    %c0_73 = arith.constant 0 : index
    %c0_74 = arith.constant 0 : index
    %130 = vector.load %arg3[%c0_72, %c0_73, %c0_74] : memref<9x1x256xf32, #tpu.memory_space<vmem>>, vector<1x1x256xf32>
    %131 = vector.shape_cast %130 : vector<1x1x256xf32> to vector<1x256xf32>
    %132 = vector.broadcast %131 : vector<1x256xf32> to vector<8x256xf32>
    %133 = arith.mulf %129, %132 : vector<8x256xf32>
    %c16_i32_75 = arith.constant 16 : i32
    %134 = tpu.dynamic_rotate %128 by %c16_i32_75 dim 1 : vector<8x256xf32>, i32 -> vector<8x256xf32>
    %c1_76 = arith.constant 1 : index
    %c0_77 = arith.constant 0 : index
    %c0_78 = arith.constant 0 : index
    %135 = vector.load %arg3[%c1_76, %c0_77, %c0_78] : memref<9x1x256xf32, #tpu.memory_space<vmem>>, vector<1x1x256xf32>
    %136 = vector.shape_cast %135 : vector<1x1x256xf32> to vector<1x256xf32>
    %137 = vector.broadcast %136 : vector<1x256xf32> to vector<8x256xf32>
    %138 = arith.mulf %134, %137 : vector<8x256xf32>
    %c15_i32_79 = arith.constant 15 : i32
    %139 = tpu.dynamic_rotate %128 by %c15_i32_79 dim 1 : vector<8x256xf32>, i32 -> vector<8x256xf32>
    %c2_80 = arith.constant 2 : index
    %c0_81 = arith.constant 0 : index
    %c0_82 = arith.constant 0 : index
    %140 = vector.load %arg3[%c2_80, %c0_81, %c0_82] : memref<9x1x256xf32, #tpu.memory_space<vmem>>, vector<1x1x256xf32>
    %141 = vector.shape_cast %140 : vector<1x1x256xf32> to vector<1x256xf32>
    %142 = vector.broadcast %141 : vector<1x256xf32> to vector<8x256xf32>
    %143 = arith.mulf %139, %142 : vector<8x256xf32>
    %c1_i32_83 = arith.constant 1 : i32
    %144 = tpu.dynamic_rotate %128 by %c1_i32_83 dim 1 : vector<8x256xf32>, i32 -> vector<8x256xf32>
    %c3_84 = arith.constant 3 : index
    %c0_85 = arith.constant 0 : index
    %c0_86 = arith.constant 0 : index
    %145 = vector.load %arg3[%c3_84, %c0_85, %c0_86] : memref<9x1x256xf32, #tpu.memory_space<vmem>>, vector<1x1x256xf32>
    %146 = vector.shape_cast %145 : vector<1x1x256xf32> to vector<1x256xf32>
    %147 = vector.broadcast %146 : vector<1x256xf32> to vector<8x256xf32>
    %148 = arith.mulf %144, %147 : vector<8x256xf32>
    %c255_i32_87 = arith.constant 255 : i32
    %149 = tpu.dynamic_rotate %128 by %c255_i32_87 dim 1 : vector<8x256xf32>, i32 -> vector<8x256xf32>
    %c5_88 = arith.constant 5 : index
    %c0_89 = arith.constant 0 : index
    %c0_90 = arith.constant 0 : index
    %150 = vector.load %arg3[%c5_88, %c0_89, %c0_90] : memref<9x1x256xf32, #tpu.memory_space<vmem>>, vector<1x1x256xf32>
    %151 = vector.shape_cast %150 : vector<1x1x256xf32> to vector<1x256xf32>
    %152 = vector.broadcast %151 : vector<1x256xf32> to vector<8x256xf32>
    %153 = arith.mulf %149, %152 : vector<8x256xf32>
    %c241_i32_91 = arith.constant 241 : i32
    %154 = tpu.dynamic_rotate %128 by %c241_i32_91 dim 1 : vector<8x256xf32>, i32 -> vector<8x256xf32>
    %c6_92 = arith.constant 6 : index
    %c0_93 = arith.constant 0 : index
    %c0_94 = arith.constant 0 : index
    %155 = vector.load %arg3[%c6_92, %c0_93, %c0_94] : memref<9x1x256xf32, #tpu.memory_space<vmem>>, vector<1x1x256xf32>
    %156 = vector.shape_cast %155 : vector<1x1x256xf32> to vector<1x256xf32>
    %157 = vector.broadcast %156 : vector<1x256xf32> to vector<8x256xf32>
    %158 = arith.mulf %154, %157 : vector<8x256xf32>
    %c240_i32_95 = arith.constant 240 : i32
    %159 = tpu.dynamic_rotate %128 by %c240_i32_95 dim 1 : vector<8x256xf32>, i32 -> vector<8x256xf32>
    %c7_96 = arith.constant 7 : index
    %c0_97 = arith.constant 0 : index
    %c0_98 = arith.constant 0 : index
    %160 = vector.load %arg3[%c7_96, %c0_97, %c0_98] : memref<9x1x256xf32, #tpu.memory_space<vmem>>, vector<1x1x256xf32>
    %161 = vector.shape_cast %160 : vector<1x1x256xf32> to vector<1x256xf32>
    %162 = vector.broadcast %161 : vector<1x256xf32> to vector<8x256xf32>
    %163 = arith.mulf %159, %162 : vector<8x256xf32>
    %c239_i32_99 = arith.constant 239 : i32
    %164 = tpu.dynamic_rotate %128 by %c239_i32_99 dim 1 : vector<8x256xf32>, i32 -> vector<8x256xf32>
    %c8_100 = arith.constant 8 : index
    %c0_101 = arith.constant 0 : index
    %c0_102 = arith.constant 0 : index
    %165 = vector.load %arg3[%c8_100, %c0_101, %c0_102] : memref<9x1x256xf32, #tpu.memory_space<vmem>>, vector<1x1x256xf32>
    %166 = vector.shape_cast %165 : vector<1x1x256xf32> to vector<1x256xf32>
    %167 = vector.broadcast %166 : vector<1x256xf32> to vector<8x256xf32>
    %168 = arith.mulf %164, %167 : vector<8x256xf32>
    %169 = tpu.concatenate %133, %138, %143, %148, %128, %153, %158, %163, %168 in 0 : vector<8x256xf32>, vector<8x256xf32>, vector<8x256xf32>, vector<8x256xf32>, vector<8x256xf32>, vector<8x256xf32>, vector<8x256xf32>, vector<8x256xf32>, vector<8x256xf32> -> vector<72x256xf32>
    %170 = arith.truncf %169 : vector<72x256xf32> to vector<72x256xbf16>
    %cst_103 = arith.constant dense<0.000000e+00> : vector<32x256xf32>
    %171 = tpu.matmul %2, %170, %cst_103 {dimension_numbers = #tpu.dot_dimension_numbers<[1], [0], [0], [1], [0, 0, 1, 1], [], []>} : vector<32x72xbf16>, vector<72x256xbf16>, vector<32x256xf32> -> vector<32x256xf32>
    %172 = vector.broadcast %4 : vector<32x1xf32> to vector<32x256xf32>
    %173 = arith.addf %171, %172 : vector<32x256xf32>
    %cst_104 = arith.constant 7.500000e-01 : f32
    %174 = vector.broadcast %cst_104 : f32 to vector<32x1xf32>
    %175 = arith.mulf %174, %5 : vector<32x1xf32>
    %176 = vector.broadcast %175 : vector<32x1xf32> to vector<32x256xf32>
    %177 = arith.addf %173, %176 : vector<32x256xf32>
    %cst_105 = arith.constant 0.000000e+00 : f32
    %178 = vector.broadcast %cst_105 : f32 to vector<32x256xf32>
    %179 = arith.maximumf %177, %178 : vector<32x256xf32>
    %180 = arith.truncf %179 : vector<32x256xf32> to vector<32x256xbf16>
    %cst_106 = arith.constant dense<0.000000e+00> : vector<72x256xf32>
    %181 = tpu.matmul %3, %180, %cst_106 {dimension_numbers = #tpu.dot_dimension_numbers<[1], [0], [0], [1], [0, 0, 1, 1], [], []>} : vector<72x32xbf16>, vector<32x256xbf16>, vector<72x256xf32> -> vector<72x256xf32>
    %182 = vector.extract_strided_slice %181 {offsets = [0, 0], sizes = [8, 256], strides = [1, 1]} : vector<72x256xf32> to vector<8x256xf32>
    %c17_i32_107 = arith.constant 17 : i32
    %183 = tpu.dynamic_rotate %182 by %c17_i32_107 dim 1 : vector<8x256xf32>, i32 -> vector<8x256xf32>
    %c0_108 = arith.constant 0 : index
    %c0_109 = arith.constant 0 : index
    %c0_110 = arith.constant 0 : index
    %184 = vector.load %arg3[%c0_108, %c0_109, %c0_110] : memref<9x1x256xf32, #tpu.memory_space<vmem>>, vector<1x1x256xf32>
    %185 = vector.shape_cast %184 : vector<1x1x256xf32> to vector<1x256xf32>
    %186 = vector.broadcast %185 : vector<1x256xf32> to vector<8x256xf32>
    %187 = arith.mulf %183, %186 : vector<8x256xf32>
    %188 = vector.extract_strided_slice %181 {offsets = [8, 0], sizes = [8, 256], strides = [1, 1]} : vector<72x256xf32> to vector<8x256xf32>
    %c16_i32_111 = arith.constant 16 : i32
    %189 = tpu.dynamic_rotate %188 by %c16_i32_111 dim 1 : vector<8x256xf32>, i32 -> vector<8x256xf32>
    %c1_112 = arith.constant 1 : index
    %c0_113 = arith.constant 0 : index
    %c0_114 = arith.constant 0 : index
    %190 = vector.load %arg3[%c1_112, %c0_113, %c0_114] : memref<9x1x256xf32, #tpu.memory_space<vmem>>, vector<1x1x256xf32>
    %191 = vector.shape_cast %190 : vector<1x1x256xf32> to vector<1x256xf32>
    %192 = vector.broadcast %191 : vector<1x256xf32> to vector<8x256xf32>
    %193 = arith.mulf %189, %192 : vector<8x256xf32>
    %194 = arith.addf %187, %193 : vector<8x256xf32>
    %195 = vector.extract_strided_slice %181 {offsets = [16, 0], sizes = [8, 256], strides = [1, 1]} : vector<72x256xf32> to vector<8x256xf32>
    %c15_i32_115 = arith.constant 15 : i32
    %196 = tpu.dynamic_rotate %195 by %c15_i32_115 dim 1 : vector<8x256xf32>, i32 -> vector<8x256xf32>
    %c2_116 = arith.constant 2 : index
    %c0_117 = arith.constant 0 : index
    %c0_118 = arith.constant 0 : index
    %197 = vector.load %arg3[%c2_116, %c0_117, %c0_118] : memref<9x1x256xf32, #tpu.memory_space<vmem>>, vector<1x1x256xf32>
    %198 = vector.shape_cast %197 : vector<1x1x256xf32> to vector<1x256xf32>
    %199 = vector.broadcast %198 : vector<1x256xf32> to vector<8x256xf32>
    %200 = arith.mulf %196, %199 : vector<8x256xf32>
    %201 = arith.addf %194, %200 : vector<8x256xf32>
    %202 = vector.extract_strided_slice %181 {offsets = [24, 0], sizes = [8, 256], strides = [1, 1]} : vector<72x256xf32> to vector<8x256xf32>
    %c1_i32_119 = arith.constant 1 : i32
    %203 = tpu.dynamic_rotate %202 by %c1_i32_119 dim 1 : vector<8x256xf32>, i32 -> vector<8x256xf32>
    %c3_120 = arith.constant 3 : index
    %c0_121 = arith.constant 0 : index
    %c0_122 = arith.constant 0 : index
    %204 = vector.load %arg3[%c3_120, %c0_121, %c0_122] : memref<9x1x256xf32, #tpu.memory_space<vmem>>, vector<1x1x256xf32>
    %205 = vector.shape_cast %204 : vector<1x1x256xf32> to vector<1x256xf32>
    %206 = vector.broadcast %205 : vector<1x256xf32> to vector<8x256xf32>
    %207 = arith.mulf %203, %206 : vector<8x256xf32>
    %208 = arith.addf %201, %207 : vector<8x256xf32>
    %209 = vector.extract_strided_slice %181 {offsets = [32, 0], sizes = [8, 256], strides = [1, 1]} : vector<72x256xf32> to vector<8x256xf32>
    %210 = arith.addf %208, %209 : vector<8x256xf32>
    %211 = vector.extract_strided_slice %181 {offsets = [40, 0], sizes = [8, 256], strides = [1, 1]} : vector<72x256xf32> to vector<8x256xf32>
    %c255_i32_123 = arith.constant 255 : i32
    %212 = tpu.dynamic_rotate %211 by %c255_i32_123 dim 1 : vector<8x256xf32>, i32 -> vector<8x256xf32>
    %c5_124 = arith.constant 5 : index
    %c0_125 = arith.constant 0 : index
    %c0_126 = arith.constant 0 : index
    %213 = vector.load %arg3[%c5_124, %c0_125, %c0_126] : memref<9x1x256xf32, #tpu.memory_space<vmem>>, vector<1x1x256xf32>
    %214 = vector.shape_cast %213 : vector<1x1x256xf32> to vector<1x256xf32>
    %215 = vector.broadcast %214 : vector<1x256xf32> to vector<8x256xf32>
    %216 = arith.mulf %212, %215 : vector<8x256xf32>
    %217 = arith.addf %210, %216 : vector<8x256xf32>
    %218 = vector.extract_strided_slice %181 {offsets = [48, 0], sizes = [8, 256], strides = [1, 1]} : vector<72x256xf32> to vector<8x256xf32>
    %c241_i32_127 = arith.constant 241 : i32
    %219 = tpu.dynamic_rotate %218 by %c241_i32_127 dim 1 : vector<8x256xf32>, i32 -> vector<8x256xf32>
    %c6_128 = arith.constant 6 : index
    %c0_129 = arith.constant 0 : index
    %c0_130 = arith.constant 0 : index
    %220 = vector.load %arg3[%c6_128, %c0_129, %c0_130] : memref<9x1x256xf32, #tpu.memory_space<vmem>>, vector<1x1x256xf32>
    %221 = vector.shape_cast %220 : vector<1x1x256xf32> to vector<1x256xf32>
    %222 = vector.broadcast %221 : vector<1x256xf32> to vector<8x256xf32>
    %223 = arith.mulf %219, %222 : vector<8x256xf32>
    %224 = arith.addf %217, %223 : vector<8x256xf32>
    %225 = vector.extract_strided_slice %181 {offsets = [56, 0], sizes = [8, 256], strides = [1, 1]} : vector<72x256xf32> to vector<8x256xf32>
    %c240_i32_131 = arith.constant 240 : i32
    %226 = tpu.dynamic_rotate %225 by %c240_i32_131 dim 1 : vector<8x256xf32>, i32 -> vector<8x256xf32>
    %c7_132 = arith.constant 7 : index
    %c0_133 = arith.constant 0 : index
    %c0_134 = arith.constant 0 : index
    %227 = vector.load %arg3[%c7_132, %c0_133, %c0_134] : memref<9x1x256xf32, #tpu.memory_space<vmem>>, vector<1x1x256xf32>
    %228 = vector.shape_cast %227 : vector<1x1x256xf32> to vector<1x256xf32>
    %229 = vector.broadcast %228 : vector<1x256xf32> to vector<8x256xf32>
    %230 = arith.mulf %226, %229 : vector<8x256xf32>
    %231 = arith.addf %224, %230 : vector<8x256xf32>
    %232 = vector.extract_strided_slice %181 {offsets = [64, 0], sizes = [8, 256], strides = [1, 1]} : vector<72x256xf32> to vector<8x256xf32>
    %c239_i32_135 = arith.constant 239 : i32
    %233 = tpu.dynamic_rotate %232 by %c239_i32_135 dim 1 : vector<8x256xf32>, i32 -> vector<8x256xf32>
    %c8_136 = arith.constant 8 : index
    %c0_137 = arith.constant 0 : index
    %c0_138 = arith.constant 0 : index
    %234 = vector.load %arg3[%c8_136, %c0_137, %c0_138] : memref<9x1x256xf32, #tpu.memory_space<vmem>>, vector<1x1x256xf32>
    %235 = vector.shape_cast %234 : vector<1x1x256xf32> to vector<1x256xf32>
    %236 = vector.broadcast %235 : vector<1x256xf32> to vector<8x256xf32>
    %237 = arith.mulf %233, %236 : vector<8x256xf32>
    %238 = arith.addf %231, %237 : vector<8x256xf32>
    %239 = vector.broadcast %6 : vector<8x1xf32> to vector<8x256xf32>
    %240 = arith.addf %238, %239 : vector<8x256xf32>
    %cst_139 = arith.constant 0.0831853076 : f32
    %241 = vector.broadcast %cst_139 : f32 to vector<8x256xf32>
    %242 = arith.mulf %241, %240 : vector<8x256xf32>
    %243 = arith.subf %128, %242 : vector<8x256xf32>
    %cst_140 = arith.constant 1.0086906 : f32
    %244 = vector.broadcast %cst_140 : f32 to vector<8x256xf32>
    %245 = arith.mulf %244, %243 : vector<8x256xf32>
    %c0_141 = arith.constant 0 : index
    %c1_142 = arith.constant 1 : index
    %c0_143 = arith.constant 0 : index
    %c0_144 = arith.constant 0 : index
    %246 = vector.load %arg2[%c0_141, %c1_142, %c0_143, %c0_144] : memref<1x8x8x256xf32, #tpu.memory_space<vmem>>, vector<1x1x8x256xf32>
    %247 = vector.shape_cast %246 : vector<1x1x8x256xf32> to vector<8x256xf32>
    %cst_145 = arith.constant 0.017157143 : f32
    %248 = vector.broadcast %cst_145 : f32 to vector<8x256xf32>
    %249 = arith.mulf %248, %247 : vector<8x256xf32>
    %250 = arith.addf %245, %249 : vector<8x256xf32>
    %c17_i32_146 = arith.constant 17 : i32
    %251 = tpu.dynamic_rotate %250 by %c17_i32_146 dim 1 : vector<8x256xf32>, i32 -> vector<8x256xf32>
    %c0_147 = arith.constant 0 : index
    %c0_148 = arith.constant 0 : index
    %c0_149 = arith.constant 0 : index
    %252 = vector.load %arg3[%c0_147, %c0_148, %c0_149] : memref<9x1x256xf32, #tpu.memory_space<vmem>>, vector<1x1x256xf32>
    %253 = vector.shape_cast %252 : vector<1x1x256xf32> to vector<1x256xf32>
    %254 = vector.broadcast %253 : vector<1x256xf32> to vector<8x256xf32>
    %255 = arith.mulf %251, %254 : vector<8x256xf32>
    %c16_i32_150 = arith.constant 16 : i32
    %256 = tpu.dynamic_rotate %250 by %c16_i32_150 dim 1 : vector<8x256xf32>, i32 -> vector<8x256xf32>
    %c1_151 = arith.constant 1 : index
    %c0_152 = arith.constant 0 : index
    %c0_153 = arith.constant 0 : index
    %257 = vector.load %arg3[%c1_151, %c0_152, %c0_153] : memref<9x1x256xf32, #tpu.memory_space<vmem>>, vector<1x1x256xf32>
    %258 = vector.shape_cast %257 : vector<1x1x256xf32> to vector<1x256xf32>
    %259 = vector.broadcast %258 : vector<1x256xf32> to vector<8x256xf32>
    %260 = arith.mulf %256, %259 : vector<8x256xf32>
    %c15_i32_154 = arith.constant 15 : i32
    %261 = tpu.dynamic_rotate %250 by %c15_i32_154 dim 1 : vector<8x256xf32>, i32 -> vector<8x256xf32>
    %c2_155 = arith.constant 2 : index
    %c0_156 = arith.constant 0 : index
    %c0_157 = arith.constant 0 : index
    %262 = vector.load %arg3[%c2_155, %c0_156, %c0_157] : memref<9x1x256xf32, #tpu.memory_space<vmem>>, vector<1x1x256xf32>
    %263 = vector.shape_cast %262 : vector<1x1x256xf32> to vector<1x256xf32>
    %264 = vector.broadcast %263 : vector<1x256xf32> to vector<8x256xf32>
    %265 = arith.mulf %261, %264 : vector<8x256xf32>
    %c1_i32_158 = arith.constant 1 : i32
    %266 = tpu.dynamic_rotate %250 by %c1_i32_158 dim 1 : vector<8x256xf32>, i32 -> vector<8x256xf32>
    %c3_159 = arith.constant 3 : index
    %c0_160 = arith.constant 0 : index
    %c0_161 = arith.constant 0 : index
    %267 = vector.load %arg3[%c3_159, %c0_160, %c0_161] : memref<9x1x256xf32, #tpu.memory_space<vmem>>, vector<1x1x256xf32>
    %268 = vector.shape_cast %267 : vector<1x1x256xf32> to vector<1x256xf32>
    %269 = vector.broadcast %268 : vector<1x256xf32> to vector<8x256xf32>
    %270 = arith.mulf %266, %269 : vector<8x256xf32>
    %c255_i32_162 = arith.constant 255 : i32
    %271 = tpu.dynamic_rotate %250 by %c255_i32_162 dim 1 : vector<8x256xf32>, i32 -> vector<8x256xf32>
    %c5_163 = arith.constant 5 : index
    %c0_164 = arith.constant 0 : index
    %c0_165 = arith.constant 0 : index
    %272 = vector.load %arg3[%c5_163, %c0_164, %c0_165] : memref<9x1x256xf32, #tpu.memory_space<vmem>>, vector<1x1x256xf32>
    %273 = vector.shape_cast %272 : vector<1x1x256xf32> to vector<1x256xf32>
    %274 = vector.broadcast %273 : vector<1x256xf32> to vector<8x256xf32>
    %275 = arith.mulf %271, %274 : vector<8x256xf32>
    %c241_i32_166 = arith.constant 241 : i32
    %276 = tpu.dynamic_rotate %250 by %c241_i32_166 dim 1 : vector<8x256xf32>, i32 -> vector<8x256xf32>
    %c6_167 = arith.constant 6 : index
    %c0_168 = arith.constant 0 : index
    %c0_169 = arith.constant 0 : index
    %277 = vector.load %arg3[%c6_167, %c0_168, %c0_169] : memref<9x1x256xf32, #tpu.memory_space<vmem>>, vector<1x1x256xf32>
    %278 = vector.shape_cast %277 : vector<1x1x256xf32> to vector<1x256xf32>
    %279 = vector.broadcast %278 : vector<1x256xf32> to vector<8x256xf32>
    %280 = arith.mulf %276, %279 : vector<8x256xf32>
    %c240_i32_170 = arith.constant 240 : i32
    %281 = tpu.dynamic_rotate %250 by %c240_i32_170 dim 1 : vector<8x256xf32>, i32 -> vector<8x256xf32>
    %c7_171 = arith.constant 7 : index
    %c0_172 = arith.constant 0 : index
    %c0_173 = arith.constant 0 : index
    %282 = vector.load %arg3[%c7_171, %c0_172, %c0_173] : memref<9x1x256xf32, #tpu.memory_space<vmem>>, vector<1x1x256xf32>
    %283 = vector.shape_cast %282 : vector<1x1x256xf32> to vector<1x256xf32>
    %284 = vector.broadcast %283 : vector<1x256xf32> to vector<8x256xf32>
    %285 = arith.mulf %281, %284 : vector<8x256xf32>
    %c239_i32_174 = arith.constant 239 : i32
    %286 = tpu.dynamic_rotate %250 by %c239_i32_174 dim 1 : vector<8x256xf32>, i32 -> vector<8x256xf32>
    %c8_175 = arith.constant 8 : index
    %c0_176 = arith.constant 0 : index
    %c0_177 = arith.constant 0 : index
    %287 = vector.load %arg3[%c8_175, %c0_176, %c0_177] : memref<9x1x256xf32, #tpu.memory_space<vmem>>, vector<1x1x256xf32>
    %288 = vector.shape_cast %287 : vector<1x1x256xf32> to vector<1x256xf32>
    %289 = vector.broadcast %288 : vector<1x256xf32> to vector<8x256xf32>
    %290 = arith.mulf %286, %289 : vector<8x256xf32>
    %291 = tpu.concatenate %255, %260, %265, %270, %250, %275, %280, %285, %290 in 0 : vector<8x256xf32>, vector<8x256xf32>, vector<8x256xf32>, vector<8x256xf32>, vector<8x256xf32>, vector<8x256xf32>, vector<8x256xf32>, vector<8x256xf32>, vector<8x256xf32> -> vector<72x256xf32>
    %292 = arith.truncf %291 : vector<72x256xf32> to vector<72x256xbf16>
    %cst_178 = arith.constant dense<0.000000e+00> : vector<32x256xf32>
    %293 = tpu.matmul %2, %292, %cst_178 {dimension_numbers = #tpu.dot_dimension_numbers<[1], [0], [0], [1], [0, 0, 1, 1], [], []>} : vector<32x72xbf16>, vector<72x256xbf16>, vector<32x256xf32> -> vector<32x256xf32>
    %294 = vector.broadcast %4 : vector<32x1xf32> to vector<32x256xf32>
    %295 = arith.addf %293, %294 : vector<32x256xf32>
    %cst_179 = arith.constant 6.250000e-01 : f32
    %296 = vector.broadcast %cst_179 : f32 to vector<32x1xf32>
    %297 = arith.mulf %296, %5 : vector<32x1xf32>
    %298 = vector.broadcast %297 : vector<32x1xf32> to vector<32x256xf32>
    %299 = arith.addf %295, %298 : vector<32x256xf32>
    %cst_180 = arith.constant 0.000000e+00 : f32
    %300 = vector.broadcast %cst_180 : f32 to vector<32x256xf32>
    %301 = arith.maximumf %299, %300 : vector<32x256xf32>
    %302 = arith.truncf %301 : vector<32x256xf32> to vector<32x256xbf16>
    %cst_181 = arith.constant dense<0.000000e+00> : vector<72x256xf32>
    %303 = tpu.matmul %3, %302, %cst_181 {dimension_numbers = #tpu.dot_dimension_numbers<[1], [0], [0], [1], [0, 0, 1, 1], [], []>} : vector<72x32xbf16>, vector<32x256xbf16>, vector<72x256xf32> -> vector<72x256xf32>
    %304 = vector.extract_strided_slice %303 {offsets = [0, 0], sizes = [8, 256], strides = [1, 1]} : vector<72x256xf32> to vector<8x256xf32>
    %c17_i32_182 = arith.constant 17 : i32
    %305 = tpu.dynamic_rotate %304 by %c17_i32_182 dim 1 : vector<8x256xf32>, i32 -> vector<8x256xf32>
    %c0_183 = arith.constant 0 : index
    %c0_184 = arith.constant 0 : index
    %c0_185 = arith.constant 0 : index
    %306 = vector.load %arg3[%c0_183, %c0_184, %c0_185] : memref<9x1x256xf32, #tpu.memory_space<vmem>>, vector<1x1x256xf32>
    %307 = vector.shape_cast %306 : vector<1x1x256xf32> to vector<1x256xf32>
    %308 = vector.broadcast %307 : vector<1x256xf32> to vector<8x256xf32>
    %309 = arith.mulf %305, %308 : vector<8x256xf32>
    %310 = vector.extract_strided_slice %303 {offsets = [8, 0], sizes = [8, 256], strides = [1, 1]} : vector<72x256xf32> to vector<8x256xf32>
    %c16_i32_186 = arith.constant 16 : i32
    %311 = tpu.dynamic_rotate %310 by %c16_i32_186 dim 1 : vector<8x256xf32>, i32 -> vector<8x256xf32>
    %c1_187 = arith.constant 1 : index
    %c0_188 = arith.constant 0 : index
    %c0_189 = arith.constant 0 : index
    %312 = vector.load %arg3[%c1_187, %c0_188, %c0_189] : memref<9x1x256xf32, #tpu.memory_space<vmem>>, vector<1x1x256xf32>
    %313 = vector.shape_cast %312 : vector<1x1x256xf32> to vector<1x256xf32>
    %314 = vector.broadcast %313 : vector<1x256xf32> to vector<8x256xf32>
    %315 = arith.mulf %311, %314 : vector<8x256xf32>
    %316 = arith.addf %309, %315 : vector<8x256xf32>
    %317 = vector.extract_strided_slice %303 {offsets = [16, 0], sizes = [8, 256], strides = [1, 1]} : vector<72x256xf32> to vector<8x256xf32>
    %c15_i32_190 = arith.constant 15 : i32
    %318 = tpu.dynamic_rotate %317 by %c15_i32_190 dim 1 : vector<8x256xf32>, i32 -> vector<8x256xf32>
    %c2_191 = arith.constant 2 : index
    %c0_192 = arith.constant 0 : index
    %c0_193 = arith.constant 0 : index
    %319 = vector.load %arg3[%c2_191, %c0_192, %c0_193] : memref<9x1x256xf32, #tpu.memory_space<vmem>>, vector<1x1x256xf32>
    %320 = vector.shape_cast %319 : vector<1x1x256xf32> to vector<1x256xf32>
    %321 = vector.broadcast %320 : vector<1x256xf32> to vector<8x256xf32>
    %322 = arith.mulf %318, %321 : vector<8x256xf32>
    %323 = arith.addf %316, %322 : vector<8x256xf32>
    %324 = vector.extract_strided_slice %303 {offsets = [24, 0], sizes = [8, 256], strides = [1, 1]} : vector<72x256xf32> to vector<8x256xf32>
    %c1_i32_194 = arith.constant 1 : i32
    %325 = tpu.dynamic_rotate %324 by %c1_i32_194 dim 1 : vector<8x256xf32>, i32 -> vector<8x256xf32>
    %c3_195 = arith.constant 3 : index
    %c0_196 = arith.constant 0 : index
    %c0_197 = arith.constant 0 : index
    %326 = vector.load %arg3[%c3_195, %c0_196, %c0_197] : memref<9x1x256xf32, #tpu.memory_space<vmem>>, vector<1x1x256xf32>
    %327 = vector.shape_cast %326 : vector<1x1x256xf32> to vector<1x256xf32>
    %328 = vector.broadcast %327 : vector<1x256xf32> to vector<8x256xf32>
    %329 = arith.mulf %325, %328 : vector<8x256xf32>
    %330 = arith.addf %323, %329 : vector<8x256xf32>
    %331 = vector.extract_strided_slice %303 {offsets = [32, 0], sizes = [8, 256], strides = [1, 1]} : vector<72x256xf32> to vector<8x256xf32>
    %332 = arith.addf %330, %331 : vector<8x256xf32>
    %333 = vector.extract_strided_slice %303 {offsets = [40, 0], sizes = [8, 256], strides = [1, 1]} : vector<72x256xf32> to vector<8x256xf32>
    %c255_i32_198 = arith.constant 255 : i32
    %334 = tpu.dynamic_rotate %333 by %c255_i32_198 dim 1 : vector<8x256xf32>, i32 -> vector<8x256xf32>
    %c5_199 = arith.constant 5 : index
    %c0_200 = arith.constant 0 : index
    %c0_201 = arith.constant 0 : index
    %335 = vector.load %arg3[%c5_199, %c0_200, %c0_201] : memref<9x1x256xf32, #tpu.memory_space<vmem>>, vector<1x1x256xf32>
    %336 = vector.shape_cast %335 : vector<1x1x256xf32> to vector<1x256xf32>
    %337 = vector.broadcast %336 : vector<1x256xf32> to vector<8x256xf32>
    %338 = arith.mulf %334, %337 : vector<8x256xf32>
    %339 = arith.addf %332, %338 : vector<8x256xf32>
    %340 = vector.extract_strided_slice %303 {offsets = [48, 0], sizes = [8, 256], strides = [1, 1]} : vector<72x256xf32> to vector<8x256xf32>
    %c241_i32_202 = arith.constant 241 : i32
    %341 = tpu.dynamic_rotate %340 by %c241_i32_202 dim 1 : vector<8x256xf32>, i32 -> vector<8x256xf32>
    %c6_203 = arith.constant 6 : index
    %c0_204 = arith.constant 0 : index
    %c0_205 = arith.constant 0 : index
    %342 = vector.load %arg3[%c6_203, %c0_204, %c0_205] : memref<9x1x256xf32, #tpu.memory_space<vmem>>, vector<1x1x256xf32>
    %343 = vector.shape_cast %342 : vector<1x1x256xf32> to vector<1x256xf32>
    %344 = vector.broadcast %343 : vector<1x256xf32> to vector<8x256xf32>
    %345 = arith.mulf %341, %344 : vector<8x256xf32>
    %346 = arith.addf %339, %345 : vector<8x256xf32>
    %347 = vector.extract_strided_slice %303 {offsets = [56, 0], sizes = [8, 256], strides = [1, 1]} : vector<72x256xf32> to vector<8x256xf32>
    %c240_i32_206 = arith.constant 240 : i32
    %348 = tpu.dynamic_rotate %347 by %c240_i32_206 dim 1 : vector<8x256xf32>, i32 -> vector<8x256xf32>
    %c7_207 = arith.constant 7 : index
    %c0_208 = arith.constant 0 : index
    %c0_209 = arith.constant 0 : index
    %349 = vector.load %arg3[%c7_207, %c0_208, %c0_209] : memref<9x1x256xf32, #tpu.memory_space<vmem>>, vector<1x1x256xf32>
    %350 = vector.shape_cast %349 : vector<1x1x256xf32> to vector<1x256xf32>
    %351 = vector.broadcast %350 : vector<1x256xf32> to vector<8x256xf32>
    %352 = arith.mulf %348, %351 : vector<8x256xf32>
    %353 = arith.addf %346, %352 : vector<8x256xf32>
    %354 = vector.extract_strided_slice %303 {offsets = [64, 0], sizes = [8, 256], strides = [1, 1]} : vector<72x256xf32> to vector<8x256xf32>
    %c239_i32_210 = arith.constant 239 : i32
    %355 = tpu.dynamic_rotate %354 by %c239_i32_210 dim 1 : vector<8x256xf32>, i32 -> vector<8x256xf32>
    %c8_211 = arith.constant 8 : index
    %c0_212 = arith.constant 0 : index
    %c0_213 = arith.constant 0 : index
    %356 = vector.load %arg3[%c8_211, %c0_212, %c0_213] : memref<9x1x256xf32, #tpu.memory_space<vmem>>, vector<1x1x256xf32>
    %357 = vector.shape_cast %356 : vector<1x1x256xf32> to vector<1x256xf32>
    %358 = vector.broadcast %357 : vector<1x256xf32> to vector<8x256xf32>
    %359 = arith.mulf %355, %358 : vector<8x256xf32>
    %360 = arith.addf %353, %359 : vector<8x256xf32>
    %361 = vector.broadcast %6 : vector<8x1xf32> to vector<8x256xf32>
    %362 = arith.addf %360, %361 : vector<8x256xf32>
    %cst_214 = arith.constant 0.0845897123 : f32
    %363 = vector.broadcast %cst_214 : f32 to vector<8x256xf32>
    %364 = arith.mulf %363, %362 : vector<8x256xf32>
    %365 = arith.subf %250, %364 : vector<8x256xf32>
    %cst_215 = arith.constant 1.00723493 : f32
    %366 = vector.broadcast %cst_215 : f32 to vector<8x256xf32>
    %367 = arith.mulf %366, %365 : vector<8x256xf32>
    %c0_216 = arith.constant 0 : index
    %c2_217 = arith.constant 2 : index
    %c0_218 = arith.constant 0 : index
    %c0_219 = arith.constant 0 : index
    %368 = vector.load %arg2[%c0_216, %c2_217, %c0_218, %c0_219] : memref<1x8x8x256xf32, #tpu.memory_space<vmem>>, vector<1x1x8x256xf32>
    %369 = vector.shape_cast %368 : vector<1x1x8x256xf32> to vector<8x256xf32>
    %cst_220 = arith.constant 0.0143142855 : f32
    %370 = vector.broadcast %cst_220 : f32 to vector<8x256xf32>
    %371 = arith.mulf %370, %369 : vector<8x256xf32>
    %372 = arith.addf %367, %371 : vector<8x256xf32>
    %c17_i32_221 = arith.constant 17 : i32
    %373 = tpu.dynamic_rotate %372 by %c17_i32_221 dim 1 : vector<8x256xf32>, i32 -> vector<8x256xf32>
    %c0_222 = arith.constant 0 : index
    %c0_223 = arith.constant 0 : index
    %c0_224 = arith.constant 0 : index
    %374 = vector.load %arg3[%c0_222, %c0_223, %c0_224] : memref<9x1x256xf32, #tpu.memory_space<vmem>>, vector<1x1x256xf32>
    %375 = vector.shape_cast %374 : vector<1x1x256xf32> to vector<1x256xf32>
    %376 = vector.broadcast %375 : vector<1x256xf32> to vector<8x256xf32>
    %377 = arith.mulf %373, %376 : vector<8x256xf32>
    %c16_i32_225 = arith.constant 16 : i32
    %378 = tpu.dynamic_rotate %372 by %c16_i32_225 dim 1 : vector<8x256xf32>, i32 -> vector<8x256xf32>
    %c1_226 = arith.constant 1 : index
    %c0_227 = arith.constant 0 : index
    %c0_228 = arith.constant 0 : index
    %379 = vector.load %arg3[%c1_226, %c0_227, %c0_228] : memref<9x1x256xf32, #tpu.memory_space<vmem>>, vector<1x1x256xf32>
    %380 = vector.shape_cast %379 : vector<1x1x256xf32> to vector<1x256xf32>
    %381 = vector.broadcast %380 : vector<1x256xf32> to vector<8x256xf32>
    %382 = arith.mulf %378, %381 : vector<8x256xf32>
    %c15_i32_229 = arith.constant 15 : i32
    %383 = tpu.dynamic_rotate %372 by %c15_i32_229 dim 1 : vector<8x256xf32>, i32 -> vector<8x256xf32>
    %c2_230 = arith.constant 2 : index
    %c0_231 = arith.constant 0 : index
    %c0_232 = arith.constant 0 : index
    %384 = vector.load %arg3[%c2_230, %c0_231, %c0_232] : memref<9x1x256xf32, #tpu.memory_space<vmem>>, vector<1x1x256xf32>
    %385 = vector.shape_cast %384 : vector<1x1x256xf32> to vector<1x256xf32>
    %386 = vector.broadcast %385 : vector<1x256xf32> to vector<8x256xf32>
    %387 = arith.mulf %383, %386 : vector<8x256xf32>
    %c1_i32_233 = arith.constant 1 : i32
    %388 = tpu.dynamic_rotate %372 by %c1_i32_233 dim 1 : vector<8x256xf32>, i32 -> vector<8x256xf32>
    %c3_234 = arith.constant 3 : index
    %c0_235 = arith.constant 0 : index
    %c0_236 = arith.constant 0 : index
    %389 = vector.load %arg3[%c3_234, %c0_235, %c0_236] : memref<9x1x256xf32, #tpu.memory_space<vmem>>, vector<1x1x256xf32>
    %390 = vector.shape_cast %389 : vector<1x1x256xf32> to vector<1x256xf32>
    %391 = vector.broadcast %390 : vector<1x256xf32> to vector<8x256xf32>
    %392 = arith.mulf %388, %391 : vector<8x256xf32>
    %c255_i32_237 = arith.constant 255 : i32
    %393 = tpu.dynamic_rotate %372 by %c255_i32_237 dim 1 : vector<8x256xf32>, i32 -> vector<8x256xf32>
    %c5_238 = arith.constant 5 : index
    %c0_239 = arith.constant 0 : index
    %c0_240 = arith.constant 0 : index
    %394 = vector.load %arg3[%c5_238, %c0_239, %c0_240] : memref<9x1x256xf32, #tpu.memory_space<vmem>>, vector<1x1x256xf32>
    %395 = vector.shape_cast %394 : vector<1x1x256xf32> to vector<1x256xf32>
    %396 = vector.broadcast %395 : vector<1x256xf32> to vector<8x256xf32>
    %397 = arith.mulf %393, %396 : vector<8x256xf32>
    %c241_i32_241 = arith.constant 241 : i32
    %398 = tpu.dynamic_rotate %372 by %c241_i32_241 dim 1 : vector<8x256xf32>, i32 -> vector<8x256xf32>
    %c6_242 = arith.constant 6 : index
    %c0_243 = arith.constant 0 : index
    %c0_244 = arith.constant 0 : index
    %399 = vector.load %arg3[%c6_242, %c0_243, %c0_244] : memref<9x1x256xf32, #tpu.memory_space<vmem>>, vector<1x1x256xf32>
    %400 = vector.shape_cast %399 : vector<1x1x256xf32> to vector<1x256xf32>
    %401 = vector.broadcast %400 : vector<1x256xf32> to vector<8x256xf32>
    %402 = arith.mulf %398, %401 : vector<8x256xf32>
    %c240_i32_245 = arith.constant 240 : i32
    %403 = tpu.dynamic_rotate %372 by %c240_i32_245 dim 1 : vector<8x256xf32>, i32 -> vector<8x256xf32>
    %c7_246 = arith.constant 7 : index
    %c0_247 = arith.constant 0 : index
    %c0_248 = arith.constant 0 : index
    %404 = vector.load %arg3[%c7_246, %c0_247, %c0_248] : memref<9x1x256xf32, #tpu.memory_space<vmem>>, vector<1x1x256xf32>
    %405 = vector.shape_cast %404 : vector<1x1x256xf32> to vector<1x256xf32>
    %406 = vector.broadcast %405 : vector<1x256xf32> to vector<8x256xf32>
    %407 = arith.mulf %403, %406 : vector<8x256xf32>
    %c239_i32_249 = arith.constant 239 : i32
    %408 = tpu.dynamic_rotate %372 by %c239_i32_249 dim 1 : vector<8x256xf32>, i32 -> vector<8x256xf32>
    %c8_250 = arith.constant 8 : index
    %c0_251 = arith.constant 0 : index
    %c0_252 = arith.constant 0 : index
    %409 = vector.load %arg3[%c8_250, %c0_251, %c0_252] : memref<9x1x256xf32, #tpu.memory_space<vmem>>, vector<1x1x256xf32>
    %410 = vector.shape_cast %409 : vector<1x1x256xf32> to vector<1x256xf32>
    %411 = vector.broadcast %410 : vector<1x256xf32> to vector<8x256xf32>
    %412 = arith.mulf %408, %411 : vector<8x256xf32>
    %413 = tpu.concatenate %377, %382, %387, %392, %372, %397, %402, %407, %412 in 0 : vector<8x256xf32>, vector<8x256xf32>, vector<8x256xf32>, vector<8x256xf32>, vector<8x256xf32>, vector<8x256xf32>, vector<8x256xf32>, vector<8x256xf32>, vector<8x256xf32> -> vector<72x256xf32>
    %414 = arith.truncf %413 : vector<72x256xf32> to vector<72x256xbf16>
    %cst_253 = arith.constant dense<0.000000e+00> : vector<32x256xf32>
    %415 = tpu.matmul %2, %414, %cst_253 {dimension_numbers = #tpu.dot_dimension_numbers<[1], [0], [0], [1], [0, 0, 1, 1], [], []>} : vector<32x72xbf16>, vector<72x256xbf16>, vector<32x256xf32> -> vector<32x256xf32>
    %416 = vector.broadcast %4 : vector<32x1xf32> to vector<32x256xf32>
    %417 = arith.addf %415, %416 : vector<32x256xf32>
    %cst_254 = arith.constant 5.000000e-01 : f32
    %418 = vector.broadcast %cst_254 : f32 to vector<32x1xf32>
    %419 = arith.mulf %418, %5 : vector<32x1xf32>
    %420 = vector.broadcast %419 : vector<32x1xf32> to vector<32x256xf32>
    %421 = arith.addf %417, %420 : vector<32x256xf32>
    %cst_255 = arith.constant 0.000000e+00 : f32
    %422 = vector.broadcast %cst_255 : f32 to vector<32x256xf32>
    %423 = arith.maximumf %421, %422 : vector<32x256xf32>
    %424 = arith.truncf %423 : vector<32x256xf32> to vector<32x256xbf16>
    %cst_256 = arith.constant dense<0.000000e+00> : vector<72x256xf32>
    %425 = tpu.matmul %3, %424, %cst_256 {dimension_numbers = #tpu.dot_dimension_numbers<[1], [0], [0], [1], [0, 0, 1, 1], [], []>} : vector<72x32xbf16>, vector<32x256xbf16>, vector<72x256xf32> -> vector<72x256xf32>
    %426 = vector.extract_strided_slice %425 {offsets = [0, 0], sizes = [8, 256], strides = [1, 1]} : vector<72x256xf32> to vector<8x256xf32>
    %c17_i32_257 = arith.constant 17 : i32
    %427 = tpu.dynamic_rotate %426 by %c17_i32_257 dim 1 : vector<8x256xf32>, i32 -> vector<8x256xf32>
    %c0_258 = arith.constant 0 : index
    %c0_259 = arith.constant 0 : index
    %c0_260 = arith.constant 0 : index
    %428 = vector.load %arg3[%c0_258, %c0_259, %c0_260] : memref<9x1x256xf32, #tpu.memory_space<vmem>>, vector<1x1x256xf32>
    %429 = vector.shape_cast %428 : vector<1x1x256xf32> to vector<1x256xf32>
    %430 = vector.broadcast %429 : vector<1x256xf32> to vector<8x256xf32>
    %431 = arith.mulf %427, %430 : vector<8x256xf32>
    %432 = vector.extract_strided_slice %425 {offsets = [8, 0], sizes = [8, 256], strides = [1, 1]} : vector<72x256xf32> to vector<8x256xf32>
    %c16_i32_261 = arith.constant 16 : i32
    %433 = tpu.dynamic_rotate %432 by %c16_i32_261 dim 1 : vector<8x256xf32>, i32 -> vector<8x256xf32>
    %c1_262 = arith.constant 1 : index
    %c0_263 = arith.constant 0 : index
    %c0_264 = arith.constant 0 : index
    %434 = vector.load %arg3[%c1_262, %c0_263, %c0_264] : memref<9x1x256xf32, #tpu.memory_space<vmem>>, vector<1x1x256xf32>
    %435 = vector.shape_cast %434 : vector<1x1x256xf32> to vector<1x256xf32>
    %436 = vector.broadcast %435 : vector<1x256xf32> to vector<8x256xf32>
    %437 = arith.mulf %433, %436 : vector<8x256xf32>
    %438 = arith.addf %431, %437 : vector<8x256xf32>
    %439 = vector.extract_strided_slice %425 {offsets = [16, 0], sizes = [8, 256], strides = [1, 1]} : vector<72x256xf32> to vector<8x256xf32>
    %c15_i32_265 = arith.constant 15 : i32
    %440 = tpu.dynamic_rotate %439 by %c15_i32_265 dim 1 : vector<8x256xf32>, i32 -> vector<8x256xf32>
    %c2_266 = arith.constant 2 : index
    %c0_267 = arith.constant 0 : index
    %c0_268 = arith.constant 0 : index
    %441 = vector.load %arg3[%c2_266, %c0_267, %c0_268] : memref<9x1x256xf32, #tpu.memory_space<vmem>>, vector<1x1x256xf32>
    %442 = vector.shape_cast %441 : vector<1x1x256xf32> to vector<1x256xf32>
    %443 = vector.broadcast %442 : vector<1x256xf32> to vector<8x256xf32>
    %444 = arith.mulf %440, %443 : vector<8x256xf32>
    %445 = arith.addf %438, %444 : vector<8x256xf32>
    %446 = vector.extract_strided_slice %425 {offsets = [24, 0], sizes = [8, 256], strides = [1, 1]} : vector<72x256xf32> to vector<8x256xf32>
    %c1_i32_269 = arith.constant 1 : i32
    %447 = tpu.dynamic_rotate %446 by %c1_i32_269 dim 1 : vector<8x256xf32>, i32 -> vector<8x256xf32>
    %c3_270 = arith.constant 3 : index
    %c0_271 = arith.constant 0 : index
    %c0_272 = arith.constant 0 : index
    %448 = vector.load %arg3[%c3_270, %c0_271, %c0_272] : memref<9x1x256xf32, #tpu.memory_space<vmem>>, vector<1x1x256xf32>
    %449 = vector.shape_cast %448 : vector<1x1x256xf32> to vector<1x256xf32>
    %450 = vector.broadcast %449 : vector<1x256xf32> to vector<8x256xf32>
    %451 = arith.mulf %447, %450 : vector<8x256xf32>
    %452 = arith.addf %445, %451 : vector<8x256xf32>
    %453 = vector.extract_strided_slice %425 {offsets = [32, 0], sizes = [8, 256], strides = [1, 1]} : vector<72x256xf32> to vector<8x256xf32>
    %454 = arith.addf %452, %453 : vector<8x256xf32>
    %455 = vector.extract_strided_slice %425 {offsets = [40, 0], sizes = [8, 256], strides = [1, 1]} : vector<72x256xf32> to vector<8x256xf32>
    %c255_i32_273 = arith.constant 255 : i32
    %456 = tpu.dynamic_rotate %455 by %c255_i32_273 dim 1 : vector<8x256xf32>, i32 -> vector<8x256xf32>
    %c5_274 = arith.constant 5 : index
    %c0_275 = arith.constant 0 : index
    %c0_276 = arith.constant 0 : index
    %457 = vector.load %arg3[%c5_274, %c0_275, %c0_276] : memref<9x1x256xf32, #tpu.memory_space<vmem>>, vector<1x1x256xf32>
    %458 = vector.shape_cast %457 : vector<1x1x256xf32> to vector<1x256xf32>
    %459 = vector.broadcast %458 : vector<1x256xf32> to vector<8x256xf32>
    %460 = arith.mulf %456, %459 : vector<8x256xf32>
    %461 = arith.addf %454, %460 : vector<8x256xf32>
    %462 = vector.extract_strided_slice %425 {offsets = [48, 0], sizes = [8, 256], strides = [1, 1]} : vector<72x256xf32> to vector<8x256xf32>
    %c241_i32_277 = arith.constant 241 : i32
    %463 = tpu.dynamic_rotate %462 by %c241_i32_277 dim 1 : vector<8x256xf32>, i32 -> vector<8x256xf32>
    %c6_278 = arith.constant 6 : index
    %c0_279 = arith.constant 0 : index
    %c0_280 = arith.constant 0 : index
    %464 = vector.load %arg3[%c6_278, %c0_279, %c0_280] : memref<9x1x256xf32, #tpu.memory_space<vmem>>, vector<1x1x256xf32>
    %465 = vector.shape_cast %464 : vector<1x1x256xf32> to vector<1x256xf32>
    %466 = vector.broadcast %465 : vector<1x256xf32> to vector<8x256xf32>
    %467 = arith.mulf %463, %466 : vector<8x256xf32>
    %468 = arith.addf %461, %467 : vector<8x256xf32>
    %469 = vector.extract_strided_slice %425 {offsets = [56, 0], sizes = [8, 256], strides = [1, 1]} : vector<72x256xf32> to vector<8x256xf32>
    %c240_i32_281 = arith.constant 240 : i32
    %470 = tpu.dynamic_rotate %469 by %c240_i32_281 dim 1 : vector<8x256xf32>, i32 -> vector<8x256xf32>
    %c7_282 = arith.constant 7 : index
    %c0_283 = arith.constant 0 : index
    %c0_284 = arith.constant 0 : index
    %471 = vector.load %arg3[%c7_282, %c0_283, %c0_284] : memref<9x1x256xf32, #tpu.memory_space<vmem>>, vector<1x1x256xf32>
    %472 = vector.shape_cast %471 : vector<1x1x256xf32> to vector<1x256xf32>
    %473 = vector.broadcast %472 : vector<1x256xf32> to vector<8x256xf32>
    %474 = arith.mulf %470, %473 : vector<8x256xf32>
    %475 = arith.addf %468, %474 : vector<8x256xf32>
    %476 = vector.extract_strided_slice %425 {offsets = [64, 0], sizes = [8, 256], strides = [1, 1]} : vector<72x256xf32> to vector<8x256xf32>
    %c239_i32_285 = arith.constant 239 : i32
    %477 = tpu.dynamic_rotate %476 by %c239_i32_285 dim 1 : vector<8x256xf32>, i32 -> vector<8x256xf32>
    %c8_286 = arith.constant 8 : index
    %c0_287 = arith.constant 0 : index
    %c0_288 = arith.constant 0 : index
    %478 = vector.load %arg3[%c8_286, %c0_287, %c0_288] : memref<9x1x256xf32, #tpu.memory_space<vmem>>, vector<1x1x256xf32>
    %479 = vector.shape_cast %478 : vector<1x1x256xf32> to vector<1x256xf32>
    %480 = vector.broadcast %479 : vector<1x256xf32> to vector<8x256xf32>
    %481 = arith.mulf %477, %480 : vector<8x256xf32>
    %482 = arith.addf %475, %481 : vector<8x256xf32>
    %483 = vector.broadcast %6 : vector<8x1xf32> to vector<8x256xf32>
    %484 = arith.addf %482, %483 : vector<8x256xf32>
    %cst_289 = arith.constant 0.087056823 : f32
    %485 = vector.broadcast %cst_289 : f32 to vector<8x256xf32>
    %486 = arith.mulf %485, %484 : vector<8x256xf32>
    %487 = arith.subf %372, %486 : vector<8x256xf32>
    %cst_290 = arith.constant 1.00578558 : f32
    %488 = vector.broadcast %cst_290 : f32 to vector<8x256xf32>
    %489 = arith.mulf %488, %487 : vector<8x256xf32>
    %c0_291 = arith.constant 0 : index
    %c3_292 = arith.constant 3 : index
    %c0_293 = arith.constant 0 : index
    %c0_294 = arith.constant 0 : index
    %490 = vector.load %arg2[%c0_291, %c3_292, %c0_293, %c0_294] : memref<1x8x8x256xf32, #tpu.memory_space<vmem>>, vector<1x1x8x256xf32>
    %491 = vector.shape_cast %490 : vector<1x1x8x256xf32> to vector<8x256xf32>
    %cst_295 = arith.constant 0.0114714289 : f32
    %492 = vector.broadcast %cst_295 : f32 to vector<8x256xf32>
    %493 = arith.mulf %492, %491 : vector<8x256xf32>
    %494 = arith.addf %489, %493 : vector<8x256xf32>
    %c17_i32_296 = arith.constant 17 : i32
    %495 = tpu.dynamic_rotate %494 by %c17_i32_296 dim 1 : vector<8x256xf32>, i32 -> vector<8x256xf32>
    %c0_297 = arith.constant 0 : index
    %c0_298 = arith.constant 0 : index
    %c0_299 = arith.constant 0 : index
    %496 = vector.load %arg3[%c0_297, %c0_298, %c0_299] : memref<9x1x256xf32, #tpu.memory_space<vmem>>, vector<1x1x256xf32>
    %497 = vector.shape_cast %496 : vector<1x1x256xf32> to vector<1x256xf32>
    %498 = vector.broadcast %497 : vector<1x256xf32> to vector<8x256xf32>
    %499 = arith.mulf %495, %498 : vector<8x256xf32>
    %c16_i32_300 = arith.constant 16 : i32
    %500 = tpu.dynamic_rotate %494 by %c16_i32_300 dim 1 : vector<8x256xf32>, i32 -> vector<8x256xf32>
    %c1_301 = arith.constant 1 : index
    %c0_302 = arith.constant 0 : index
    %c0_303 = arith.constant 0 : index
    %501 = vector.load %arg3[%c1_301, %c0_302, %c0_303] : memref<9x1x256xf32, #tpu.memory_space<vmem>>, vector<1x1x256xf32>
    %502 = vector.shape_cast %501 : vector<1x1x256xf32> to vector<1x256xf32>
    %503 = vector.broadcast %502 : vector<1x256xf32> to vector<8x256xf32>
    %504 = arith.mulf %500, %503 : vector<8x256xf32>
    %c15_i32_304 = arith.constant 15 : i32
    %505 = tpu.dynamic_rotate %494 by %c15_i32_304 dim 1 : vector<8x256xf32>, i32 -> vector<8x256xf32>
    %c2_305 = arith.constant 2 : index
    %c0_306 = arith.constant 0 : index
    %c0_307 = arith.constant 0 : index
    %506 = vector.load %arg3[%c2_305, %c0_306, %c0_307] : memref<9x1x256xf32, #tpu.memory_space<vmem>>, vector<1x1x256xf32>
    %507 = vector.shape_cast %506 : vector<1x1x256xf32> to vector<1x256xf32>
    %508 = vector.broadcast %507 : vector<1x256xf32> to vector<8x256xf32>
    %509 = arith.mulf %505, %508 : vector<8x256xf32>
    %c1_i32_308 = arith.constant 1 : i32
    %510 = tpu.dynamic_rotate %494 by %c1_i32_308 dim 1 : vector<8x256xf32>, i32 -> vector<8x256xf32>
    %c3_309 = arith.constant 3 : index
    %c0_310 = arith.constant 0 : index
    %c0_311 = arith.constant 0 : index
    %511 = vector.load %arg3[%c3_309, %c0_310, %c0_311] : memref<9x1x256xf32, #tpu.memory_space<vmem>>, vector<1x1x256xf32>
    %512 = vector.shape_cast %511 : vector<1x1x256xf32> to vector<1x256xf32>
    %513 = vector.broadcast %512 : vector<1x256xf32> to vector<8x256xf32>
    %514 = arith.mulf %510, %513 : vector<8x256xf32>
    %c255_i32_312 = arith.constant 255 : i32
    %515 = tpu.dynamic_rotate %494 by %c255_i32_312 dim 1 : vector<8x256xf32>, i32 -> vector<8x256xf32>
    %c5_313 = arith.constant 5 : index
    %c0_314 = arith.constant 0 : index
    %c0_315 = arith.constant 0 : index
    %516 = vector.load %arg3[%c5_313, %c0_314, %c0_315] : memref<9x1x256xf32, #tpu.memory_space<vmem>>, vector<1x1x256xf32>
    %517 = vector.shape_cast %516 : vector<1x1x256xf32> to vector<1x256xf32>
    %518 = vector.broadcast %517 : vector<1x256xf32> to vector<8x256xf32>
    %519 = arith.mulf %515, %518 : vector<8x256xf32>
    %c241_i32_316 = arith.constant 241 : i32
    %520 = tpu.dynamic_rotate %494 by %c241_i32_316 dim 1 : vector<8x256xf32>, i32 -> vector<8x256xf32>
    %c6_317 = arith.constant 6 : index
    %c0_318 = arith.constant 0 : index
    %c0_319 = arith.constant 0 : index
    %521 = vector.load %arg3[%c6_317, %c0_318, %c0_319] : memref<9x1x256xf32, #tpu.memory_space<vmem>>, vector<1x1x256xf32>
    %522 = vector.shape_cast %521 : vector<1x1x256xf32> to vector<1x256xf32>
    %523 = vector.broadcast %522 : vector<1x256xf32> to vector<8x256xf32>
    %524 = arith.mulf %520, %523 : vector<8x256xf32>
    %c240_i32_320 = arith.constant 240 : i32
    %525 = tpu.dynamic_rotate %494 by %c240_i32_320 dim 1 : vector<8x256xf32>, i32 -> vector<8x256xf32>
    %c7_321 = arith.constant 7 : index
    %c0_322 = arith.constant 0 : index
    %c0_323 = arith.constant 0 : index
    %526 = vector.load %arg3[%c7_321, %c0_322, %c0_323] : memref<9x1x256xf32, #tpu.memory_space<vmem>>, vector<1x1x256xf32>
    %527 = vector.shape_cast %526 : vector<1x1x256xf32> to vector<1x256xf32>
    %528 = vector.broadcast %527 : vector<1x256xf32> to vector<8x256xf32>
    %529 = arith.mulf %525, %528 : vector<8x256xf32>
    %c239_i32_324 = arith.constant 239 : i32
    %530 = tpu.dynamic_rotate %494 by %c239_i32_324 dim 1 : vector<8x256xf32>, i32 -> vector<8x256xf32>
    %c8_325 = arith.constant 8 : index
    %c0_326 = arith.constant 0 : index
    %c0_327 = arith.constant 0 : index
    %531 = vector.load %arg3[%c8_325, %c0_326, %c0_327] : memref<9x1x256xf32, #tpu.memory_space<vmem>>, vector<1x1x256xf32>
    %532 = vector.shape_cast %531 : vector<1x1x256xf32> to vector<1x256xf32>
    %533 = vector.broadcast %532 : vector<1x256xf32> to vector<8x256xf32>
    %534 = arith.mulf %530, %533 : vector<8x256xf32>
    %535 = tpu.concatenate %499, %504, %509, %514, %494, %519, %524, %529, %534 in 0 : vector<8x256xf32>, vector<8x256xf32>, vector<8x256xf32>, vector<8x256xf32>, vector<8x256xf32>, vector<8x256xf32>, vector<8x256xf32>, vector<8x256xf32>, vector<8x256xf32> -> vector<72x256xf32>
    %536 = arith.truncf %535 : vector<72x256xf32> to vector<72x256xbf16>
    %cst_328 = arith.constant dense<0.000000e+00> : vector<32x256xf32>
    %537 = tpu.matmul %2, %536, %cst_328 {dimension_numbers = #tpu.dot_dimension_numbers<[1], [0], [0], [1], [0, 0, 1, 1], [], []>} : vector<32x72xbf16>, vector<72x256xbf16>, vector<32x256xf32> -> vector<32x256xf32>
    %538 = vector.broadcast %4 : vector<32x1xf32> to vector<32x256xf32>
    %539 = arith.addf %537, %538 : vector<32x256xf32>
    %cst_329 = arith.constant 3.750000e-01 : f32
    %540 = vector.broadcast %cst_329 : f32 to vector<32x1xf32>
    %541 = arith.mulf %540, %5 : vector<32x1xf32>
    %542 = vector.broadcast %541 : vector<32x1xf32> to vector<32x256xf32>
    %543 = arith.addf %539, %542 : vector<32x256xf32>
    %cst_330 = arith.constant 0.000000e+00 : f32
    %544 = vector.broadcast %cst_330 : f32 to vector<32x256xf32>
    %545 = arith.maximumf %543, %544 : vector<32x256xf32>
    %546 = arith.truncf %545 : vector<32x256xf32> to vector<32x256xbf16>
    %cst_331 = arith.constant dense<0.000000e+00> : vector<72x256xf32>
    %547 = tpu.matmul %3, %546, %cst_331 {dimension_numbers = #tpu.dot_dimension_numbers<[1], [0], [0], [1], [0, 0, 1, 1], [], []>} : vector<72x32xbf16>, vector<32x256xbf16>, vector<72x256xf32> -> vector<72x256xf32>
    %548 = vector.extract_strided_slice %547 {offsets = [0, 0], sizes = [8, 256], strides = [1, 1]} : vector<72x256xf32> to vector<8x256xf32>
    %c17_i32_332 = arith.constant 17 : i32
    %549 = tpu.dynamic_rotate %548 by %c17_i32_332 dim 1 : vector<8x256xf32>, i32 -> vector<8x256xf32>
    %c0_333 = arith.constant 0 : index
    %c0_334 = arith.constant 0 : index
    %c0_335 = arith.constant 0 : index
    %550 = vector.load %arg3[%c0_333, %c0_334, %c0_335] : memref<9x1x256xf32, #tpu.memory_space<vmem>>, vector<1x1x256xf32>
    %551 = vector.shape_cast %550 : vector<1x1x256xf32> to vector<1x256xf32>
    %552 = vector.broadcast %551 : vector<1x256xf32> to vector<8x256xf32>
    %553 = arith.mulf %549, %552 : vector<8x256xf32>
    %554 = vector.extract_strided_slice %547 {offsets = [8, 0], sizes = [8, 256], strides = [1, 1]} : vector<72x256xf32> to vector<8x256xf32>
    %c16_i32_336 = arith.constant 16 : i32
    %555 = tpu.dynamic_rotate %554 by %c16_i32_336 dim 1 : vector<8x256xf32>, i32 -> vector<8x256xf32>
    %c1_337 = arith.constant 1 : index
    %c0_338 = arith.constant 0 : index
    %c0_339 = arith.constant 0 : index
    %556 = vector.load %arg3[%c1_337, %c0_338, %c0_339] : memref<9x1x256xf32, #tpu.memory_space<vmem>>, vector<1x1x256xf32>
    %557 = vector.shape_cast %556 : vector<1x1x256xf32> to vector<1x256xf32>
    %558 = vector.broadcast %557 : vector<1x256xf32> to vector<8x256xf32>
    %559 = arith.mulf %555, %558 : vector<8x256xf32>
    %560 = arith.addf %553, %559 : vector<8x256xf32>
    %561 = vector.extract_strided_slice %547 {offsets = [16, 0], sizes = [8, 256], strides = [1, 1]} : vector<72x256xf32> to vector<8x256xf32>
    %c15_i32_340 = arith.constant 15 : i32
    %562 = tpu.dynamic_rotate %561 by %c15_i32_340 dim 1 : vector<8x256xf32>, i32 -> vector<8x256xf32>
    %c2_341 = arith.constant 2 : index
    %c0_342 = arith.constant 0 : index
    %c0_343 = arith.constant 0 : index
    %563 = vector.load %arg3[%c2_341, %c0_342, %c0_343] : memref<9x1x256xf32, #tpu.memory_space<vmem>>, vector<1x1x256xf32>
    %564 = vector.shape_cast %563 : vector<1x1x256xf32> to vector<1x256xf32>
    %565 = vector.broadcast %564 : vector<1x256xf32> to vector<8x256xf32>
    %566 = arith.mulf %562, %565 : vector<8x256xf32>
    %567 = arith.addf %560, %566 : vector<8x256xf32>
    %568 = vector.extract_strided_slice %547 {offsets = [24, 0], sizes = [8, 256], strides = [1, 1]} : vector<72x256xf32> to vector<8x256xf32>
    %c1_i32_344 = arith.constant 1 : i32
    %569 = tpu.dynamic_rotate %568 by %c1_i32_344 dim 1 : vector<8x256xf32>, i32 -> vector<8x256xf32>
    %c3_345 = arith.constant 3 : index
    %c0_346 = arith.constant 0 : index
    %c0_347 = arith.constant 0 : index
    %570 = vector.load %arg3[%c3_345, %c0_346, %c0_347] : memref<9x1x256xf32, #tpu.memory_space<vmem>>, vector<1x1x256xf32>
    %571 = vector.shape_cast %570 : vector<1x1x256xf32> to vector<1x256xf32>
    %572 = vector.broadcast %571 : vector<1x256xf32> to vector<8x256xf32>
    %573 = arith.mulf %569, %572 : vector<8x256xf32>
    %574 = arith.addf %567, %573 : vector<8x256xf32>
    %575 = vector.extract_strided_slice %547 {offsets = [32, 0], sizes = [8, 256], strides = [1, 1]} : vector<72x256xf32> to vector<8x256xf32>
    %576 = arith.addf %574, %575 : vector<8x256xf32>
    %577 = vector.extract_strided_slice %547 {offsets = [40, 0], sizes = [8, 256], strides = [1, 1]} : vector<72x256xf32> to vector<8x256xf32>
    %c255_i32_348 = arith.constant 255 : i32
    %578 = tpu.dynamic_rotate %577 by %c255_i32_348 dim 1 : vector<8x256xf32>, i32 -> vector<8x256xf32>
    %c5_349 = arith.constant 5 : index
    %c0_350 = arith.constant 0 : index
    %c0_351 = arith.constant 0 : index
    %579 = vector.load %arg3[%c5_349, %c0_350, %c0_351] : memref<9x1x256xf32, #tpu.memory_space<vmem>>, vector<1x1x256xf32>
    %580 = vector.shape_cast %579 : vector<1x1x256xf32> to vector<1x256xf32>
    %581 = vector.broadcast %580 : vector<1x256xf32> to vector<8x256xf32>
    %582 = arith.mulf %578, %581 : vector<8x256xf32>
    %583 = arith.addf %576, %582 : vector<8x256xf32>
    %584 = vector.extract_strided_slice %547 {offsets = [48, 0], sizes = [8, 256], strides = [1, 1]} : vector<72x256xf32> to vector<8x256xf32>
    %c241_i32_352 = arith.constant 241 : i32
    %585 = tpu.dynamic_rotate %584 by %c241_i32_352 dim 1 : vector<8x256xf32>, i32 -> vector<8x256xf32>
    %c6_353 = arith.constant 6 : index
    %c0_354 = arith.constant 0 : index
    %c0_355 = arith.constant 0 : index
    %586 = vector.load %arg3[%c6_353, %c0_354, %c0_355] : memref<9x1x256xf32, #tpu.memory_space<vmem>>, vector<1x1x256xf32>
    %587 = vector.shape_cast %586 : vector<1x1x256xf32> to vector<1x256xf32>
    %588 = vector.broadcast %587 : vector<1x256xf32> to vector<8x256xf32>
    %589 = arith.mulf %585, %588 : vector<8x256xf32>
    %590 = arith.addf %583, %589 : vector<8x256xf32>
    %591 = vector.extract_strided_slice %547 {offsets = [56, 0], sizes = [8, 256], strides = [1, 1]} : vector<72x256xf32> to vector<8x256xf32>
    %c240_i32_356 = arith.constant 240 : i32
    %592 = tpu.dynamic_rotate %591 by %c240_i32_356 dim 1 : vector<8x256xf32>, i32 -> vector<8x256xf32>
    %c7_357 = arith.constant 7 : index
    %c0_358 = arith.constant 0 : index
    %c0_359 = arith.constant 0 : index
    %593 = vector.load %arg3[%c7_357, %c0_358, %c0_359] : memref<9x1x256xf32, #tpu.memory_space<vmem>>, vector<1x1x256xf32>
    %594 = vector.shape_cast %593 : vector<1x1x256xf32> to vector<1x256xf32>
    %595 = vector.broadcast %594 : vector<1x256xf32> to vector<8x256xf32>
    %596 = arith.mulf %592, %595 : vector<8x256xf32>
    %597 = arith.addf %590, %596 : vector<8x256xf32>
    %598 = vector.extract_strided_slice %547 {offsets = [64, 0], sizes = [8, 256], strides = [1, 1]} : vector<72x256xf32> to vector<8x256xf32>
    %c239_i32_360 = arith.constant 239 : i32
    %599 = tpu.dynamic_rotate %598 by %c239_i32_360 dim 1 : vector<8x256xf32>, i32 -> vector<8x256xf32>
    %c8_361 = arith.constant 8 : index
    %c0_362 = arith.constant 0 : index
    %c0_363 = arith.constant 0 : index
    %600 = vector.load %arg3[%c8_361, %c0_362, %c0_363] : memref<9x1x256xf32, #tpu.memory_space<vmem>>, vector<1x1x256xf32>
    %601 = vector.shape_cast %600 : vector<1x1x256xf32> to vector<1x256xf32>
    %602 = vector.broadcast %601 : vector<1x256xf32> to vector<8x256xf32>
    %603 = arith.mulf %599, %602 : vector<8x256xf32>
    %604 = arith.addf %597, %603 : vector<8x256xf32>
    %605 = vector.broadcast %6 : vector<8x1xf32> to vector<8x256xf32>
    %606 = arith.addf %604, %605 : vector<8x256xf32>
    %cst_364 = arith.constant 0.0919247567 : f32
    %607 = vector.broadcast %cst_364 : f32 to vector<8x256xf32>
    %608 = arith.mulf %607, %606 : vector<8x256xf32>
    %609 = arith.subf %494, %608 : vector<8x256xf32>
    %cst_365 = arith.constant 1.00434244 : f32
    %610 = vector.broadcast %cst_365 : f32 to vector<8x256xf32>
    %611 = arith.mulf %610, %609 : vector<8x256xf32>
    %c0_366 = arith.constant 0 : index
    %c4 = arith.constant 4 : index
    %c0_367 = arith.constant 0 : index
    %c0_368 = arith.constant 0 : index
    %612 = vector.load %arg2[%c0_366, %c4, %c0_367, %c0_368] : memref<1x8x8x256xf32, #tpu.memory_space<vmem>>, vector<1x1x8x256xf32>
    %613 = vector.shape_cast %612 : vector<1x1x8x256xf32> to vector<8x256xf32>
    %cst_369 = arith.constant 0.0086285714 : f32
    %614 = vector.broadcast %cst_369 : f32 to vector<8x256xf32>
    %615 = arith.mulf %614, %613 : vector<8x256xf32>
    %616 = arith.addf %611, %615 : vector<8x256xf32>
    %c17_i32_370 = arith.constant 17 : i32
    %617 = tpu.dynamic_rotate %616 by %c17_i32_370 dim 1 : vector<8x256xf32>, i32 -> vector<8x256xf32>
    %c0_371 = arith.constant 0 : index
    %c0_372 = arith.constant 0 : index
    %c0_373 = arith.constant 0 : index
    %618 = vector.load %arg3[%c0_371, %c0_372, %c0_373] : memref<9x1x256xf32, #tpu.memory_space<vmem>>, vector<1x1x256xf32>
    %619 = vector.shape_cast %618 : vector<1x1x256xf32> to vector<1x256xf32>
    %620 = vector.broadcast %619 : vector<1x256xf32> to vector<8x256xf32>
    %621 = arith.mulf %617, %620 : vector<8x256xf32>
    %c16_i32_374 = arith.constant 16 : i32
    %622 = tpu.dynamic_rotate %616 by %c16_i32_374 dim 1 : vector<8x256xf32>, i32 -> vector<8x256xf32>
    %c1_375 = arith.constant 1 : index
    %c0_376 = arith.constant 0 : index
    %c0_377 = arith.constant 0 : index
    %623 = vector.load %arg3[%c1_375, %c0_376, %c0_377] : memref<9x1x256xf32, #tpu.memory_space<vmem>>, vector<1x1x256xf32>
    %624 = vector.shape_cast %623 : vector<1x1x256xf32> to vector<1x256xf32>
    %625 = vector.broadcast %624 : vector<1x256xf32> to vector<8x256xf32>
    %626 = arith.mulf %622, %625 : vector<8x256xf32>
    %c15_i32_378 = arith.constant 15 : i32
    %627 = tpu.dynamic_rotate %616 by %c15_i32_378 dim 1 : vector<8x256xf32>, i32 -> vector<8x256xf32>
    %c2_379 = arith.constant 2 : index
    %c0_380 = arith.constant 0 : index
    %c0_381 = arith.constant 0 : index
    %628 = vector.load %arg3[%c2_379, %c0_380, %c0_381] : memref<9x1x256xf32, #tpu.memory_space<vmem>>, vector<1x1x256xf32>
    %629 = vector.shape_cast %628 : vector<1x1x256xf32> to vector<1x256xf32>
    %630 = vector.broadcast %629 : vector<1x256xf32> to vector<8x256xf32>
    %631 = arith.mulf %627, %630 : vector<8x256xf32>
    %c1_i32_382 = arith.constant 1 : i32
    %632 = tpu.dynamic_rotate %616 by %c1_i32_382 dim 1 : vector<8x256xf32>, i32 -> vector<8x256xf32>
    %c3_383 = arith.constant 3 : index
    %c0_384 = arith.constant 0 : index
    %c0_385 = arith.constant 0 : index
    %633 = vector.load %arg3[%c3_383, %c0_384, %c0_385] : memref<9x1x256xf32, #tpu.memory_space<vmem>>, vector<1x1x256xf32>
    %634 = vector.shape_cast %633 : vector<1x1x256xf32> to vector<1x256xf32>
    %635 = vector.broadcast %634 : vector<1x256xf32> to vector<8x256xf32>
    %636 = arith.mulf %632, %635 : vector<8x256xf32>
    %c255_i32_386 = arith.constant 255 : i32
    %637 = tpu.dynamic_rotate %616 by %c255_i32_386 dim 1 : vector<8x256xf32>, i32 -> vector<8x256xf32>
    %c5_387 = arith.constant 5 : index
    %c0_388 = arith.constant 0 : index
    %c0_389 = arith.constant 0 : index
    %638 = vector.load %arg3[%c5_387, %c0_388, %c0_389] : memref<9x1x256xf32, #tpu.memory_space<vmem>>, vector<1x1x256xf32>
    %639 = vector.shape_cast %638 : vector<1x1x256xf32> to vector<1x256xf32>
    %640 = vector.broadcast %639 : vector<1x256xf32> to vector<8x256xf32>
    %641 = arith.mulf %637, %640 : vector<8x256xf32>
    %c241_i32_390 = arith.constant 241 : i32
    %642 = tpu.dynamic_rotate %616 by %c241_i32_390 dim 1 : vector<8x256xf32>, i32 -> vector<8x256xf32>
    %c6_391 = arith.constant 6 : index
    %c0_392 = arith.constant 0 : index
    %c0_393 = arith.constant 0 : index
    %643 = vector.load %arg3[%c6_391, %c0_392, %c0_393] : memref<9x1x256xf32, #tpu.memory_space<vmem>>, vector<1x1x256xf32>
    %644 = vector.shape_cast %643 : vector<1x1x256xf32> to vector<1x256xf32>
    %645 = vector.broadcast %644 : vector<1x256xf32> to vector<8x256xf32>
    %646 = arith.mulf %642, %645 : vector<8x256xf32>
    %c240_i32_394 = arith.constant 240 : i32
    %647 = tpu.dynamic_rotate %616 by %c240_i32_394 dim 1 : vector<8x256xf32>, i32 -> vector<8x256xf32>
    %c7_395 = arith.constant 7 : index
    %c0_396 = arith.constant 0 : index
    %c0_397 = arith.constant 0 : index
    %648 = vector.load %arg3[%c7_395, %c0_396, %c0_397] : memref<9x1x256xf32, #tpu.memory_space<vmem>>, vector<1x1x256xf32>
    %649 = vector.shape_cast %648 : vector<1x1x256xf32> to vector<1x256xf32>
    %650 = vector.broadcast %649 : vector<1x256xf32> to vector<8x256xf32>
    %651 = arith.mulf %647, %650 : vector<8x256xf32>
    %c239_i32_398 = arith.constant 239 : i32
    %652 = tpu.dynamic_rotate %616 by %c239_i32_398 dim 1 : vector<8x256xf32>, i32 -> vector<8x256xf32>
    %c8_399 = arith.constant 8 : index
    %c0_400 = arith.constant 0 : index
    %c0_401 = arith.constant 0 : index
    %653 = vector.load %arg3[%c8_399, %c0_400, %c0_401] : memref<9x1x256xf32, #tpu.memory_space<vmem>>, vector<1x1x256xf32>
    %654 = vector.shape_cast %653 : vector<1x1x256xf32> to vector<1x256xf32>
    %655 = vector.broadcast %654 : vector<1x256xf32> to vector<8x256xf32>
    %656 = arith.mulf %652, %655 : vector<8x256xf32>
    %657 = tpu.concatenate %621, %626, %631, %636, %616, %641, %646, %651, %656 in 0 : vector<8x256xf32>, vector<8x256xf32>, vector<8x256xf32>, vector<8x256xf32>, vector<8x256xf32>, vector<8x256xf32>, vector<8x256xf32>, vector<8x256xf32>, vector<8x256xf32> -> vector<72x256xf32>
    %658 = arith.truncf %657 : vector<72x256xf32> to vector<72x256xbf16>
    %cst_402 = arith.constant dense<0.000000e+00> : vector<32x256xf32>
    %659 = tpu.matmul %2, %658, %cst_402 {dimension_numbers = #tpu.dot_dimension_numbers<[1], [0], [0], [1], [0, 0, 1, 1], [], []>} : vector<32x72xbf16>, vector<72x256xbf16>, vector<32x256xf32> -> vector<32x256xf32>
    %660 = vector.broadcast %4 : vector<32x1xf32> to vector<32x256xf32>
    %661 = arith.addf %659, %660 : vector<32x256xf32>
    %cst_403 = arith.constant 2.500000e-01 : f32
    %662 = vector.broadcast %cst_403 : f32 to vector<32x1xf32>
    %663 = arith.mulf %662, %5 : vector<32x1xf32>
    %664 = vector.broadcast %663 : vector<32x1xf32> to vector<32x256xf32>
    %665 = arith.addf %661, %664 : vector<32x256xf32>
    %cst_404 = arith.constant 0.000000e+00 : f32
    %666 = vector.broadcast %cst_404 : f32 to vector<32x256xf32>
    %667 = arith.maximumf %665, %666 : vector<32x256xf32>
    %668 = arith.truncf %667 : vector<32x256xf32> to vector<32x256xbf16>
    %cst_405 = arith.constant dense<0.000000e+00> : vector<72x256xf32>
    %669 = tpu.matmul %3, %668, %cst_405 {dimension_numbers = #tpu.dot_dimension_numbers<[1], [0], [0], [1], [0, 0, 1, 1], [], []>} : vector<72x32xbf16>, vector<32x256xbf16>, vector<72x256xf32> -> vector<72x256xf32>
    %670 = vector.extract_strided_slice %669 {offsets = [0, 0], sizes = [8, 256], strides = [1, 1]} : vector<72x256xf32> to vector<8x256xf32>
    %c17_i32_406 = arith.constant 17 : i32
    %671 = tpu.dynamic_rotate %670 by %c17_i32_406 dim 1 : vector<8x256xf32>, i32 -> vector<8x256xf32>
    %c0_407 = arith.constant 0 : index
    %c0_408 = arith.constant 0 : index
    %c0_409 = arith.constant 0 : index
    %672 = vector.load %arg3[%c0_407, %c0_408, %c0_409] : memref<9x1x256xf32, #tpu.memory_space<vmem>>, vector<1x1x256xf32>
    %673 = vector.shape_cast %672 : vector<1x1x256xf32> to vector<1x256xf32>
    %674 = vector.broadcast %673 : vector<1x256xf32> to vector<8x256xf32>
    %675 = arith.mulf %671, %674 : vector<8x256xf32>
    %676 = vector.extract_strided_slice %669 {offsets = [8, 0], sizes = [8, 256], strides = [1, 1]} : vector<72x256xf32> to vector<8x256xf32>
    %c16_i32_410 = arith.constant 16 : i32
    %677 = tpu.dynamic_rotate %676 by %c16_i32_410 dim 1 : vector<8x256xf32>, i32 -> vector<8x256xf32>
    %c1_411 = arith.constant 1 : index
    %c0_412 = arith.constant 0 : index
    %c0_413 = arith.constant 0 : index
    %678 = vector.load %arg3[%c1_411, %c0_412, %c0_413] : memref<9x1x256xf32, #tpu.memory_space<vmem>>, vector<1x1x256xf32>
    %679 = vector.shape_cast %678 : vector<1x1x256xf32> to vector<1x256xf32>
    %680 = vector.broadcast %679 : vector<1x256xf32> to vector<8x256xf32>
    %681 = arith.mulf %677, %680 : vector<8x256xf32>
    %682 = arith.addf %675, %681 : vector<8x256xf32>
    %683 = vector.extract_strided_slice %669 {offsets = [16, 0], sizes = [8, 256], strides = [1, 1]} : vector<72x256xf32> to vector<8x256xf32>
    %c15_i32_414 = arith.constant 15 : i32
    %684 = tpu.dynamic_rotate %683 by %c15_i32_414 dim 1 : vector<8x256xf32>, i32 -> vector<8x256xf32>
    %c2_415 = arith.constant 2 : index
    %c0_416 = arith.constant 0 : index
    %c0_417 = arith.constant 0 : index
    %685 = vector.load %arg3[%c2_415, %c0_416, %c0_417] : memref<9x1x256xf32, #tpu.memory_space<vmem>>, vector<1x1x256xf32>
    %686 = vector.shape_cast %685 : vector<1x1x256xf32> to vector<1x256xf32>
    %687 = vector.broadcast %686 : vector<1x256xf32> to vector<8x256xf32>
    %688 = arith.mulf %684, %687 : vector<8x256xf32>
    %689 = arith.addf %682, %688 : vector<8x256xf32>
    %690 = vector.extract_strided_slice %669 {offsets = [24, 0], sizes = [8, 256], strides = [1, 1]} : vector<72x256xf32> to vector<8x256xf32>
    %c1_i32_418 = arith.constant 1 : i32
    %691 = tpu.dynamic_rotate %690 by %c1_i32_418 dim 1 : vector<8x256xf32>, i32 -> vector<8x256xf32>
    %c3_419 = arith.constant 3 : index
    %c0_420 = arith.constant 0 : index
    %c0_421 = arith.constant 0 : index
    %692 = vector.load %arg3[%c3_419, %c0_420, %c0_421] : memref<9x1x256xf32, #tpu.memory_space<vmem>>, vector<1x1x256xf32>
    %693 = vector.shape_cast %692 : vector<1x1x256xf32> to vector<1x256xf32>
    %694 = vector.broadcast %693 : vector<1x256xf32> to vector<8x256xf32>
    %695 = arith.mulf %691, %694 : vector<8x256xf32>
    %696 = arith.addf %689, %695 : vector<8x256xf32>
    %697 = vector.extract_strided_slice %669 {offsets = [32, 0], sizes = [8, 256], strides = [1, 1]} : vector<72x256xf32> to vector<8x256xf32>
    %698 = arith.addf %696, %697 : vector<8x256xf32>
    %699 = vector.extract_strided_slice %669 {offsets = [40, 0], sizes = [8, 256], strides = [1, 1]} : vector<72x256xf32> to vector<8x256xf32>
    %c255_i32_422 = arith.constant 255 : i32
    %700 = tpu.dynamic_rotate %699 by %c255_i32_422 dim 1 : vector<8x256xf32>, i32 -> vector<8x256xf32>
    %c5_423 = arith.constant 5 : index
    %c0_424 = arith.constant 0 : index
    %c0_425 = arith.constant 0 : index
    %701 = vector.load %arg3[%c5_423, %c0_424, %c0_425] : memref<9x1x256xf32, #tpu.memory_space<vmem>>, vector<1x1x256xf32>
    %702 = vector.shape_cast %701 : vector<1x1x256xf32> to vector<1x256xf32>
    %703 = vector.broadcast %702 : vector<1x256xf32> to vector<8x256xf32>
    %704 = arith.mulf %700, %703 : vector<8x256xf32>
    %705 = arith.addf %698, %704 : vector<8x256xf32>
    %706 = vector.extract_strided_slice %669 {offsets = [48, 0], sizes = [8, 256], strides = [1, 1]} : vector<72x256xf32> to vector<8x256xf32>
    %c241_i32_426 = arith.constant 241 : i32
    %707 = tpu.dynamic_rotate %706 by %c241_i32_426 dim 1 : vector<8x256xf32>, i32 -> vector<8x256xf32>
    %c6_427 = arith.constant 6 : index
    %c0_428 = arith.constant 0 : index
    %c0_429 = arith.constant 0 : index
    %708 = vector.load %arg3[%c6_427, %c0_428, %c0_429] : memref<9x1x256xf32, #tpu.memory_space<vmem>>, vector<1x1x256xf32>
    %709 = vector.shape_cast %708 : vector<1x1x256xf32> to vector<1x256xf32>
    %710 = vector.broadcast %709 : vector<1x256xf32> to vector<8x256xf32>
    %711 = arith.mulf %707, %710 : vector<8x256xf32>
    %712 = arith.addf %705, %711 : vector<8x256xf32>
    %713 = vector.extract_strided_slice %669 {offsets = [56, 0], sizes = [8, 256], strides = [1, 1]} : vector<72x256xf32> to vector<8x256xf32>
    %c240_i32_430 = arith.constant 240 : i32
    %714 = tpu.dynamic_rotate %713 by %c240_i32_430 dim 1 : vector<8x256xf32>, i32 -> vector<8x256xf32>
    %c7_431 = arith.constant 7 : index
    %c0_432 = arith.constant 0 : index
    %c0_433 = arith.constant 0 : index
    %715 = vector.load %arg3[%c7_431, %c0_432, %c0_433] : memref<9x1x256xf32, #tpu.memory_space<vmem>>, vector<1x1x256xf32>
    %716 = vector.shape_cast %715 : vector<1x1x256xf32> to vector<1x256xf32>
    %717 = vector.broadcast %716 : vector<1x256xf32> to vector<8x256xf32>
    %718 = arith.mulf %714, %717 : vector<8x256xf32>
    %719 = arith.addf %712, %718 : vector<8x256xf32>
    %720 = vector.extract_strided_slice %669 {offsets = [64, 0], sizes = [8, 256], strides = [1, 1]} : vector<72x256xf32> to vector<8x256xf32>
    %c239_i32_434 = arith.constant 239 : i32
    %721 = tpu.dynamic_rotate %720 by %c239_i32_434 dim 1 : vector<8x256xf32>, i32 -> vector<8x256xf32>
    %c8_435 = arith.constant 8 : index
    %c0_436 = arith.constant 0 : index
    %c0_437 = arith.constant 0 : index
    %722 = vector.load %arg3[%c8_435, %c0_436, %c0_437] : memref<9x1x256xf32, #tpu.memory_space<vmem>>, vector<1x1x256xf32>
    %723 = vector.shape_cast %722 : vector<1x1x256xf32> to vector<1x256xf32>
    %724 = vector.broadcast %723 : vector<1x256xf32> to vector<8x256xf32>
    %725 = arith.mulf %721, %724 : vector<8x256xf32>
    %726 = arith.addf %719, %725 : vector<8x256xf32>
    %727 = vector.broadcast %6 : vector<8x1xf32> to vector<8x256xf32>
    %728 = arith.addf %726, %727 : vector<8x256xf32>
    %cst_438 = arith.constant 0.104890287 : f32
    %729 = vector.broadcast %cst_438 : f32 to vector<8x256xf32>
    %730 = arith.mulf %729, %728 : vector<8x256xf32>
    %731 = arith.subf %616, %730 : vector<8x256xf32>
    %cst_439 = arith.constant 1.00290549 : f32
    %732 = vector.broadcast %cst_439 : f32 to vector<8x256xf32>
    %733 = arith.mulf %732, %731 : vector<8x256xf32>
    %c0_440 = arith.constant 0 : index
    %c5_441 = arith.constant 5 : index
    %c0_442 = arith.constant 0 : index
    %c0_443 = arith.constant 0 : index
    %734 = vector.load %arg2[%c0_440, %c5_441, %c0_442, %c0_443] : memref<1x8x8x256xf32, #tpu.memory_space<vmem>>, vector<1x1x8x256xf32>
    %735 = vector.shape_cast %734 : vector<1x1x8x256xf32> to vector<8x256xf32>
    %cst_444 = arith.constant 0.00578571437 : f32
    %736 = vector.broadcast %cst_444 : f32 to vector<8x256xf32>
    %737 = arith.mulf %736, %735 : vector<8x256xf32>
    %738 = arith.addf %733, %737 : vector<8x256xf32>
    %c17_i32_445 = arith.constant 17 : i32
    %739 = tpu.dynamic_rotate %738 by %c17_i32_445 dim 1 : vector<8x256xf32>, i32 -> vector<8x256xf32>
    %c0_446 = arith.constant 0 : index
    %c0_447 = arith.constant 0 : index
    %c0_448 = arith.constant 0 : index
    %740 = vector.load %arg3[%c0_446, %c0_447, %c0_448] : memref<9x1x256xf32, #tpu.memory_space<vmem>>, vector<1x1x256xf32>
    %741 = vector.shape_cast %740 : vector<1x1x256xf32> to vector<1x256xf32>
    %742 = vector.broadcast %741 : vector<1x256xf32> to vector<8x256xf32>
    %743 = arith.mulf %739, %742 : vector<8x256xf32>
    %c16_i32_449 = arith.constant 16 : i32
    %744 = tpu.dynamic_rotate %738 by %c16_i32_449 dim 1 : vector<8x256xf32>, i32 -> vector<8x256xf32>
    %c1_450 = arith.constant 1 : index
    %c0_451 = arith.constant 0 : index
    %c0_452 = arith.constant 0 : index
    %745 = vector.load %arg3[%c1_450, %c0_451, %c0_452] : memref<9x1x256xf32, #tpu.memory_space<vmem>>, vector<1x1x256xf32>
    %746 = vector.shape_cast %745 : vector<1x1x256xf32> to vector<1x256xf32>
    %747 = vector.broadcast %746 : vector<1x256xf32> to vector<8x256xf32>
    %748 = arith.mulf %744, %747 : vector<8x256xf32>
    %c15_i32_453 = arith.constant 15 : i32
    %749 = tpu.dynamic_rotate %738 by %c15_i32_453 dim 1 : vector<8x256xf32>, i32 -> vector<8x256xf32>
    %c2_454 = arith.constant 2 : index
    %c0_455 = arith.constant 0 : index
    %c0_456 = arith.constant 0 : index
    %750 = vector.load %arg3[%c2_454, %c0_455, %c0_456] : memref<9x1x256xf32, #tpu.memory_space<vmem>>, vector<1x1x256xf32>
    %751 = vector.shape_cast %750 : vector<1x1x256xf32> to vector<1x256xf32>
    %752 = vector.broadcast %751 : vector<1x256xf32> to vector<8x256xf32>
    %753 = arith.mulf %749, %752 : vector<8x256xf32>
    %c1_i32_457 = arith.constant 1 : i32
    %754 = tpu.dynamic_rotate %738 by %c1_i32_457 dim 1 : vector<8x256xf32>, i32 -> vector<8x256xf32>
    %c3_458 = arith.constant 3 : index
    %c0_459 = arith.constant 0 : index
    %c0_460 = arith.constant 0 : index
    %755 = vector.load %arg3[%c3_458, %c0_459, %c0_460] : memref<9x1x256xf32, #tpu.memory_space<vmem>>, vector<1x1x256xf32>
    %756 = vector.shape_cast %755 : vector<1x1x256xf32> to vector<1x256xf32>
    %757 = vector.broadcast %756 : vector<1x256xf32> to vector<8x256xf32>
    %758 = arith.mulf %754, %757 : vector<8x256xf32>
    %c255_i32_461 = arith.constant 255 : i32
    %759 = tpu.dynamic_rotate %738 by %c255_i32_461 dim 1 : vector<8x256xf32>, i32 -> vector<8x256xf32>
    %c5_462 = arith.constant 5 : index
    %c0_463 = arith.constant 0 : index
    %c0_464 = arith.constant 0 : index
    %760 = vector.load %arg3[%c5_462, %c0_463, %c0_464] : memref<9x1x256xf32, #tpu.memory_space<vmem>>, vector<1x1x256xf32>
    %761 = vector.shape_cast %760 : vector<1x1x256xf32> to vector<1x256xf32>
    %762 = vector.broadcast %761 : vector<1x256xf32> to vector<8x256xf32>
    %763 = arith.mulf %759, %762 : vector<8x256xf32>
    %c241_i32_465 = arith.constant 241 : i32
    %764 = tpu.dynamic_rotate %738 by %c241_i32_465 dim 1 : vector<8x256xf32>, i32 -> vector<8x256xf32>
    %c6_466 = arith.constant 6 : index
    %c0_467 = arith.constant 0 : index
    %c0_468 = arith.constant 0 : index
    %765 = vector.load %arg3[%c6_466, %c0_467, %c0_468] : memref<9x1x256xf32, #tpu.memory_space<vmem>>, vector<1x1x256xf32>
    %766 = vector.shape_cast %765 : vector<1x1x256xf32> to vector<1x256xf32>
    %767 = vector.broadcast %766 : vector<1x256xf32> to vector<8x256xf32>
    %768 = arith.mulf %764, %767 : vector<8x256xf32>
    %c240_i32_469 = arith.constant 240 : i32
    %769 = tpu.dynamic_rotate %738 by %c240_i32_469 dim 1 : vector<8x256xf32>, i32 -> vector<8x256xf32>
    %c7_470 = arith.constant 7 : index
    %c0_471 = arith.constant 0 : index
    %c0_472 = arith.constant 0 : index
    %770 = vector.load %arg3[%c7_470, %c0_471, %c0_472] : memref<9x1x256xf32, #tpu.memory_space<vmem>>, vector<1x1x256xf32>
    %771 = vector.shape_cast %770 : vector<1x1x256xf32> to vector<1x256xf32>
    %772 = vector.broadcast %771 : vector<1x256xf32> to vector<8x256xf32>
    %773 = arith.mulf %769, %772 : vector<8x256xf32>
    %c239_i32_473 = arith.constant 239 : i32
    %774 = tpu.dynamic_rotate %738 by %c239_i32_473 dim 1 : vector<8x256xf32>, i32 -> vector<8x256xf32>
    %c8_474 = arith.constant 8 : index
    %c0_475 = arith.constant 0 : index
    %c0_476 = arith.constant 0 : index
    %775 = vector.load %arg3[%c8_474, %c0_475, %c0_476] : memref<9x1x256xf32, #tpu.memory_space<vmem>>, vector<1x1x256xf32>
    %776 = vector.shape_cast %775 : vector<1x1x256xf32> to vector<1x256xf32>
    %777 = vector.broadcast %776 : vector<1x256xf32> to vector<8x256xf32>
    %778 = arith.mulf %774, %777 : vector<8x256xf32>
    %779 = tpu.concatenate %743, %748, %753, %758, %738, %763, %768, %773, %778 in 0 : vector<8x256xf32>, vector<8x256xf32>, vector<8x256xf32>, vector<8x256xf32>, vector<8x256xf32>, vector<8x256xf32>, vector<8x256xf32>, vector<8x256xf32>, vector<8x256xf32> -> vector<72x256xf32>
    %780 = arith.truncf %779 : vector<72x256xf32> to vector<72x256xbf16>
    %cst_477 = arith.constant dense<0.000000e+00> : vector<32x256xf32>
    %781 = tpu.matmul %2, %780, %cst_477 {dimension_numbers = #tpu.dot_dimension_numbers<[1], [0], [0], [1], [0, 0, 1, 1], [], []>} : vector<32x72xbf16>, vector<72x256xbf16>, vector<32x256xf32> -> vector<32x256xf32>
    %782 = vector.broadcast %4 : vector<32x1xf32> to vector<32x256xf32>
    %783 = arith.addf %781, %782 : vector<32x256xf32>
    %cst_478 = arith.constant 1.250000e-01 : f32
    %784 = vector.broadcast %cst_478 : f32 to vector<32x1xf32>
    %785 = arith.mulf %784, %5 : vector<32x1xf32>
    %786 = vector.broadcast %785 : vector<32x1xf32> to vector<32x256xf32>
    %787 = arith.addf %783, %786 : vector<32x256xf32>
    %cst_479 = arith.constant 0.000000e+00 : f32
    %788 = vector.broadcast %cst_479 : f32 to vector<32x256xf32>
    %789 = arith.maximumf %787, %788 : vector<32x256xf32>
    %790 = arith.truncf %789 : vector<32x256xf32> to vector<32x256xbf16>
    %cst_480 = arith.constant dense<0.000000e+00> : vector<72x256xf32>
    %791 = tpu.matmul %3, %790, %cst_480 {dimension_numbers = #tpu.dot_dimension_numbers<[1], [0], [0], [1], [0, 0, 1, 1], [], []>} : vector<72x32xbf16>, vector<32x256xbf16>, vector<72x256xf32> -> vector<72x256xf32>
    %792 = vector.extract_strided_slice %791 {offsets = [0, 0], sizes = [8, 256], strides = [1, 1]} : vector<72x256xf32> to vector<8x256xf32>
    %c17_i32_481 = arith.constant 17 : i32
    %793 = tpu.dynamic_rotate %792 by %c17_i32_481 dim 1 : vector<8x256xf32>, i32 -> vector<8x256xf32>
    %c0_482 = arith.constant 0 : index
    %c0_483 = arith.constant 0 : index
    %c0_484 = arith.constant 0 : index
    %794 = vector.load %arg3[%c0_482, %c0_483, %c0_484] : memref<9x1x256xf32, #tpu.memory_space<vmem>>, vector<1x1x256xf32>
    %795 = vector.shape_cast %794 : vector<1x1x256xf32> to vector<1x256xf32>
    %796 = vector.broadcast %795 : vector<1x256xf32> to vector<8x256xf32>
    %797 = arith.mulf %793, %796 : vector<8x256xf32>
    %798 = vector.extract_strided_slice %791 {offsets = [8, 0], sizes = [8, 256], strides = [1, 1]} : vector<72x256xf32> to vector<8x256xf32>
    %c16_i32_485 = arith.constant 16 : i32
    %799 = tpu.dynamic_rotate %798 by %c16_i32_485 dim 1 : vector<8x256xf32>, i32 -> vector<8x256xf32>
    %c1_486 = arith.constant 1 : index
    %c0_487 = arith.constant 0 : index
    %c0_488 = arith.constant 0 : index
    %800 = vector.load %arg3[%c1_486, %c0_487, %c0_488] : memref<9x1x256xf32, #tpu.memory_space<vmem>>, vector<1x1x256xf32>
    %801 = vector.shape_cast %800 : vector<1x1x256xf32> to vector<1x256xf32>
    %802 = vector.broadcast %801 : vector<1x256xf32> to vector<8x256xf32>
    %803 = arith.mulf %799, %802 : vector<8x256xf32>
    %804 = arith.addf %797, %803 : vector<8x256xf32>
    %805 = vector.extract_strided_slice %791 {offsets = [16, 0], sizes = [8, 256], strides = [1, 1]} : vector<72x256xf32> to vector<8x256xf32>
    %c15_i32_489 = arith.constant 15 : i32
    %806 = tpu.dynamic_rotate %805 by %c15_i32_489 dim 1 : vector<8x256xf32>, i32 -> vector<8x256xf32>
    %c2_490 = arith.constant 2 : index
    %c0_491 = arith.constant 0 : index
    %c0_492 = arith.constant 0 : index
    %807 = vector.load %arg3[%c2_490, %c0_491, %c0_492] : memref<9x1x256xf32, #tpu.memory_space<vmem>>, vector<1x1x256xf32>
    %808 = vector.shape_cast %807 : vector<1x1x256xf32> to vector<1x256xf32>
    %809 = vector.broadcast %808 : vector<1x256xf32> to vector<8x256xf32>
    %810 = arith.mulf %806, %809 : vector<8x256xf32>
    %811 = arith.addf %804, %810 : vector<8x256xf32>
    %812 = vector.extract_strided_slice %791 {offsets = [24, 0], sizes = [8, 256], strides = [1, 1]} : vector<72x256xf32> to vector<8x256xf32>
    %c1_i32_493 = arith.constant 1 : i32
    %813 = tpu.dynamic_rotate %812 by %c1_i32_493 dim 1 : vector<8x256xf32>, i32 -> vector<8x256xf32>
    %c3_494 = arith.constant 3 : index
    %c0_495 = arith.constant 0 : index
    %c0_496 = arith.constant 0 : index
    %814 = vector.load %arg3[%c3_494, %c0_495, %c0_496] : memref<9x1x256xf32, #tpu.memory_space<vmem>>, vector<1x1x256xf32>
    %815 = vector.shape_cast %814 : vector<1x1x256xf32> to vector<1x256xf32>
    %816 = vector.broadcast %815 : vector<1x256xf32> to vector<8x256xf32>
    %817 = arith.mulf %813, %816 : vector<8x256xf32>
    %818 = arith.addf %811, %817 : vector<8x256xf32>
    %819 = vector.extract_strided_slice %791 {offsets = [32, 0], sizes = [8, 256], strides = [1, 1]} : vector<72x256xf32> to vector<8x256xf32>
    %820 = arith.addf %818, %819 : vector<8x256xf32>
    %821 = vector.extract_strided_slice %791 {offsets = [40, 0], sizes = [8, 256], strides = [1, 1]} : vector<72x256xf32> to vector<8x256xf32>
    %c255_i32_497 = arith.constant 255 : i32
    %822 = tpu.dynamic_rotate %821 by %c255_i32_497 dim 1 : vector<8x256xf32>, i32 -> vector<8x256xf32>
    %c5_498 = arith.constant 5 : index
    %c0_499 = arith.constant 0 : index
    %c0_500 = arith.constant 0 : index
    %823 = vector.load %arg3[%c5_498, %c0_499, %c0_500] : memref<9x1x256xf32, #tpu.memory_space<vmem>>, vector<1x1x256xf32>
    %824 = vector.shape_cast %823 : vector<1x1x256xf32> to vector<1x256xf32>
    %825 = vector.broadcast %824 : vector<1x256xf32> to vector<8x256xf32>
    %826 = arith.mulf %822, %825 : vector<8x256xf32>
    %827 = arith.addf %820, %826 : vector<8x256xf32>
    %828 = vector.extract_strided_slice %791 {offsets = [48, 0], sizes = [8, 256], strides = [1, 1]} : vector<72x256xf32> to vector<8x256xf32>
    %c241_i32_501 = arith.constant 241 : i32
    %829 = tpu.dynamic_rotate %828 by %c241_i32_501 dim 1 : vector<8x256xf32>, i32 -> vector<8x256xf32>
    %c6_502 = arith.constant 6 : index
    %c0_503 = arith.constant 0 : index
    %c0_504 = arith.constant 0 : index
    %830 = vector.load %arg3[%c6_502, %c0_503, %c0_504] : memref<9x1x256xf32, #tpu.memory_space<vmem>>, vector<1x1x256xf32>
    %831 = vector.shape_cast %830 : vector<1x1x256xf32> to vector<1x256xf32>
    %832 = vector.broadcast %831 : vector<1x256xf32> to vector<8x256xf32>
    %833 = arith.mulf %829, %832 : vector<8x256xf32>
    %834 = arith.addf %827, %833 : vector<8x256xf32>
    %835 = vector.extract_strided_slice %791 {offsets = [56, 0], sizes = [8, 256], strides = [1, 1]} : vector<72x256xf32> to vector<8x256xf32>
    %c240_i32_505 = arith.constant 240 : i32
    %836 = tpu.dynamic_rotate %835 by %c240_i32_505 dim 1 : vector<8x256xf32>, i32 -> vector<8x256xf32>
    %c7_506 = arith.constant 7 : index
    %c0_507 = arith.constant 0 : index
    %c0_508 = arith.constant 0 : index
    %837 = vector.load %arg3[%c7_506, %c0_507, %c0_508] : memref<9x1x256xf32, #tpu.memory_space<vmem>>, vector<1x1x256xf32>
    %838 = vector.shape_cast %837 : vector<1x1x256xf32> to vector<1x256xf32>
    %839 = vector.broadcast %838 : vector<1x256xf32> to vector<8x256xf32>
    %840 = arith.mulf %836, %839 : vector<8x256xf32>
    %841 = arith.addf %834, %840 : vector<8x256xf32>
    %842 = vector.extract_strided_slice %791 {offsets = [64, 0], sizes = [8, 256], strides = [1, 1]} : vector<72x256xf32> to vector<8x256xf32>
    %c239_i32_509 = arith.constant 239 : i32
    %843 = tpu.dynamic_rotate %842 by %c239_i32_509 dim 1 : vector<8x256xf32>, i32 -> vector<8x256xf32>
    %c8_510 = arith.constant 8 : index
    %c0_511 = arith.constant 0 : index
    %c0_512 = arith.constant 0 : index
    %844 = vector.load %arg3[%c8_510, %c0_511, %c0_512] : memref<9x1x256xf32, #tpu.memory_space<vmem>>, vector<1x1x256xf32>
    %845 = vector.shape_cast %844 : vector<1x1x256xf32> to vector<1x256xf32>
    %846 = vector.broadcast %845 : vector<1x256xf32> to vector<8x256xf32>
    %847 = arith.mulf %843, %846 : vector<8x256xf32>
    %848 = arith.addf %841, %847 : vector<8x256xf32>
    %849 = vector.broadcast %6 : vector<8x1xf32> to vector<8x256xf32>
    %850 = arith.addf %848, %849 : vector<8x256xf32>
    %cst_513 = arith.constant 0.294261605 : f32
    %851 = vector.broadcast %cst_513 : f32 to vector<8x256xf32>
    %852 = arith.mulf %851, %850 : vector<8x256xf32>
    %853 = arith.subf %738, %852 : vector<8x256xf32>
    %cst_514 = arith.constant 1.00147474 : f32
    %854 = vector.broadcast %cst_514 : f32 to vector<8x256xf32>
    %855 = arith.mulf %854, %853 : vector<8x256xf32>
    %c0_515 = arith.constant 0 : index
    %c6_516 = arith.constant 6 : index
    %c0_517 = arith.constant 0 : index
    %c0_518 = arith.constant 0 : index
    %856 = vector.load %arg2[%c0_515, %c6_516, %c0_517, %c0_518] : memref<1x8x8x256xf32, #tpu.memory_space<vmem>>, vector<1x1x8x256xf32>
    %857 = vector.shape_cast %856 : vector<1x1x8x256xf32> to vector<8x256xf32>
    %cst_519 = arith.constant 0.0029428571 : f32
    %858 = vector.broadcast %cst_519 : f32 to vector<8x256xf32>
    %859 = arith.mulf %858, %857 : vector<8x256xf32>
    %860 = arith.addf %855, %859 : vector<8x256xf32>
    %c17_i32_520 = arith.constant 17 : i32
    %861 = tpu.dynamic_rotate %860 by %c17_i32_520 dim 1 : vector<8x256xf32>, i32 -> vector<8x256xf32>
    %c0_521 = arith.constant 0 : index
    %c0_522 = arith.constant 0 : index
    %c0_523 = arith.constant 0 : index
    %862 = vector.load %arg3[%c0_521, %c0_522, %c0_523] : memref<9x1x256xf32, #tpu.memory_space<vmem>>, vector<1x1x256xf32>
    %863 = vector.shape_cast %862 : vector<1x1x256xf32> to vector<1x256xf32>
    %864 = vector.broadcast %863 : vector<1x256xf32> to vector<8x256xf32>
    %865 = arith.mulf %861, %864 : vector<8x256xf32>
    %c16_i32_524 = arith.constant 16 : i32
    %866 = tpu.dynamic_rotate %860 by %c16_i32_524 dim 1 : vector<8x256xf32>, i32 -> vector<8x256xf32>
    %c1_525 = arith.constant 1 : index
    %c0_526 = arith.constant 0 : index
    %c0_527 = arith.constant 0 : index
    %867 = vector.load %arg3[%c1_525, %c0_526, %c0_527] : memref<9x1x256xf32, #tpu.memory_space<vmem>>, vector<1x1x256xf32>
    %868 = vector.shape_cast %867 : vector<1x1x256xf32> to vector<1x256xf32>
    %869 = vector.broadcast %868 : vector<1x256xf32> to vector<8x256xf32>
    %870 = arith.mulf %866, %869 : vector<8x256xf32>
    %c15_i32_528 = arith.constant 15 : i32
    %871 = tpu.dynamic_rotate %860 by %c15_i32_528 dim 1 : vector<8x256xf32>, i32 -> vector<8x256xf32>
    %c2_529 = arith.constant 2 : index
    %c0_530 = arith.constant 0 : index
    %c0_531 = arith.constant 0 : index
    %872 = vector.load %arg3[%c2_529, %c0_530, %c0_531] : memref<9x1x256xf32, #tpu.memory_space<vmem>>, vector<1x1x256xf32>
    %873 = vector.shape_cast %872 : vector<1x1x256xf32> to vector<1x256xf32>
    %874 = vector.broadcast %873 : vector<1x256xf32> to vector<8x256xf32>
    %875 = arith.mulf %871, %874 : vector<8x256xf32>
    %c1_i32_532 = arith.constant 1 : i32
    %876 = tpu.dynamic_rotate %860 by %c1_i32_532 dim 1 : vector<8x256xf32>, i32 -> vector<8x256xf32>
    %c3_533 = arith.constant 3 : index
    %c0_534 = arith.constant 0 : index
    %c0_535 = arith.constant 0 : index
    %877 = vector.load %arg3[%c3_533, %c0_534, %c0_535] : memref<9x1x256xf32, #tpu.memory_space<vmem>>, vector<1x1x256xf32>
    %878 = vector.shape_cast %877 : vector<1x1x256xf32> to vector<1x256xf32>
    %879 = vector.broadcast %878 : vector<1x256xf32> to vector<8x256xf32>
    %880 = arith.mulf %876, %879 : vector<8x256xf32>
    %c255_i32_536 = arith.constant 255 : i32
    %881 = tpu.dynamic_rotate %860 by %c255_i32_536 dim 1 : vector<8x256xf32>, i32 -> vector<8x256xf32>
    %c5_537 = arith.constant 5 : index
    %c0_538 = arith.constant 0 : index
    %c0_539 = arith.constant 0 : index
    %882 = vector.load %arg3[%c5_537, %c0_538, %c0_539] : memref<9x1x256xf32, #tpu.memory_space<vmem>>, vector<1x1x256xf32>
    %883 = vector.shape_cast %882 : vector<1x1x256xf32> to vector<1x256xf32>
    %884 = vector.broadcast %883 : vector<1x256xf32> to vector<8x256xf32>
    %885 = arith.mulf %881, %884 : vector<8x256xf32>
    %c241_i32_540 = arith.constant 241 : i32
    %886 = tpu.dynamic_rotate %860 by %c241_i32_540 dim 1 : vector<8x256xf32>, i32 -> vector<8x256xf32>
    %c6_541 = arith.constant 6 : index
    %c0_542 = arith.constant 0 : index
    %c0_543 = arith.constant 0 : index
    %887 = vector.load %arg3[%c6_541, %c0_542, %c0_543] : memref<9x1x256xf32, #tpu.memory_space<vmem>>, vector<1x1x256xf32>
    %888 = vector.shape_cast %887 : vector<1x1x256xf32> to vector<1x256xf32>
    %889 = vector.broadcast %888 : vector<1x256xf32> to vector<8x256xf32>
    %890 = arith.mulf %886, %889 : vector<8x256xf32>
    %c240_i32_544 = arith.constant 240 : i32
    %891 = tpu.dynamic_rotate %860 by %c240_i32_544 dim 1 : vector<8x256xf32>, i32 -> vector<8x256xf32>
    %c7_545 = arith.constant 7 : index
    %c0_546 = arith.constant 0 : index
    %c0_547 = arith.constant 0 : index
    %892 = vector.load %arg3[%c7_545, %c0_546, %c0_547] : memref<9x1x256xf32, #tpu.memory_space<vmem>>, vector<1x1x256xf32>
    %893 = vector.shape_cast %892 : vector<1x1x256xf32> to vector<1x256xf32>
    %894 = vector.broadcast %893 : vector<1x256xf32> to vector<8x256xf32>
    %895 = arith.mulf %891, %894 : vector<8x256xf32>
    %c239_i32_548 = arith.constant 239 : i32
    %896 = tpu.dynamic_rotate %860 by %c239_i32_548 dim 1 : vector<8x256xf32>, i32 -> vector<8x256xf32>
    %c8_549 = arith.constant 8 : index
    %c0_550 = arith.constant 0 : index
    %c0_551 = arith.constant 0 : index
    %897 = vector.load %arg3[%c8_549, %c0_550, %c0_551] : memref<9x1x256xf32, #tpu.memory_space<vmem>>, vector<1x1x256xf32>
    %898 = vector.shape_cast %897 : vector<1x1x256xf32> to vector<1x256xf32>
    %899 = vector.broadcast %898 : vector<1x256xf32> to vector<8x256xf32>
    %900 = arith.mulf %896, %899 : vector<8x256xf32>
    %901 = tpu.concatenate %865, %870, %875, %880, %860, %885, %890, %895, %900 in 0 : vector<8x256xf32>, vector<8x256xf32>, vector<8x256xf32>, vector<8x256xf32>, vector<8x256xf32>, vector<8x256xf32>, vector<8x256xf32>, vector<8x256xf32>, vector<8x256xf32> -> vector<72x256xf32>
    %902 = arith.truncf %901 : vector<72x256xf32> to vector<72x256xbf16>
    %cst_552 = arith.constant dense<0.000000e+00> : vector<32x256xf32>
    %903 = tpu.matmul %2, %902, %cst_552 {dimension_numbers = #tpu.dot_dimension_numbers<[1], [0], [0], [1], [0, 0, 1, 1], [], []>} : vector<32x72xbf16>, vector<72x256xbf16>, vector<32x256xf32> -> vector<32x256xf32>
    %904 = vector.broadcast %4 : vector<32x1xf32> to vector<32x256xf32>
    %905 = arith.addf %903, %904 : vector<32x256xf32>
    %cst_553 = arith.constant 0.000000e+00 : f32
    %906 = vector.broadcast %cst_553 : f32 to vector<32x1xf32>
    %907 = arith.mulf %906, %5 : vector<32x1xf32>
    %908 = vector.broadcast %907 : vector<32x1xf32> to vector<32x256xf32>
    %909 = arith.addf %905, %908 : vector<32x256xf32>
    %cst_554 = arith.constant 0.000000e+00 : f32
    %910 = vector.broadcast %cst_554 : f32 to vector<32x256xf32>
    %911 = arith.maximumf %909, %910 : vector<32x256xf32>
    %912 = arith.truncf %911 : vector<32x256xf32> to vector<32x256xbf16>
    %cst_555 = arith.constant dense<0.000000e+00> : vector<72x256xf32>
    %913 = tpu.matmul %3, %912, %cst_555 {dimension_numbers = #tpu.dot_dimension_numbers<[1], [0], [0], [1], [0, 0, 1, 1], [], []>} : vector<72x32xbf16>, vector<32x256xbf16>, vector<72x256xf32> -> vector<72x256xf32>
    %914 = vector.extract_strided_slice %913 {offsets = [0, 0], sizes = [8, 256], strides = [1, 1]} : vector<72x256xf32> to vector<8x256xf32>
    %c17_i32_556 = arith.constant 17 : i32
    %915 = tpu.dynamic_rotate %914 by %c17_i32_556 dim 1 : vector<8x256xf32>, i32 -> vector<8x256xf32>
    %c0_557 = arith.constant 0 : index
    %c0_558 = arith.constant 0 : index
    %c0_559 = arith.constant 0 : index
    %916 = vector.load %arg3[%c0_557, %c0_558, %c0_559] : memref<9x1x256xf32, #tpu.memory_space<vmem>>, vector<1x1x256xf32>
    %917 = vector.shape_cast %916 : vector<1x1x256xf32> to vector<1x256xf32>
    %918 = vector.broadcast %917 : vector<1x256xf32> to vector<8x256xf32>
    %919 = arith.mulf %915, %918 : vector<8x256xf32>
    %920 = vector.extract_strided_slice %913 {offsets = [8, 0], sizes = [8, 256], strides = [1, 1]} : vector<72x256xf32> to vector<8x256xf32>
    %c16_i32_560 = arith.constant 16 : i32
    %921 = tpu.dynamic_rotate %920 by %c16_i32_560 dim 1 : vector<8x256xf32>, i32 -> vector<8x256xf32>
    %c1_561 = arith.constant 1 : index
    %c0_562 = arith.constant 0 : index
    %c0_563 = arith.constant 0 : index
    %922 = vector.load %arg3[%c1_561, %c0_562, %c0_563] : memref<9x1x256xf32, #tpu.memory_space<vmem>>, vector<1x1x256xf32>
    %923 = vector.shape_cast %922 : vector<1x1x256xf32> to vector<1x256xf32>
    %924 = vector.broadcast %923 : vector<1x256xf32> to vector<8x256xf32>
    %925 = arith.mulf %921, %924 : vector<8x256xf32>
    %926 = arith.addf %919, %925 : vector<8x256xf32>
    %927 = vector.extract_strided_slice %913 {offsets = [16, 0], sizes = [8, 256], strides = [1, 1]} : vector<72x256xf32> to vector<8x256xf32>
    %c15_i32_564 = arith.constant 15 : i32
    %928 = tpu.dynamic_rotate %927 by %c15_i32_564 dim 1 : vector<8x256xf32>, i32 -> vector<8x256xf32>
    %c2_565 = arith.constant 2 : index
    %c0_566 = arith.constant 0 : index
    %c0_567 = arith.constant 0 : index
    %929 = vector.load %arg3[%c2_565, %c0_566, %c0_567] : memref<9x1x256xf32, #tpu.memory_space<vmem>>, vector<1x1x256xf32>
    %930 = vector.shape_cast %929 : vector<1x1x256xf32> to vector<1x256xf32>
    %931 = vector.broadcast %930 : vector<1x256xf32> to vector<8x256xf32>
    %932 = arith.mulf %928, %931 : vector<8x256xf32>
    %933 = arith.addf %926, %932 : vector<8x256xf32>
    %934 = vector.extract_strided_slice %913 {offsets = [24, 0], sizes = [8, 256], strides = [1, 1]} : vector<72x256xf32> to vector<8x256xf32>
    %c1_i32_568 = arith.constant 1 : i32
    %935 = tpu.dynamic_rotate %934 by %c1_i32_568 dim 1 : vector<8x256xf32>, i32 -> vector<8x256xf32>
    %c3_569 = arith.constant 3 : index
    %c0_570 = arith.constant 0 : index
    %c0_571 = arith.constant 0 : index
    %936 = vector.load %arg3[%c3_569, %c0_570, %c0_571] : memref<9x1x256xf32, #tpu.memory_space<vmem>>, vector<1x1x256xf32>
    %937 = vector.shape_cast %936 : vector<1x1x256xf32> to vector<1x256xf32>
    %938 = vector.broadcast %937 : vector<1x256xf32> to vector<8x256xf32>
    %939 = arith.mulf %935, %938 : vector<8x256xf32>
    %940 = arith.addf %933, %939 : vector<8x256xf32>
    %941 = vector.extract_strided_slice %913 {offsets = [32, 0], sizes = [8, 256], strides = [1, 1]} : vector<72x256xf32> to vector<8x256xf32>
    %942 = arith.addf %940, %941 : vector<8x256xf32>
    %943 = vector.extract_strided_slice %913 {offsets = [40, 0], sizes = [8, 256], strides = [1, 1]} : vector<72x256xf32> to vector<8x256xf32>
    %c255_i32_572 = arith.constant 255 : i32
    %944 = tpu.dynamic_rotate %943 by %c255_i32_572 dim 1 : vector<8x256xf32>, i32 -> vector<8x256xf32>
    %c5_573 = arith.constant 5 : index
    %c0_574 = arith.constant 0 : index
    %c0_575 = arith.constant 0 : index
    %945 = vector.load %arg3[%c5_573, %c0_574, %c0_575] : memref<9x1x256xf32, #tpu.memory_space<vmem>>, vector<1x1x256xf32>
    %946 = vector.shape_cast %945 : vector<1x1x256xf32> to vector<1x256xf32>
    %947 = vector.broadcast %946 : vector<1x256xf32> to vector<8x256xf32>
    %948 = arith.mulf %944, %947 : vector<8x256xf32>
    %949 = arith.addf %942, %948 : vector<8x256xf32>
    %950 = vector.extract_strided_slice %913 {offsets = [48, 0], sizes = [8, 256], strides = [1, 1]} : vector<72x256xf32> to vector<8x256xf32>
    %c241_i32_576 = arith.constant 241 : i32
    %951 = tpu.dynamic_rotate %950 by %c241_i32_576 dim 1 : vector<8x256xf32>, i32 -> vector<8x256xf32>
    %c6_577 = arith.constant 6 : index
    %c0_578 = arith.constant 0 : index
    %c0_579 = arith.constant 0 : index
    %952 = vector.load %arg3[%c6_577, %c0_578, %c0_579] : memref<9x1x256xf32, #tpu.memory_space<vmem>>, vector<1x1x256xf32>
    %953 = vector.shape_cast %952 : vector<1x1x256xf32> to vector<1x256xf32>
    %954 = vector.broadcast %953 : vector<1x256xf32> to vector<8x256xf32>
    %955 = arith.mulf %951, %954 : vector<8x256xf32>
    %956 = arith.addf %949, %955 : vector<8x256xf32>
    %957 = vector.extract_strided_slice %913 {offsets = [56, 0], sizes = [8, 256], strides = [1, 1]} : vector<72x256xf32> to vector<8x256xf32>
    %c240_i32_580 = arith.constant 240 : i32
    %958 = tpu.dynamic_rotate %957 by %c240_i32_580 dim 1 : vector<8x256xf32>, i32 -> vector<8x256xf32>
    %c7_581 = arith.constant 7 : index
    %c0_582 = arith.constant 0 : index
    %c0_583 = arith.constant 0 : index
    %959 = vector.load %arg3[%c7_581, %c0_582, %c0_583] : memref<9x1x256xf32, #tpu.memory_space<vmem>>, vector<1x1x256xf32>
    %960 = vector.shape_cast %959 : vector<1x1x256xf32> to vector<1x256xf32>
    %961 = vector.broadcast %960 : vector<1x256xf32> to vector<8x256xf32>
    %962 = arith.mulf %958, %961 : vector<8x256xf32>
    %963 = arith.addf %956, %962 : vector<8x256xf32>
    %964 = vector.extract_strided_slice %913 {offsets = [64, 0], sizes = [8, 256], strides = [1, 1]} : vector<72x256xf32> to vector<8x256xf32>
    %c239_i32_584 = arith.constant 239 : i32
    %965 = tpu.dynamic_rotate %964 by %c239_i32_584 dim 1 : vector<8x256xf32>, i32 -> vector<8x256xf32>
    %c8_585 = arith.constant 8 : index
    %c0_586 = arith.constant 0 : index
    %c0_587 = arith.constant 0 : index
    %966 = vector.load %arg3[%c8_585, %c0_586, %c0_587] : memref<9x1x256xf32, #tpu.memory_space<vmem>>, vector<1x1x256xf32>
    %967 = vector.shape_cast %966 : vector<1x1x256xf32> to vector<1x256xf32>
    %968 = vector.broadcast %967 : vector<1x256xf32> to vector<8x256xf32>
    %969 = arith.mulf %965, %968 : vector<8x256xf32>
    %970 = arith.addf %963, %969 : vector<8x256xf32>
    %971 = vector.broadcast %6 : vector<8x1xf32> to vector<8x256xf32>
    %972 = arith.addf %970, %971 : vector<8x256xf32>
    %cst_588 = arith.constant 0.000000e+00 : f32
    %973 = vector.broadcast %cst_588 : f32 to vector<8x256xf32>
    %974 = arith.mulf %973, %972 : vector<8x256xf32>
    %975 = arith.subf %860, %974 : vector<8x256xf32>
    %cst_589 = arith.constant 1.00005007 : f32
    %976 = vector.broadcast %cst_589 : f32 to vector<8x256xf32>
    %977 = arith.mulf %976, %975 : vector<8x256xf32>
    %c0_590 = arith.constant 0 : index
    %c7_591 = arith.constant 7 : index
    %c0_592 = arith.constant 0 : index
    %c0_593 = arith.constant 0 : index
    %978 = vector.load %arg2[%c0_590, %c7_591, %c0_592, %c0_593] : memref<1x8x8x256xf32, #tpu.memory_space<vmem>>, vector<1x1x8x256xf32>
    %979 = vector.shape_cast %978 : vector<1x1x8x256xf32> to vector<8x256xf32>
    %cst_594 = arith.constant 0.000000e+00 : f32
    %980 = vector.broadcast %cst_594 : f32 to vector<8x256xf32>
    %981 = arith.mulf %980, %979 : vector<8x256xf32>
    %982 = arith.addf %977, %981 : vector<8x256xf32>
    %c0_595 = arith.constant 0 : index
    %c0_596 = arith.constant 0 : index
    %c0_597 = arith.constant 0 : index
    %983 = vector.load %arg9[%c0_595, %c0_596, %c0_597] : memref<1x8x256xf32, #tpu.memory_space<vmem>>, vector<1x8x256xf32>
    %984 = vector.shape_cast %983 : vector<1x8x256xf32> to vector<8x256xf32>
    %985 = vector.shape_cast %982 : vector<8x256xf32> to vector<1x8x256xf32>
    tpu.vector_store %arg9[%c0_595, %c0_596, %c0_597], %985 {strides = array<i32>} : memref<1x8x256xf32, #tpu.memory_space<vmem>>, vector<1x8x256xf32>,
    return
  }
  func.func @transform_0(%arg0: i32) -> (i32, i32, i32) {
    %c0_i32 = arith.constant 0 : i32
    %c0_i32_0 = arith.constant 0 : i32
    %c0_i32_1 = arith.constant 0 : i32
    return %arg0, %c0_i32, %c0_i32_0 : i32, i32, i32
  }
  func.func @transform_1(%arg0: i32) -> (i32, i32, i32, i32) {
    %c0_i32 = arith.constant 0 : i32
    %c0_i32_0 = arith.constant 0 : i32
    %c0_i32_1 = arith.constant 0 : i32
    %c0_i32_2 = arith.constant 0 : i32
    return %arg0, %c0_i32, %c0_i32_0, %c0_i32_1 : i32, i32, i32, i32
  }
  func.func @transform_2(%arg0: i32) -> (i32, i32, i32) {
    %c0_i32 = arith.constant 0 : i32
    %c0_i32_0 = arith.constant 0 : i32
    %c0_i32_1 = arith.constant 0 : i32
    %c0_i32_2 = arith.constant 0 : i32
    return %c0_i32, %c0_i32_0, %c0_i32_1 : i32, i32, i32
  }
  func.func @transform_3(%arg0: i32) -> (i32, i32) {
    %c0_i32 = arith.constant 0 : i32
    %c0_i32_0 = arith.constant 0 : i32
    %c0_i32_1 = arith.constant 0 : i32
    return %c0_i32, %c0_i32_0 : i32, i32
  }
  func.func @transform_4(%arg0: i32) -> (i32, i32) {
    %c0_i32 = arith.constant 0 : i32
    %c0_i32_0 = arith.constant 0 : i32
    %c0_i32_1 = arith.constant 0 : i32
    return %c0_i32, %c0_i32_0 : i32, i32
  }
  func.func @transform_5(%arg0: i32) -> (i32, i32) {
    %c0_i32 = arith.constant 0 : i32
    %c0_i32_0 = arith.constant 0 : i32
    %c0_i32_1 = arith.constant 0 : i32
    return %c0_i32, %c0_i32_0 : i32, i32
  }
  func.func @transform_6(%arg0: i32) -> (i32, i32) {
    %c0_i32 = arith.constant 0 : i32
    %c0_i32_0 = arith.constant 0 : i32
    %c0_i32_1 = arith.constant 0 : i32
    return %c0_i32, %c0_i32_0 : i32, i32
  }
  func.func @transform_7(%arg0: i32) -> (i32, i32) {
    %c0_i32 = arith.constant 0 : i32
    %c0_i32_0 = arith.constant 0 : i32
    %c0_i32_1 = arith.constant 0 : i32
    return %c0_i32, %c0_i32_0 : i32, i32
  }
  func.func @transform_8(%arg0: i32) -> (i32, i32, i32) {
    %c0_i32 = arith.constant 0 : i32
    %c0_i32_0 = arith.constant 0 : i32
    %c0_i32_1 = arith.constant 0 : i32
    return %arg0, %c0_i32, %c0_i32_0 : i32, i32, i32
  }
}

</mosaic_0001>

<bundles_post_ra>
// kernel: dm_sample.1
= control target key start
LH: loop header
LB: loop body
LE: loop exit
PB: predicated region body
PF: predicated region fallthrough
CT: control target
= control target key end

     0   :  { %s5891_s0 = inlined_call_operand.vmem [shape: f32[2,8,256], index: 0, kind: input, shape index: {}]   ;;  %s5892_s1 = inlined_call_operand.hbm [shape: f32[2,8,8,256], index: 1, kind: input, shape index: {}]   ;;  %s5893_s2 = inlined_call_operand.vmem [shape: f32[9,1,256], index: 2, kind: input, shape index: {}]   ;;  %s5894_s3 = inlined_call_operand.vmem [shape: bf16[32,72], index: 3, kind: input, shape index: {}]   ;;  %s5895_s4 = inlined_call_operand.vmem [shape: f32[32,1], index: 4, kind: input, shape index: {}]   ;;  %s5896_s5 = inlined_call_operand.vmem [shape: f32[32,1], index: 5, kind: input, shape index: {}]   ;;  %s5897_s6 = inlined_call_operand.vmem [shape: bf16[72,32], index: 6, kind: input, shape index: {}]   ;;  %s5898_s7 = inlined_call_operand.vmem [shape: f32[8,1], index: 7, kind: input, shape index: {}]   ;;  %s5899_s8 = inlined_call_operand.hbm [shape: f32[2,8,256], index: 8, kind: output, shape index: {}]  }
   0x1   :  { %5915 = sst [smem:[#allocation8_spill]] %s5891_s0 }
   0x2   :  { %5916 = sst [smem:[#allocation9_spill]] %s5892_s1 }
   0x3   :  { %5917 = sst [smem:[#allocation10_spill]] %s5893_s2 }
   0x4   :  { %13 = vsyncpa [#allocation3], 0 }
   0x5   :  { %15 = vsyncpa [#allocation3 + $0x1], 0 }
   0x6   :  { %16 = vsyncpa [#allocation4], 0 }
   0x7   :  { %18 = vsyncpa [#allocation4 + $0x1], 0  ;;  %s3856_s27 = smov 0   ;;  %s3858_s28 = smov 0  }
   0x8   :  { %s3860_s29 = smov 0   ;;  %s3862_s30 = smov 0  }
   0x9 LB: > { %s3877_s9 = sadd.s32 4294967295, %s3796_s30   ;;  %s3486_s10 = sadd.s32 4294967294, %s3796_s30   ;;  %s3796_s30 = sphi %s3862_s30, %s5939_s30   ;;  %s3792_s29 = sphi %s3860_s29, %s5938_s29   ;;  %s3788_s28 = sphi %s3858_s28, %s5937_s28   ;;  %s3784_s27 = sphi %s3856_s27, %s5936_s27  }
   0xa   : > { %s3881_s11 = sadd.s32 1, %s3796_s30   ;;  %s57_s12 = sadd.s32 1, %s3792_s29 }
   0xb   : > { %s54_s13 = ssub.s32 %s3796_s30, %s3881_s11  ;;  %p64_p0 = scmp.ne.s32.totalorder %s3792_s29, %s3788_s28 }
   0xc   : > { %p55_p1 = scmp.eq.s32.totalorder %s54_s13, 0  ;;  %p65_p2 = scmp.eq.s32.totalorder %s3796_s30, 0 }
   0xd   : > { %p70_p3 = scmp.ne.s32.totalorder %s3788_s28, %s3784_s27  ;;  %p71_p4 = scmp.eq.s32.totalorder %s3877_s9, 0 }
   0xe   : > { %s3893_s14 = scalar_select %p55_p1, %s3792_s29, %s57_s12  }
   0xf   : > { %p3895_p5 = por %p65_p2, %p64_p0  ;;  %p3899_p6 = por %p71_p4, %p70_p3 }
  0x10   : > { %p220_p7 = scmp.eq.s32.totalorder %s3877_s9, 1  ;;  %p226_p8 = scmp.eq.s32.totalorder %s3486_s10, 1 }
  0x11   : > { %p3613_p10 = scmp.lt.s32.totalorder %s3796_s30, 2  ;;  %s272_s19 = sand.u32 1, %s3792_s29  }
  0x12   : > { %p3906_p11 = por %p220_p7, %p64_p0  ;;  %p3910_p12 = por %p226_p8, %p70_p3 }
  0x13   : > { %s3594_s20 = sshll.u32 %s3796_s30, 11  ;;  %s3489_s21 = sshll.u32 %s272_s19, 7 }
  0x14   : > { %s5920_s17 = scalar_select %p3906_p11, 1, 0 }
  0x15   : > { %s5921_s18 = scalar_select %p3910_p12, 1, 0 }
  0x16   : > { %s5922_s1 = sld [smem:[#allocation9_spill]]  ;;  %s276_s25 = scalar_lea.vmem [#allocation2], %s3489_s21 }
  0x17   : > { %s283_s26 = sshll.u32 %s276_s25, 4  ;;  %p3923_p13 = pnand %p3613_p10, %p3895_p5  ;;  %s3927_s26 = int_to_ptr.vmem [resolvable:$true] %s283_s26 }
  0x18   : > { %s3929_s12 = scalar_lea.sflag [#allocation3], %s272_s19 }
  0x19   : > { %p3702_p1 = pneg %p3923_p13 }
  0x1c   : > { %s3919_s24 = scalar_lea.hbm %s5922_s1, %s3594_s20  ;;  %s3705_s21 = scalar_lea.hbm %s5922_s1, 4096 }
  0x1d   : > { %s3700_s13 = scalar_lea.hbm %s3919_s24, 2048  ;;  %p3706_p4 = scmp.lt.u32.totalorder %s3919_s24, %s5922_s1 }
  0x1e   : > { %p3701_p0 = scmp.ne.s32.totalorder %s3919_s24, %s3700_s13  ;;  %p3707_p5 = scmp.lt.u32.totalorder %s3705_s21, %s3700_s13 }
  0x1f   : > { %p3709_p8 = scmp.lt.u32.totalorder %s3700_s13, %s3919_s24 }
  0x20   : > { %p3703_p2 = pnand %p3702_p1, %p3701_p0  ;;  %p3708_p7 = por %p3707_p5, %p3706_p4 }
  0x22   : > { %p3704_p3 = pneg %p3703_p2  ;;  %p3710_p10 = por %p3709_p8, %p3708_p7 }
  0x24   : > { %p3711_p9 = pnand %p3710_p10, %p3704_p3 }
  0x26   : > { %3714 = shalt.err (!%p3711_p9)
}
  0x27   : > { %s3715_s19 = scalar_lea.vmem %s3927_s26, 2048  ;;  %s3798_s25 = smov [#allocation2]  }
  0x28   : > { %p3716_p0 = scmp.ne.s32.totalorder %s3927_s26, %s3715_s19  ;;  %s3720_s20 = sshll.u32 %s3798_s25, 4  ;;  %s3721_s20 = int_to_ptr.vmem [resolvable:$false] %s3720_s20 }
  0x29   : > { %s3722_s15 = scalar_lea.vmem %s3721_s20, 4096  ;;  %p3723_p11 = scmp.lt.s32.totalorder %s3927_s26, %s3721_s20 }
  0x2a   : > { %p3718_p2 = pnand %p3716_p0, %p3702_p1  ;;  %p3724_p4 = scmp.lt.s32.totalorder %s3722_s15, %s3715_s19 }
  0x2c   : > { %p3719_p12 = pneg %p3718_p2  ;;  %p3725_p5 = por %p3724_p4, %p3723_p11 }
  0x2e   : > { %p3726_p7 = pnand %p3725_p5, %p3719_p12 }
  0x30   : > { %3729 = shalt.err (!%p3726_p7)
}
  0x31   : > { %s3799_s13 = smov 256   ;;  %s3800_s21 = smov 16  }
  0x32   : > { %3608 = dma.hbm_to_vmem [thread:$0]  (!%p3923_p13), %s3919_s24, 2048, %s3927_s26, %s3929_s12, %s3799_s13, %s3799_s13, %s3800_s21  }
  0x33   : > { %p3492_p9 = scmp.ge.s32.totalorder %s3796_s30, 1  ;;  %p291_p1 = scmp.lt.s32.totalorder %s3796_s30, 3 }
  0x35   : > { %p292_p3 = pnand %p3492_p9, %p291_p1 }
  0x36   : > { %s3960_s22 = sand.u32 (!%p292_p3), 1, %s3788_s28  }
  0x37   : > { %295 = sbr.rel (%p292_p3) target bundleno = 6177 (0x1821), region = 52  ;;  %s3493_s23 = sshll.u32 (!%p292_p3), %s3960_s22, 7 }
  0x38   : > { %s298_s19 = scalar_lea.sflag (!%p292_p3), [#allocation3], %s3960_s22  ;;  %s3964_s25 = scalar_lea.vmem (!%p292_p3), [#allocation2], %s3493_s23 }
  0x3e   : > { %3775 = dma.done.wait (%p3899_p6), %s298_s19, 2048  }
  0x3f   : > { %3777 = vsyncadd (%p3899_p6), %s298_s19, 4294965248  ;;  %p339_p11 = scmp.lt.s32.totalorder %s3877_s9, 1  ;;  %s5924_s0 = sld [smem:[#allocation8_spill]]  ;;  %v3807_v2 = vmov 0   ;;  %v361_v3 = vld [vmem:[%s5895_s4 + $0x8] sm:$0xff]  ;;  %v4021_v4 = vld [vmem:[%s5896_s5] sm:$0xff]  ;;  %v373_v16 = vlaneseq }
  0x40   : > { %s5911_s15 = smov 16   ;;  %s5913_s13 = smov 17   ;;  %632 = vmatprep.mubr.bf16.mxu0 %v3807_v2  ;;  %3659 = vset.pattern.permute.xlu1 %v3807_v2  ;;  %v360_v5 = vld [vmem:[%s5895_s4] sm:$0xff]  ;;  %v653_v6 = vmul.f32 0.875, %v4021_v4  ;;  %v4030_v7 = vld [vmem:[%s5896_s5 + $0x8] sm:$0xff]  ;;  %v362_v9 = vld [vmem:[%s5895_s4 + $0x10] sm:$0xff] }
  0x41   : > { %s340_s24 = scalar_select %p339_p11, %s3877_s9, 1  ;;  %3658 = vset.pattern.permute.xlu0 %v3807_v2  ;;  %768 = vmatprep.mubr.bf16.mxu1 %v3807_v2  ;;  %v654_v8 = vmul.f32 0.875, %v4030_v7  ;;  %v4039_v10 = vld [vmem:[%s5896_s5 + $0x10] sm:$0xff]  ;;  %v363_v11 = vld [vmem:[%s5895_s4 + $0x18] sm:$0xff]  ;;  %v368_v15 = vld [vmem:[%s5898_s7] sm:$0xff]  ;;  %v381_v17 = vshrl.u32 %v373_v16, 7 }
  0x42   : > { %s5909_s16 = smov 15   ;;  %s5905_s21 = smov 1   ;;  %v4047_v12 = vld [vmem:[%s5896_s5 + $0x18] sm:$0xff]  ;;  %v655_v13 = vmul.f32 0.875, %v4039_v10  ;;  %v4054_v18 = vand.u32 127, %v373_v16  ;;  %vm593_vm8 = vcmask 1043456  }
  0x43   : > { %s3595_s26 = sshll.u32 %s340_s24, 4  ;;  %s5903_s23 = smov 127   ;;  %v656_v14 = vmul.f32 0.875, %v4047_v12  ;;  %v4056_v19 = vsub.s32 0, %v381_v17  ;;  %v4058_v20 = vsub.s32 1, %v381_v17  ;;  %vm586_vm9 = vcmask 588800  }
  0x44   : > { %s5901_s19 = smov 113   ;;  %s5907_s24 = smov 112   ;;  %vm396_vm0 = vcmp.lt.s32.totalorder %v4054_v18, 16  ;;  %vm375_vm1 = vcmp.lt.s32.totalorder %v4054_v18, 17  ;;  %vm418_vm2 = vcmp.lt.s32.totalorder %v4054_v18, 15  ;;  %vm440_vm3 = vcmp.lt.s32.totalorder %v4054_v18, 1 }
  0x45   : > { %s343_s20 = scalar_lea.vmem %s5924_s0, %s3595_s26  ;;  %s3809_s26 = smov 111   ;;  %vm462_vm4 = vcmp.lt.s32.totalorder %v4054_v18, 127  ;;  %vm484_vm5 = vcmp.lt.s32.totalorder %v4054_v18, 113  ;;  %vm506_vm6 = vcmp.lt.s32.totalorder %v4054_v18, 112  ;;  %vm528_vm7 = vcmp.lt.s32.totalorder %v4054_v18, 111 }
  0x46   : > { %v3975_v0 = vld [vmem:[%s343_s20] sm:$0xff]  ;;  %v3981_v1 = vld [vmem:[%s343_s20 + $0x8] sm:$0xff]  ;;  %s5925_s2 = sld [smem:[#allocation10_spill]]  ;;  %vm720_vm10 = vcmask 261120   ;;  %s5926_s10 = smov 15  }
  0x47   : > { %392 = vrot.lane.b32.xlu1 %v3975_v0, %s5911_s15  ;;  %369 = vrot.lane.b32.xlu0 %v3975_v0, %s5913_s13  ;;  %s5928_s12 = smov 127   ;;  %p5933_p12 = scmp.ne.s32.totalorder %s5920_s17, 0 }
  0x4b   : > { %394 = vrot.lane.b32.xlu1 %v3981_v1, %s5911_s15  ;;  %371 = vrot.lane.b32.xlu0 %v3981_v1, %s5913_s13 }
  0x4c   : > { %v378_v21 = vld [vmem:[%s5925_s2] sm:$0x3]  ;;  %v3497_v22 = vld [vmem:[%s5925_s2 + $0x2] sm:$0x3]  ;;  %v3498_v39 = vld [vmem:[%s5925_s2 + $0x4] sm:$0x3] }
  0x4d   : > { %v4069_v25 = vrot.slane %v378_v21, %v4058_v20  ;;  %v4072_v26 = vrot.slane %v3497_v22, %v4058_v20  ;;  %v4075_v27 = vrot.slane %v378_v21, %v4056_v19  ;;  %v4078_v28 = vrot.slane %v3497_v22, %v4056_v19  ;;  %v3499_v40 = vld [vmem:[%s5925_s2 + $0x6] sm:$0x3]  ;;  %v3500_v49 = vld [vmem:[%s5925_s2 + $0xa] sm:$0x3] }
  0x4e   : > { %v4101_v45 = vrot.slane %v3498_v39, %v4056_v19  ;;  %v4104_v46 = vrot.slane %v3498_v39, %v4058_v20  ;;  %v4107_v47 = vrot.slane %v3499_v40, %v4056_v19  ;;  %v4110_v48 = vrot.slane %v3499_v40, %v4058_v20 }
  0x4f   : > { %416 = vrot.lane.b32.xlu1 %v3981_v1, %s5909_s16  ;;  %414 = vrot.lane.b32.xlu0 %v3975_v0, %s5909_s16  ;;  %v4125_v56 = vrot.slane %v3500_v49, %v4056_v19  ;;  %v4128_v57 = vrot.slane %v3500_v49, %v4058_v20 }
  0x53   : > { %438 = vrot.lane.b32.xlu1 %v3981_v1, %s5905_s21  ;;  %436 = vrot.lane.b32.xlu0 %v3975_v0, %s5905_s21  ;;  %s5929_s21 = smov 113  }
  0x57   : > { %460 = vrot.lane.b32.xlu1 %v3981_v1, %s5903_s23  ;;  %458 = vrot.lane.b32.xlu0 %v3975_v0, %s5903_s23  ;;  %s5930_s23 = smov 112  }
  0x5b   : > { %482 = vrot.lane.b32.xlu1 %v3981_v1, %s5901_s19  ;;  %480 = vrot.lane.b32.xlu0 %v3975_v0, %s5901_s19  ;;  %s5927_s19 = smov 1  }
  0x5f   : > { %504 = vrot.lane.b32.xlu1 %v3981_v1, %s5907_s24  ;;  %502 = vrot.lane.b32.xlu0 %v3975_v0, %s5907_s24  ;;  %s5932_s24 = smov 16  }
  0x63   : > { %526 = vrot.lane.b32.xlu1 %v3981_v1, %s3809_s26  ;;  %524 = vrot.lane.b32.xlu0 %v3975_v0, %s3809_s26 }
  0x67   : > { %563 = vperm.xlu1 %3659, %v361_v3   ;;  %558 = vperm.xlu0 %3658, %v360_v5  }
  0x6b   : > { %659 = vperm.xlu1 %3659, %v653_v6   ;;  %664 = vperm.xlu0 %3658, %v654_v8  }
  0x6f   : > { %568 = vperm.xlu1 %3659, %v362_v9   ;;  %573 = vperm.xlu0 %3658, %v363_v11  }
  0x73   : > { %669 = vperm.xlu1 %3659, %v655_v13   ;;  %674 = vperm.xlu0 %3658, %v656_v14   ;;  %v3501_v13 = vld [vmem:[%s5925_s2 + $0xc] sm:$0x3]  ;;  %v3502_v14 = vld [vmem:[%s5925_s2 + $0xe] sm:$0x3] }
  0x74   : > { %v4151_v22 = vrot.slane %v3501_v13, %v4056_v19 }
  0x77   : > { %899 = vperm.xlu1 %3659, %v368_v15  }
  0xb9   : > { %v393_v23 = vpop.permute.xlu1 %392  ;;  %v370_v24 = vpop.permute.xlu0 %369 }
  0xbd   : > { %v395_v29 = vpop.permute.xlu1 %394  ;;  %v372_v30 = vpop.permute.xlu0 %371 }
  0xbe   : > { %v398_v31 = vsel %vm396_vm0, %v395_v29, %v393_v23  ;;  %v377_v32 = vsel %vm375_vm1, %v372_v30, %v370_v24  ;;  %v376_v33 = vsel %vm375_vm1, %v370_v24, %v372_v30  ;;  %v397_v34 = vsel %vm396_vm0, %v393_v23, %v395_v29  ;;  %v3503_v30 = vld [vmem:[%s5925_s2 + $0x10] sm:$0x3] }
  0xbf   : > { %v391_v35 = vmul.f32 %v4069_v25, %v376_v33  ;;  %v413_v36 = vmul.f32 %v4072_v26, %v397_v34  ;;  %v390_v37 = vmul.f32 %v4075_v27, %v377_v32  ;;  %v412_v38 = vmul.f32 %v4078_v28, %v398_v31 }
  0xc0   : > { %v4154_v23 = vrot.slane %v3501_v13, %v4058_v20  ;;  %v4157_v24 = vrot.slane %v3502_v14, %v4056_v19  ;;  %v4160_v29 = vrot.slane %v3502_v14, %v4058_v20 }
  0xc1   : > { %v417_v41 = vpop.permute.xlu1 %416  ;;  %v415_v42 = vpop.permute.xlu0 %414  ;;  %v547_v43 = vpack.c.bf16 %v413_v36, %v391_v35  ;;  %v546_v44 = vpack.c.bf16 %v412_v38, %v390_v37  ;;  %v4175_v37 = vrot.slane %v3503_v30, %v4058_v20  ;;  %v4178_v38 = vrot.slane %v3503_v30, %v4056_v19 }
  0xc2   : > { %v419_v50 = vsel %vm418_vm2, %v415_v42, %v417_v41  ;;  %v420_v51 = vsel %vm418_vm2, %v417_v41, %v415_v42 }
  0xc3   : > { %600 = vmatprep.subr.bf16.mxu0 %v547_v43  ;;  %v434_v58 = vmul.f32 %v4101_v45, %v420_v51  ;;  %v435_v59 = vmul.f32 %v4104_v46, %v419_v50 }
  0xc4   : > { %601 = vmatpush1.bf16.msra.mxu0 %v546_v44 }
  0xc5   : > { %v439_v52 = vpop.permute.xlu1 %438  ;;  %v437_v53 = vpop.permute.xlu0 %436 }
  0xc6   : > { %v441_v54 = vsel %vm440_vm3, %v437_v53, %v439_v52  ;;  %v442_v55 = vsel %vm440_vm3, %v439_v52, %v437_v53 }
  0xc7   : > { %v456_v60 = vmul.f32 %v4107_v47, %v442_v55  ;;  %v457_v61 = vmul.f32 %v4110_v48, %v441_v54 }
  0xc9   : > { %v461_v62 = vpop.permute.xlu1 %460  ;;  %v459_v63 = vpop.permute.xlu0 %458  ;;  %v549_v3 = vpack.c.bf16 %v457_v61, %v435_v59  ;;  %v548_v5 = vpack.c.bf16 %v456_v60, %v434_v58  ;;  %v4195_v58 = vld [vmem:[%s5894_s3] sm:$0xff]   ;;  %v4203_v59 = vld [vmem:[%s5894_s3 + $0x8] sm:$0xff]  }
  0xca   : > { %v463_v6 = vsel %vm462_vm4, %v459_v63, %v461_v62  ;;  %v464_v8 = vsel %vm462_vm4, %v461_v62, %v459_v63 }
  0xcb   : > { %v478_v9 = vmul.f32 %v4125_v56, %v463_v6  ;;  %v479_v11 = vmul.f32 %v4128_v57, %v464_v8  ;;  %602 = vmatprep.subr.bf16.mxu0 %v549_v3 }
  0xcc   : > { %603 = vmatpush1.bf16.msra.mxu0 %v548_v5 }
  0xcd   : > { %v483_v15 = vpop.permute.xlu1 %482  ;;  %v481_v16 = vpop.permute.xlu0 %480  ;;  %v551_v17 = vpack.c.bf16 %v479_v11, %v3981_v1  ;;  %v550_v21 = vpack.c.bf16 %v478_v9, %v3975_v0 }
  0xce   : > { %v485_v31 = vsel %vm484_vm5, %v481_v16, %v483_v15  ;;  %v486_v32 = vsel %vm484_vm5, %v483_v15, %v481_v16 }
  0xcf   : > { %604 = vmatprep.subr.bf16.mxu0 %v551_v17  ;;  %v500_v39 = vmul.f32 %v4151_v22, %v485_v31  ;;  %v501_v40 = vmul.f32 %v4154_v23, %v486_v32 }
  0xd0   : > { %605 = vmatpush1.bf16.msra.mxu0 %v550_v21 }
  0xd1   : > { %v505_v33 = vpop.permute.xlu1 %504  ;;  %v503_v34 = vpop.permute.xlu0 %502 }
  0xd2   : > { %v507_v35 = vsel %vm506_vm6, %v503_v34, %v505_v33  ;;  %v508_v36 = vsel %vm506_vm6, %v505_v33, %v503_v34 }
  0xd3   : > { %v522_v41 = vmul.f32 %v4157_v24, %v507_v35  ;;  %v523_v42 = vmul.f32 %v4160_v29, %v508_v36 }
  0xd5   : > { %v527_v43 = vpop.permute.xlu1 %526  ;;  %v525_v44 = vpop.permute.xlu0 %524  ;;  %v553_v49 = vpack.c.bf16 %v523_v42, %v501_v40  ;;  %v552_v50 = vpack.c.bf16 %v522_v41, %v500_v39 }
  0xd6   : > { %v529_v51 = vsel %vm528_vm7, %v525_v44, %v527_v43  ;;  %v530_v20 = vsel %vm528_vm7, %v527_v43, %v525_v44 }
  0xd7   : > { %v545_v19 = vmul.f32 %v4175_v37, %v530_v20  ;;  %606 = vmatprep.subr.bf16.mxu0 %v553_v49  ;;  %v544_v52 = vmul.f32 %v4178_v38, %v529_v51 }
  0xd8   : > { %607 = vmatpush1.bf16.msra.mxu0 %v552_v50 }
  0xd9   : > { %v555_v53 = vpack.c.bf16 %v545_v19, %v545_v19  ;;  %v554_v54 = vpack.c.bf16 %v544_v52, %v544_v52 }
  0xdb   : > { %3506 = vmatprep.subr.msk.bf16.mxu0 %vm593_vm8, %v555_v53  ;;  %v595_v55 = vsel %vm593_vm8, %v554_v54, 0 }
  0xdc   : > { %609 = vmatpush1.bf16.msra.mxu0 %v595_v55 }
  0xdf   : > { %3507 = vmatmul.mubr.msk.bf16.vlgmr.msra.gmra.mrb[0].mxu0 %vm586_vm9, %v4195_v58 }
  0xe0   : > { %642 = vmatprep.mubr.bf16.mxu0 %v3807_v2 }
  0xe6   : > { %v4208_v60 = vpop.permute.xlu1 %563  ;;  %v4210_v61 = vpop.permute.xlu0 %558 }
  0xe7   : > { %3508 = vmatmul.mubr.msk.bf16.gmra.mrb[4].mxu0 %vm586_vm9, %v4203_v59 }
  0xe8   : > { %1028 = vmatprep.mubr.bf16.mxu0 %v3807_v2 }
  0xea   : > { %v660_v62 = vpop.permute.xlu1 %659  ;;  %v665_v63 = vpop.permute.xlu0 %664 }
  0xee   : > { %v4215_v15 = vpop.permute.xlu1 %568  ;;  %v4218_v30 = vpop.permute.xlu0 %573 }
  0xf2   : > { %v670_v42 = vpop.permute.xlu1 %669  ;;  %v675_v19 = vpop.permute.xlu0 %674 }
 0x1b2   : > { %v634_v3 = vpop.f32.mrb[0].mxu0 }
 0x1b3   : > { %v635_v5 = vadd.f32 %v634_v3, %v4210_v61  ;;  %v636_v6 = vpop.f32.mrb[1].mxu0 }
 0x1b4   : > { %v637_v8 = vadd.f32 %v636_v6, %v4210_v61  ;;  %v638_v9 = vpop.f32.mrb[2].mxu0 }
 0x1b5   : > { %v677_v11 = vadd.f32 %v660_v62, %v635_v5  ;;  %v639_v13 = vadd.f32 %v638_v9, %v4208_v60  ;;  %v640_v14 = vpop.f32.mrb[3].mxu0  ;;  %v4227_v9 = vld [vmem:[%s5897_s6] sm:$0xff]  }
 0x1b6   : > { %v641_v16 = vadd.f32 %v640_v14, %v4208_v60  ;;  %v678_v17 = vadd.f32 %v660_v62, %v637_v8  ;;  %v4251_v14 = vld [vmem:[%s5897_s6 + $0x18] sm:$0xff]  }
 0x1b7   : > { %v679_v21 = vadd.f32 %v665_v63, %v639_v13  ;;  %v685_v32 = vmax.f32 %v677_v11, 0.0  ;;  %v4235_v11 = vld [vmem:[%s5897_s6 + $0x8] sm:$0xff]   ;;  %v4243_v13 = vld [vmem:[%s5897_s6 + $0x10] sm:$0xff]  }
 0x1b8   : > { %v680_v31 = vadd.f32 %v665_v63, %v641_v16  ;;  %v686_v35 = vmax.f32 %v678_v17, 0.0  ;;  %v4259_v16 = vld [vmem:[%s5897_s6 + $0x20] ss:$0 sps:$4 sm:$0xff]  }
 0x1b9   : > { %v687_v33 = vmax.f32 %v679_v21, 0.0 }
 0x1ba   : > { %v644_v34 = vpop.f32.mrb[4].mxu0  ;;  %v688_v36 = vmax.f32 %v680_v31, 0.0 }
 0x1bb   : > { %v645_v39 = vadd.f32 %v644_v34, %v4215_v15  ;;  %v646_v40 = vpop.f32.mrb[5].mxu0  ;;  %v693_v41 = vpack.c.bf16 %v687_v33, %v685_v32 }
 0x1bc   : > { %v647_v43 = vadd.f32 %v646_v40, %v4215_v15  ;;  %v648_v44 = vpop.f32.mrb[6].mxu0  ;;  %v694_v49 = vpack.c.bf16 %v688_v36, %v686_v35 }
 0x1bd   : > { %v681_v50 = vadd.f32 %v670_v42, %v645_v39  ;;  %v649_v51 = vadd.f32 %v648_v44, %v4218_v30  ;;  %v650_v20 = vpop.f32.mrb[7].mxu0 }
 0x1be   : > { %v682_v52 = vadd.f32 %v670_v42, %v647_v43  ;;  %v651_v53 = vadd.f32 %v650_v20, %v4218_v30  ;;  %736 = vmatprep.subr.bf16.mxu1 %v694_v49 }
 0x1bf   : > { %v683_v54 = vadd.f32 %v675_v19, %v649_v51  ;;  %737 = vmatpush1.bf16.msra.mxu1 %v693_v41  ;;  %v689_v62 = vmax.f32 %v681_v50, 0.0 }
 0x1c0   : > { %v684_v55 = vadd.f32 %v675_v19, %v651_v53  ;;  %v690_v3 = vmax.f32 %v682_v52, 0.0  ;;  %v4280_v53 = vpop.permute.xlu1 %899 }
 0x1c1   : > { %v691_v63 = vmax.f32 %v683_v54, 0.0 }
 0x1c2   : > { %v692_v5 = vmax.f32 %v684_v55, 0.0 }
 0x1c3   : > { %v695_v6 = vpack.c.bf16 %v691_v63, %v689_v62 }
 0x1c4   : > { %v696_v8 = vpack.c.bf16 %v692_v5, %v690_v3 }
 0x1c6   : > { %738 = vmatprep.subr.bf16.mxu1 %v696_v8 }
 0x1c7   : > { %739 = vmatpush1.bf16.msra.mxu1 %v695_v6 }
 0x1ca   : > { %3514 = vmatmul.mubr.msk.bf16.vlgmr.msra.gmra.mrb[0].mxu1 %vm720_vm10, %v4227_v9 }
 0x1cb   : > { %778 = vmatprep.mubr.bf16.mxu1 %v3807_v2 }
 0x1d2   : > { %3515 = vmatmul.mubr.msk.bf16.gmra.mrb[4].mxu1 %vm720_vm10, %v4235_v11 }
 0x1d3   : > { %788 = vmatprep.mubr.bf16.mxu1 %v3807_v2 }
 0x1da   : > { %3516 = vmatmul.mubr.msk.bf16.gmra.mrb[8].mxu1 %vm720_vm10, %v4243_v13 }
 0x1db   : > { %798 = vmatprep.mubr.bf16.mxu1 %v3807_v2 }
 0x1e2   : > { %3517 = vmatmul.mubr.msk.bf16.gmra.mrb[12].mxu1 %vm720_vm10, %v4251_v14 }
 0x1e3   : > { %808 = vmatprep.mubr.bf16.mxu1 %v3807_v2 }
 0x1ea   : > { %3518 = vmatmul.mubr.msk.bf16.gmra.mrb[16].mxu1 %vm720_vm10, %v4259_v16 }
 0x1eb   : > { %1145 = vmatprep.mubr.bf16.mxu1 %v3807_v2 }
 0x29d   : > { %v770_v17 = vpop.f32.mrb[0].mxu1 }
 0x29e   : > { %817 = vrot.lane.b32.xlu1 %v770_v17, %s5913_s13  ;;  %v772_v21 = vpop.f32.mrb[1].mxu1 }
 0x29f   : > { %819 = vrot.lane.b32.xlu0 %v772_v21, %s5913_s13  ;;  %v774_v31 = vpop.f32.mrb[2].mxu1 }
 0x2a0   : > { %v776_v32 = vpop.f32.mrb[3].mxu1 }
 0x2a2   : > { %825 = vrot.lane.b32.xlu1 %v774_v31, %s5911_s15 }
 0x2a3   : > { %827 = vrot.lane.b32.xlu0 %v776_v32, %s5911_s15 }
 0x2a5   : > { %v780_v33 = vpop.f32.mrb[4].mxu1 }
 0x2a6   : > { %835 = vrot.lane.b32.xlu1 %v780_v33, %s5926_s10  ;;  %v782_v34 = vpop.f32.mrb[5].mxu1 }
 0x2a7   : > { %837 = vrot.lane.b32.xlu0 %v782_v34, %s5926_s10  ;;  %v784_v35 = vpop.f32.mrb[6].mxu1 }
 0x2a8   : > { %v786_v36 = vpop.f32.mrb[7].mxu1 }
 0x2aa   : > { %845 = vrot.lane.b32.xlu1 %v784_v35, %s5927_s19 }
 0x2ab   : > { %847 = vrot.lane.b32.xlu0 %v786_v36, %s5927_s19 }
 0x2ad   : > { %v790_v39 = vpop.f32.mrb[8].mxu1 }
 0x2ae   : > { %v792_v40 = vpop.f32.mrb[9].mxu1 }
 0x2af   : > { %v794_v41 = vpop.f32.mrb[10].mxu1 }
 0x2b0   : > { %857 = vrot.lane.b32.xlu1 %v794_v41, %s5928_s12  ;;  %v796_v42 = vpop.f32.mrb[11].mxu1 }
 0x2b1   : > { %859 = vrot.lane.b32.xlu0 %v796_v42, %s5928_s12 }
 0x2b5   : > { %v800_v43 = vpop.f32.mrb[12].mxu1 }
 0x2b6   : > { %867 = vrot.lane.b32.xlu1 %v800_v43, %s5929_s21  ;;  %v802_v44 = vpop.f32.mrb[13].mxu1 }
 0x2b7   : > { %869 = vrot.lane.b32.xlu0 %v802_v44, %s5929_s21  ;;  %v804_v49 = vpop.f32.mrb[14].mxu1 }
 0x2b8   : > { %v806_v50 = vpop.f32.mrb[15].mxu1 }
 0x2ba   : > { %877 = vrot.lane.b32.xlu1 %v804_v49, %s5930_s23 }
 0x2bb   : > { %879 = vrot.lane.b32.xlu0 %v806_v50, %s5930_s23 }
 0x2bd   : > { %v810_v51 = vpop.f32.mrb[16].mxu1 }
 0x2be   : > { %v812_v20 = vpop.f32.mrb[17].mxu1 }
 0x2bf   : > { %887 = vrot.lane.b32.xlu0 %v810_v51, %s3809_s26  ;;  %889 = vrot.lane.b32.xlu1 %v812_v20, %s3809_s26  ;;  %v814_v19 = vpop.f32.mrb[18].mxu1 }
 0x2c0   : > { %v815_v52 = vpop.f32.mrb[19].mxu1 }
 0x310   : > { %v818_v54 = vpop.permute.xlu1 %817 }
 0x311   : > { %v820_v55 = vpop.permute.xlu0 %819 }
 0x312   : > { %v821_v31 = vsel %vm375_vm1, %v818_v54, %v820_v55  ;;  %v822_v32 = vsel %vm375_vm1, %v820_v55, %v818_v54 }
 0x313   : > { %v823_v43 = vmul.f32 %v822_v32, %v4075_v27  ;;  %v824_v44 = vmul.f32 %v821_v31, %v4069_v25 }
 0x314   : > { %v826_v62 = vpop.permute.xlu1 %825 }
 0x315   : > { %v828_v63 = vpop.permute.xlu0 %827 }
 0x316   : > { %v829_v6 = vsel %vm396_vm0, %v826_v62, %v828_v63  ;;  %v830_v8 = vsel %vm396_vm0, %v828_v63, %v826_v62 }
 0x317   : > { %v831_v35 = vmul.f32 %v830_v8, %v4078_v28  ;;  %v832_v36 = vmul.f32 %v829_v6, %v4072_v26 }
 0x318   : > { %v836_v3 = vpop.permute.xlu1 %835 }
 0x319   : > { %v838_v5 = vpop.permute.xlu0 %837  ;;  %v833_v20 = vadd.f32 %v831_v35, %v823_v43  ;;  %v834_v19 = vadd.f32 %v832_v36, %v824_v44 }
 0x31a   : > { %v839_v33 = vsel %vm418_vm2, %v836_v3, %v838_v5  ;;  %v840_v34 = vsel %vm418_vm2, %v838_v5, %v836_v3 }
 0x31b   : > { %v841_v49 = vmul.f32 %v840_v34, %v4101_v45  ;;  %v842_v50 = vmul.f32 %v839_v33, %v4104_v46 }
 0x31c   : > { %v846_v17 = vpop.permute.xlu1 %845 }
 0x31d   : > { %v848_v21 = vpop.permute.xlu0 %847  ;;  %v843_v62 = vadd.f32 %v841_v49, %v833_v20  ;;  %v844_v63 = vadd.f32 %v842_v50, %v834_v19 }
 0x31e   : > { %v849_v41 = vsel %vm440_vm3, %v846_v17, %v848_v21  ;;  %v850_v42 = vsel %vm440_vm3, %v848_v21, %v846_v17 }
 0x31f   : > { %v851_v52 = vmul.f32 %v850_v42, %v4107_v47  ;;  %v852_v54 = vmul.f32 %v849_v41, %v4110_v48 }
 0x321   : > { %v853_v8 = vadd.f32 %v851_v52, %v843_v62  ;;  %v854_v17 = vadd.f32 %v852_v54, %v844_v63 }
 0x322   : > { %v858_v51 = vpop.permute.xlu1 %857 }
 0x323   : > { %v860_v55 = vpop.permute.xlu0 %859  ;;  %v855_v36 = vadd.f32 %v853_v8, %v790_v39  ;;  %v856_v41 = vadd.f32 %v854_v17, %v792_v40 }
 0x324   : > { %v861_v3 = vsel %vm462_vm4, %v858_v51, %v860_v55  ;;  %v862_v5 = vsel %vm462_vm4, %v860_v55, %v858_v51 }
 0x325   : > { %v863_v33 = vmul.f32 %v861_v3, %v4125_v56  ;;  %v864_v34 = vmul.f32 %v862_v5, %v4128_v57 }
 0x327   : > { %v865_v51 = vadd.f32 %v863_v33, %v855_v36  ;;  %v866_v20 = vadd.f32 %v864_v34, %v856_v41  ;;  %v910_v33 = vld [vmem:[%s3964_s25] sm:$0xff]  ;;  %v911_v34 = vld [vmem:[%s3964_s25 + $0x8] sm:$0xff] }
 0x328   : > { %v868_v6 = vpop.permute.xlu1 %867  ;;  %v912_v41 = vmul.f32 0.02, %v910_v33 }
 0x329   : > { %v870_v21 = vpop.permute.xlu0 %869 }
 0x32a   : > { %v871_v31 = vsel %vm484_vm5, %v868_v6, %v870_v21  ;;  %v872_v32 = vsel %vm484_vm5, %v870_v21, %v868_v6 }
 0x32b   : > { %v873_v42 = vmul.f32 %v871_v31, %v4151_v22  ;;  %v874_v43 = vmul.f32 %v872_v32, %v4154_v23 }
 0x32c   : > { %v878_v35 = vpop.permute.xlu1 %877 }
 0x32d   : > { %v880_v44 = vpop.permute.xlu0 %879  ;;  %v875_v39 = vadd.f32 %v873_v42, %v865_v51  ;;  %v876_v40 = vadd.f32 %v874_v43, %v866_v20  ;;  %v913_v42 = vmul.f32 0.02, %v911_v34 }
 0x32e   : > { %v881_v49 = vsel %vm506_vm6, %v878_v35, %v880_v44  ;;  %v882_v50 = vsel %vm506_vm6, %v880_v44, %v878_v35 }
 0x32f   : > { %v883_v19 = vmul.f32 %v881_v49, %v4157_v24  ;;  %v884_v52 = vmul.f32 %v882_v50, %v4160_v29 }
 0x331   : > { %v888_v54 = vpop.permute.xlu0 %887  ;;  %v890_v55 = vpop.permute.xlu1 %889  ;;  %v885_v3 = vadd.f32 %v883_v19, %v875_v39  ;;  %v886_v5 = vadd.f32 %v884_v52, %v876_v40  ;;  %v1052_v19 = vmul.f32 0.75, %v4047_v12  ;;  %v1051_v52 = vmul.f32 0.75, %v4039_v10 }
 0x332   : > { %v891_v62 = vsel %vm528_vm7, %v888_v54, %v890_v55  ;;  %v892_v63 = vsel %vm528_vm7, %v890_v55, %v888_v54 }
 0x333   : > { %v893_v6 = vmul.f32 %v891_v62, %v4178_v38  ;;  %v894_v8 = vmul.f32 %v892_v63, %v4175_v37 }
 0x335   : > { %v895_v17 = vadd.f32 %v893_v6, %v885_v3  ;;  %v896_v21 = vadd.f32 %v894_v8, %v886_v5 }
 0x337   : > { %v902_v31 = vadd.f32 %v4280_v53, %v895_v17  ;;  %v903_v32 = vadd.f32 %v4280_v53, %v896_v21 }
 0x339   : > { %v904_v35 = vmul.f32 0.082361534, %v902_v31  ;;  %v905_v36 = vmul.f32 0.082361534, %v903_v32 }
 0x33b   : > { %v906_v43 = vsub.f32 %v3975_v0, %v904_v35  ;;  %v907_v44 = vsub.f32 %v3981_v1, %v905_v36  ;;  %v1050_v0 = vmul.f32 0.75, %v4030_v7  ;;  %v1049_v1 = vmul.f32 0.75, %v4021_v4 }
 0x33d   : > { %v908_v49 = vmul.f32 1.0101526, %v906_v43  ;;  %v909_v50 = vmul.f32 1.0101526, %v907_v44 }
 0x33f   : > { %v4336_v51 = vadd.f32 %v912_v41, %v908_v49  ;;  %v4338_v20 = vadd.f32 %v913_v42, %v909_v50 }
 0x341   : > { %918 = vrot.lane.b32.xlu1 %v4338_v20, %s5913_s13  ;;  %916 = vrot.lane.b32.xlu0 %v4336_v51, %s5913_s13 }
 0x345   : > { %926 = vrot.lane.b32.xlu1 %v4338_v20, %s5911_s15  ;;  %924 = vrot.lane.b32.xlu0 %v4336_v51, %s5911_s15 }
 0x349   : > { %934 = vrot.lane.b32.xlu1 %v4338_v20, %s5926_s10  ;;  %932 = vrot.lane.b32.xlu0 %v4336_v51, %s5926_s10 }
 0x34d   : > { %942 = vrot.lane.b32.xlu1 %v4338_v20, %s5927_s19  ;;  %940 = vrot.lane.b32.xlu0 %v4336_v51, %s5927_s19 }
 0x351   : > { %950 = vrot.lane.b32.xlu1 %v4338_v20, %s5928_s12  ;;  %948 = vrot.lane.b32.xlu0 %v4336_v51, %s5928_s12 }
 0x355   : > { %958 = vrot.lane.b32.xlu1 %v4338_v20, %s5929_s21  ;;  %956 = vrot.lane.b32.xlu0 %v4336_v51, %s5929_s21 }
 0x359   : > { %966 = vrot.lane.b32.xlu1 %v4338_v20, %s5930_s23  ;;  %964 = vrot.lane.b32.xlu0 %v4336_v51, %s5930_s23 }
 0x35d   : > { %974 = vrot.lane.b32.xlu1 %v4338_v20, %s3809_s26  ;;  %972 = vrot.lane.b32.xlu0 %v4336_v51, %s3809_s26 }
 0x361   : > { %1060 = vperm.xlu1 %3659, %v1050_v0   ;;  %1055 = vperm.xlu0 %3658, %v1049_v1  }
 0x365   : > { %1070 = vperm.xlu1 %3659, %v1052_v19   ;;  %1065 = vperm.xlu0 %3658, %v1051_v52  }
 0x3b3   : > { %v919_v39 = vpop.permute.xlu1 %918  ;;  %v917_v40 = vpop.permute.xlu0 %916 }
 0x3b4   : > { %v920_v54 = vsel %vm375_vm1, %v917_v40, %v919_v39  ;;  %v921_v55 = vsel %vm375_vm1, %v919_v39, %v917_v40 }
 0x3b5   : > { %v922_v10 = vmul.f32 %v921_v55, %v4075_v27  ;;  %v923_v63 = vmul.f32 %v920_v54, %v4069_v25 }
 0x3b7   : > { %v927_v62 = vpop.permute.xlu1 %926  ;;  %v925_v7 = vpop.permute.xlu0 %924 }
 0x3b8   : > { %v928_v4 = vsel %vm396_vm0, %v925_v7, %v927_v62  ;;  %v929_v12 = vsel %vm396_vm0, %v927_v62, %v925_v7 }
 0x3b9   : > { %v930_v3 = vmul.f32 %v929_v12, %v4078_v28  ;;  %v931_v5 = vmul.f32 %v928_v4, %v4072_v26 }
 0x3bb   : > { %v980_v6 = vpack.c.bf16 %v930_v3, %v922_v10  ;;  %v935_v8 = vpop.permute.xlu1 %934  ;;  %v933_v17 = vpop.permute.xlu0 %932  ;;  %v981_v21 = vpack.c.bf16 %v931_v5, %v923_v63 }
 0x3bc   : > { %v936_v31 = vsel %vm418_vm2, %v933_v17, %v935_v8  ;;  %v937_v32 = vsel %vm418_vm2, %v935_v8, %v933_v17 }
 0x3bd   : > { %996 = vmatprep.subr.bf16.mxu0 %v981_v21  ;;  %v938_v41 = vmul.f32 %v937_v32, %v4101_v45  ;;  %v939_v42 = vmul.f32 %v936_v31, %v4104_v46 }
 0x3be   : > { %997 = vmatpush1.bf16.msra.mxu0 %v980_v6 }
 0x3bf   : > { %v943_v33 = vpop.permute.xlu1 %942  ;;  %v941_v34 = vpop.permute.xlu0 %940 }
 0x3c0   : > { %v944_v35 = vsel %vm440_vm3, %v941_v34, %v943_v33  ;;  %v945_v36 = vsel %vm440_vm3, %v943_v33, %v941_v34 }
 0x3c1   : > { %v946_v43 = vmul.f32 %v945_v36, %v4107_v47  ;;  %v947_v44 = vmul.f32 %v944_v35, %v4110_v48 }
 0x3c3   : > { %v982_v49 = vpack.c.bf16 %v946_v43, %v938_v41  ;;  %v951_v50 = vpop.permute.xlu1 %950  ;;  %v949_v0 = vpop.permute.xlu0 %948  ;;  %v983_v1 = vpack.c.bf16 %v947_v44, %v939_v42 }
 0x3c4   : > { %v952_v19 = vsel %vm462_vm4, %v949_v0, %v951_v50  ;;  %v953_v52 = vsel %vm462_vm4, %v951_v50, %v949_v0 }
 0x3c5   : > { %v954_v39 = vmul.f32 %v952_v19, %v4125_v56  ;;  %v955_v40 = vmul.f32 %v953_v52, %v4128_v57  ;;  %998 = vmatprep.subr.bf16.mxu0 %v983_v1 }
 0x3c6   : > { %999 = vmatpush1.bf16.msra.mxu0 %v982_v49 }
 0x3c7   : > { %v984_v54 = vpack.c.bf16 %v954_v39, %v4336_v51  ;;  %v959_v55 = vpop.permute.xlu1 %958  ;;  %v957_v62 = vpop.permute.xlu0 %956  ;;  %v985_v7 = vpack.c.bf16 %v955_v40, %v4338_v20 }
 0x3c8   : > { %v960_v4 = vsel %vm484_vm5, %v957_v62, %v959_v55  ;;  %v961_v12 = vsel %vm484_vm5, %v959_v55, %v957_v62 }
 0x3c9   : > { %1000 = vmatprep.subr.bf16.mxu0 %v985_v7  ;;  %v962_v6 = vmul.f32 %v960_v4, %v4151_v22  ;;  %v963_v8 = vmul.f32 %v961_v12, %v4154_v23 }
 0x3ca   : > { %1001 = vmatpush1.bf16.msra.mxu0 %v984_v54 }
 0x3cb   : > { %v967_v10 = vpop.permute.xlu1 %966  ;;  %v965_v63 = vpop.permute.xlu0 %964 }
 0x3cc   : > { %v968_v3 = vsel %vm506_vm6, %v965_v63, %v967_v10  ;;  %v969_v5 = vsel %vm506_vm6, %v967_v10, %v965_v63 }
 0x3cd   : > { %v970_v17 = vmul.f32 %v968_v3, %v4157_v24  ;;  %v971_v21 = vmul.f32 %v969_v5, %v4160_v29 }
 0x3cf   : > { %v986_v31 = vpack.c.bf16 %v970_v17, %v962_v6  ;;  %v975_v32 = vpop.permute.xlu1 %974  ;;  %v973_v33 = vpop.permute.xlu0 %972  ;;  %v987_v34 = vpack.c.bf16 %v971_v21, %v963_v8 }
 0x3d0   : > { %v976_v35 = vsel %vm528_vm7, %v973_v33, %v975_v32  ;;  %v977_v36 = vsel %vm528_vm7, %v975_v32, %v973_v33 }
 0x3d1   : > { %v978_v41 = vmul.f32 %v976_v35, %v4178_v38  ;;  %v979_v42 = vmul.f32 %v977_v36, %v4175_v37  ;;  %1002 = vmatprep.subr.bf16.mxu0 %v987_v34 }
 0x3d2   : > { %1003 = vmatpush1.bf16.msra.mxu0 %v986_v31 }
 0x3d3   : > { %v988_v43 = vpack.c.bf16 %v978_v41, %v978_v41  ;;  %v989_v44 = vpack.c.bf16 %v979_v42, %v979_v42 }
 0x3d5   : > { %3519 = vmatprep.subr.msk.bf16.mxu0 %vm593_vm8, %v989_v44  ;;  %v991_v49 = vsel %vm593_vm8, %v988_v43, 0 }
 0x3d6   : > { %1005 = vmatpush1.bf16.msra.mxu0 %v991_v49 }
 0x3d9   : > { %3520 = vmatmul.mubr.msk.bf16.vlgmr.msra.gmra.mrb[8].mxu0 %vm586_vm9, %v4195_v58 }
 0x3da   : > { %1038 = vmatprep.mubr.bf16.mxu0 %v3807_v2 }
 0x3e0   : > { %v1056_v19 = vpop.permute.xlu0 %1055  ;;  %v1061_v58 = vpop.permute.xlu1 %1060 }
 0x3e1   : > { %3521 = vmatmul.mubr.msk.bf16.gmra.mrb[12].mxu0 %vm586_vm9, %v4203_v59 }
 0x3e2   : > { %1125 = vmatprep.mubr.bf16.mxu0 %v3807_v2 }
 0x3e4   : > { %v1066_v21 = vpop.permute.xlu0 %1065  ;;  %v1071_v41 = vpop.permute.xlu1 %1070 }
 0x4ac   : > { %v1030_v50 = vpop.f32.mrb[8].mxu0 }
 0x4ad   : > { %v1031_v0 = vadd.f32 %v1030_v50, %v4210_v61  ;;  %v1032_v1 = vpop.f32.mrb[9].mxu0 }
 0x4ae   : > { %v1033_v52 = vadd.f32 %v1032_v1, %v4210_v61  ;;  %v1034_v39 = vpop.f32.mrb[10].mxu0 }
 0x4af   : > { %v1073_v40 = vadd.f32 %v1056_v19, %v1031_v0  ;;  %v1035_v54 = vadd.f32 %v1034_v39, %v4208_v60  ;;  %v1036_v55 = vpop.f32.mrb[11].mxu0 }
 0x4b0   : > { %v1074_v62 = vadd.f32 %v1056_v19, %v1033_v52  ;;  %v1037_v7 = vadd.f32 %v1036_v55, %v4208_v60 }
 0x4b1   : > { %v1075_v4 = vadd.f32 %v1061_v58, %v1035_v54  ;;  %v1081_v12 = vmax.f32 %v1073_v40, 0.0 }
 0x4b2   : > { %v1076_v59 = vadd.f32 %v1061_v58, %v1037_v7  ;;  %v1082_v63 = vmax.f32 %v1074_v62, 0.0 }
 0x4b3   : > { %v1083_v10 = vmax.f32 %v1075_v4, 0.0 }
 0x4b4   : > { %v1084_v3 = vmax.f32 %v1076_v59, 0.0  ;;  %v1040_v5 = vpop.f32.mrb[12].mxu0 }
 0x4b5   : > { %v1089_v6 = vpack.c.bf16 %v1083_v10, %v1081_v12  ;;  %v1041_v8 = vadd.f32 %v1040_v5, %v4215_v15  ;;  %v1042_v17 = vpop.f32.mrb[13].mxu0 }
 0x4b6   : > { %v1043_v31 = vadd.f32 %v1042_v17, %v4215_v15  ;;  %v1044_v32 = vpop.f32.mrb[14].mxu0  ;;  %v1090_v33 = vpack.c.bf16 %v1084_v3, %v1082_v63 }
 0x4b7   : > { %v1077_v34 = vadd.f32 %v1066_v21, %v1041_v8  ;;  %v1045_v35 = vadd.f32 %v1044_v32, %v4218_v30  ;;  %v1046_v36 = vpop.f32.mrb[15].mxu0 }
 0x4b8   : > { %v1078_v42 = vadd.f32 %v1066_v21, %v1043_v31  ;;  %v1047_v43 = vadd.f32 %v1046_v36, %v4218_v30  ;;  %1093 = vmatprep.subr.bf16.mxu0 %v1090_v33  ;;  %3597 = vmatprep.subr.bf16.mxu1 %v1090_v33 }
 0x4b9   : > { %v1079_v44 = vadd.f32 %v1071_v41, %v1045_v35  ;;  %1094 = vmatpush1.bf16.msra.mxu0 %v1089_v6  ;;  %3599 = vmatpush1.bf16.msra.mxu1 %v1089_v6  ;;  %v1085_v50 = vmax.f32 %v1077_v34, 0.0 }
 0x4ba   : > { %v1080_v49 = vadd.f32 %v1071_v41, %v1047_v43  ;;  %v1086_v1 = vmax.f32 %v1078_v42, 0.0 }
 0x4bb   : > { %v1087_v0 = vmax.f32 %v1079_v44, 0.0 }
 0x4bc   : > { %v1088_v19 = vmax.f32 %v1080_v49, 0.0 }
 0x4bd   : > { %v1091_v52 = vpack.c.bf16 %v1087_v0, %v1085_v50 }
 0x4be   : > { %v1092_v39 = vpack.c.bf16 %v1088_v19, %v1086_v1 }
 0x4c0   : > { %1095 = vmatprep.subr.bf16.mxu0 %v1092_v39  ;;  %3598 = vmatprep.subr.bf16.mxu1 %v1092_v39 }
 0x4c1   : > { %1096 = vmatpush1.bf16.msra.mxu0 %v1091_v52  ;;  %3600 = vmatpush1.bf16.msra.mxu1 %v1091_v52 }
 0x4c4   : > { %3522 = vmatmul.mubr.msk.bf16.vlgmr.msra.gmra.mrb[16].mxu0 %vm720_vm10, %v4227_v9  ;;  %3524 = vmatmul.mubr.msk.bf16.vlgmr.msra.gmra.mrb[20].mxu1 %vm720_vm10, %v4243_v13 }
 0x4c5   : > { %1135 = vmatprep.mubr.bf16.mxu0 %v3807_v2  ;;  %1155 = vmatprep.mubr.bf16.mxu1 %v3807_v2 }
 0x4cc   : > { %3523 = vmatmul.mubr.msk.bf16.gmra.mrb[20].mxu0 %vm720_vm10, %v4235_v11  ;;  %3525 = vmatmul.mubr.msk.bf16.gmra.mrb[24].mxu1 %vm720_vm10, %v4251_v14 }
 0x4cd   : > { %1165 = vmatprep.mubr.bf16.mxu1 %v3807_v2  ;;  %1381 = vmatprep.mubr.bf16.mxu0 %v3807_v2 }
 0x4d4   : > { %3526 = vmatmul.mubr.msk.bf16.gmra.mrb[28].mxu1 %vm720_vm10, %v4259_v16 }
 0x4d5   : > { %1734 = vmatprep.mubr.bf16.mxu1 %v3807_v2 }
 0x597   : > { %v1127_v9 = vpop.f32.mrb[16].mxu0  ;;  %v4457_v13 = vpop.f32.mrb[20].mxu1 }
 0x598   : > { %v1129_v40 = vpop.f32.mrb[17].mxu0  ;;  %1174 = vrot.lane.b32.xlu0 %v1127_v9, %s5913_s13  ;;  %v4460_v54 = vpop.f32.mrb[21].mxu1 }
 0x599   : > { %1176 = vrot.lane.b32.xlu1 %v1129_v40, %s5913_s13  ;;  %v1131_v11 = vpop.f32.mrb[18].mxu0  ;;  %v1151_v14 = vpop.f32.mrb[22].mxu1 }
 0x59a   : > { %v1133_v55 = vpop.f32.mrb[19].mxu0  ;;  %v1153_v58 = vpop.f32.mrb[23].mxu1 }
 0x59c   : > { %1182 = vrot.lane.b32.xlu0 %v1131_v11, %s5911_s15 }
 0x59d   : > { %1184 = vrot.lane.b32.xlu1 %v1133_v55, %s5911_s15 }
 0x59f   : > { %v1137_v16 = vpop.f32.mrb[20].mxu0  ;;  %v1157_v62 = vpop.f32.mrb[24].mxu1 }
 0x5a0   : > { %1214 = vrot.lane.b32.xlu0 %v1151_v14, %s5928_s12  ;;  %v1139_v7 = vpop.f32.mrb[21].mxu0  ;;  %v1159_v4 = vpop.f32.mrb[25].mxu1 }
 0x5a1   : > { %1216 = vrot.lane.b32.xlu1 %v1153_v58, %s5928_s12  ;;  %v1141_v59 = vpop.f32.mrb[22].mxu0  ;;  %v1161_v12 = vpop.f32.mrb[26].mxu1 }
 0x5a2   : > { %v1143_v10 = vpop.f32.mrb[23].mxu0  ;;  %v1163_v63 = vpop.f32.mrb[27].mxu1 }
 0x5a4   : > { %1192 = vrot.lane.b32.xlu0 %v1137_v16, %s5926_s10 }
 0x5a5   : > { %1194 = vrot.lane.b32.xlu1 %v1139_v7, %s5926_s10 }
 0x5a7   : > { %v1167_v3 = vpop.f32.mrb[28].mxu1 }
 0x5a8   : > { %1202 = vrot.lane.b32.xlu0 %v1141_v59, %s5927_s19  ;;  %v1169_v5 = vpop.f32.mrb[29].mxu1 }
 0x5a9   : > { %1204 = vrot.lane.b32.xlu1 %v1143_v10, %s5927_s19  ;;  %v1171_v6 = vpop.f32.mrb[30].mxu1 }
 0x5aa   : > { %v1172_v8 = vpop.f32.mrb[31].mxu1 }
 0x5ac   : > { %1224 = vrot.lane.b32.xlu0 %v1157_v62, %s5929_s21 }
 0x5ad   : > { %1226 = vrot.lane.b32.xlu1 %v1159_v4, %s5929_s21 }
 0x5b0   : > { %1234 = vrot.lane.b32.xlu0 %v1161_v12, %s5930_s23 }
 0x5b1   : > { %1236 = vrot.lane.b32.xlu1 %v1163_v63, %s5930_s23 }
 0x5b4   : > { %1244 = vrot.lane.b32.xlu0 %v1167_v3, %s3809_s26 }
 0x5b5   : > { %1246 = vrot.lane.b32.xlu1 %v1169_v5, %s3809_s26 }
 0x60a   : > { %v1175_v17 = vpop.permute.xlu0 %1174 }
 0x60b   : > { %v1177_v21 = vpop.permute.xlu1 %1176 }
 0x60c   : > { %v1178_v41 = vsel %vm375_vm1, %v1175_v17, %v1177_v21  ;;  %v1179_v42 = vsel %vm375_vm1, %v1177_v21, %v1175_v17 }
 0x60d   : > { %v1180_v19 = vmul.f32 %v1179_v42, %v4075_v27  ;;  %v1181_v52 = vmul.f32 %v1178_v41, %v4069_v25 }
 0x60e   : > { %v1183_v31 = vpop.permute.xlu0 %1182 }
 0x60f   : > { %v1185_v32 = vpop.permute.xlu1 %1184 }
 0x610   : > { %v1186_v35 = vsel %vm396_vm0, %v1183_v31, %v1185_v32  ;;  %v1187_v36 = vsel %vm396_vm0, %v1185_v32, %v1183_v31 }
 0x611   : > { %v1188_v44 = vmul.f32 %v1187_v36, %v4078_v28  ;;  %v1189_v49 = vmul.f32 %v1186_v35, %v4072_v26 }
 0x612   : > { %v1215_v33 = vpop.permute.xlu0 %1214 }
 0x613   : > { %v1217_v34 = vpop.permute.xlu1 %1216  ;;  %v1190_v11 = vadd.f32 %v1188_v44, %v1180_v19  ;;  %v1191_v14 = vadd.f32 %v1189_v49, %v1181_v52 }
 0x614   : > { %v1218_v12 = vsel %vm462_vm4, %v1215_v33, %v1217_v34  ;;  %v1219_v10 = vsel %vm462_vm4, %v1217_v34, %v1215_v33 }
 0x615   : > { %v1220_v21 = vmul.f32 %v1218_v12, %v4125_v56  ;;  %v1221_v31 = vmul.f32 %v1219_v10, %v4128_v57 }
 0x616   : > { %v1193_v43 = vpop.permute.xlu0 %1192 }
 0x617   : > { %v1195_v50 = vpop.permute.xlu1 %1194 }
 0x618   : > { %v1196_v0 = vsel %vm418_vm2, %v1193_v43, %v1195_v50  ;;  %v1197_v1 = vsel %vm418_vm2, %v1195_v50, %v1193_v43 }
 0x619   : > { %v1198_v39 = vmul.f32 %v1197_v1, %v4101_v45  ;;  %v1199_v9 = vmul.f32 %v1196_v0, %v4104_v46 }
 0x61a   : > { %v1203_v40 = vpop.permute.xlu0 %1202 }
 0x61b   : > { %v1205_v55 = vpop.permute.xlu1 %1204  ;;  %v1200_v62 = vadd.f32 %v1198_v39, %v1190_v11  ;;  %v1201_v7 = vadd.f32 %v1199_v9, %v1191_v14 }
 0x61c   : > { %v1206_v58 = vsel %vm440_vm3, %v1203_v40, %v1205_v55  ;;  %v1207_v16 = vsel %vm440_vm3, %v1205_v55, %v1203_v40 }
 0x61d   : > { %v1208_v4 = vmul.f32 %v1207_v16, %v4107_v47  ;;  %v1209_v59 = vmul.f32 %v1206_v58, %v4110_v48 }
 0x61e   : > { %v1225_v63 = vpop.permute.xlu0 %1224 }
 0x61f   : > { %v1210_v3 = vadd.f32 %v1208_v4, %v1200_v62  ;;  %v1211_v5 = vadd.f32 %v1209_v59, %v1201_v7  ;;  %v1227_v6 = vpop.permute.xlu1 %1226  ;;  %v3527_v7 = vld [vmem:[%s3964_s25 + $0x10] sm:$0xff]  ;;  %v3528_v4 = vld [vmem:[%s3964_s25 + $0x18] sm:$0xff] }
 0x620   : > { %v1228_v8 = vsel %vm484_vm5, %v1225_v63, %v1227_v6  ;;  %v1229_v17 = vsel %vm484_vm5, %v1227_v6, %v1225_v63  ;;  %v1265_v10 = vmul.f32 0.017157143, %v3527_v7  ;;  %v1266_v63 = vmul.f32 0.017157143, %v3528_v4 }
 0x621   : > { %v1212_v32 = vadd.f32 %v1210_v3, %v4457_v13  ;;  %v1213_v35 = vadd.f32 %v1211_v5, %v4460_v54  ;;  %v1230_v41 = vmul.f32 %v1228_v8, %v4151_v22  ;;  %v1231_v42 = vmul.f32 %v1229_v17, %v4154_v23 }
 0x622   : > { %v1235_v36 = vpop.permute.xlu0 %1234 }
 0x623   : > { %v1222_v33 = vadd.f32 %v1220_v21, %v1212_v32  ;;  %v1223_v34 = vadd.f32 %v1221_v31, %v1213_v35  ;;  %v1237_v43 = vpop.permute.xlu1 %1236  ;;  %v4578_v31 = vld [vmem:[%s5896_s5] sm:$0xff]  ;;  %v4584_v35 = vld [vmem:[%s5896_s5 + $0x18] sm:$0xff] }
 0x624   : > { %v1238_v44 = vsel %vm506_vm6, %v1235_v36, %v1237_v43  ;;  %v1239_v49 = vsel %vm506_vm6, %v1237_v43, %v1235_v36  ;;  %v1402_v32 = vmul.f32 0.625, %v4578_v31  ;;  %v1405_v36 = vmul.f32 0.625, %v4584_v35 }
 0x625   : > { %v1232_v50 = vadd.f32 %v1230_v41, %v1222_v33  ;;  %v1233_v0 = vadd.f32 %v1231_v42, %v1223_v34  ;;  %v1240_v13 = vmul.f32 %v1238_v44, %v4157_v24  ;;  %v1241_v54 = vmul.f32 %v1239_v49, %v4160_v29  ;;  %v4590_v33 = vld [vmem:[%s5896_s5 + $0x10] sm:$0xff] }
 0x626   : > { %v1245_v1 = vpop.permute.xlu0 %1244  ;;  %v1404_v34 = vmul.f32 0.625, %v4590_v33 }
 0x627   : > { %v1247_v19 = vpop.permute.xlu1 %1246  ;;  %v1242_v9 = vadd.f32 %v1240_v13, %v1232_v50  ;;  %v1243_v40 = vadd.f32 %v1241_v54, %v1233_v0 }
 0x628   : > { %v1248_v52 = vsel %vm528_vm7, %v1245_v1, %v1247_v19  ;;  %v1249_v39 = vsel %vm528_vm7, %v1247_v19, %v1245_v1 }
 0x629   : > { %v1250_v11 = vmul.f32 %v1248_v52, %v4178_v38  ;;  %v1251_v14 = vmul.f32 %v1249_v39, %v4175_v37 }
 0x62b   : > { %v1252_v55 = vadd.f32 %v1250_v11, %v1242_v9  ;;  %v1253_v58 = vadd.f32 %v1251_v14, %v1243_v40 }
 0x62d   : > { %v1254_v16 = vadd.f32 %v1252_v55, %v4280_v53  ;;  %v1255_v62 = vadd.f32 %v1253_v58, %v4280_v53 }
 0x62f   : > { %v1256_v59 = vmul.f32 0.08318531, %v1254_v16  ;;  %v1257_v12 = vmul.f32 0.08318531, %v1255_v62 }
 0x631   : > { %v1258_v3 = vsub.f32 %v4336_v51, %v1256_v59  ;;  %v1259_v5 = vsub.f32 %v4338_v20, %v1257_v12  ;;  %v4572_v51 = vld [vmem:[%s5896_s5 + $0x8] sm:$0xff] }
 0x632   : > { %v1403_v20 = vmul.f32 0.625, %v4572_v51 }
 0x633   : > { %v1260_v6 = vmul.f32 1.0086906, %v1258_v3  ;;  %v1261_v8 = vmul.f32 1.0086906, %v1259_v5 }
 0x635   : > { %v4533_v17 = vadd.f32 %v1265_v10, %v1260_v6  ;;  %v4535_v21 = vadd.f32 %v1266_v63, %v1261_v8 }
 0x637   : > { %1271 = vrot.lane.b32.xlu1 %v4535_v21, %s5913_s13  ;;  %1269 = vrot.lane.b32.xlu0 %v4533_v17, %s5913_s13  ;;  %s5931_s13 = smov 17  }
 0x63b   : > { %1279 = vrot.lane.b32.xlu1 %v4535_v21, %s5911_s15  ;;  %1277 = vrot.lane.b32.xlu0 %v4533_v17, %s5911_s15 }
 0x63f   : > { %1287 = vrot.lane.b32.xlu1 %v4535_v21, %s5926_s10  ;;  %1285 = vrot.lane.b32.xlu0 %v4533_v17, %s5926_s10 }
 0x643   : > { %1295 = vrot.lane.b32.xlu1 %v4535_v21, %s5927_s19  ;;  %1293 = vrot.lane.b32.xlu0 %v4533_v17, %s5927_s19 }
 0x647   : > { %1303 = vrot.lane.b32.xlu1 %v4535_v21, %s5928_s12  ;;  %1301 = vrot.lane.b32.xlu0 %v4533_v17, %s5928_s12 }
 0x64b   : > { %1311 = vrot.lane.b32.xlu1 %v4535_v21, %s5929_s21  ;;  %1309 = vrot.lane.b32.xlu0 %v4533_v17, %s5929_s21 }
 0x64f   : > { %1319 = vrot.lane.b32.xlu1 %v4535_v21, %s5930_s23  ;;  %1317 = vrot.lane.b32.xlu0 %v4533_v17, %s5930_s23 }
 0x653   : > { %1327 = vrot.lane.b32.xlu1 %v4535_v21, %s3809_s26  ;;  %1325 = vrot.lane.b32.xlu0 %v4533_v17, %s3809_s26 }
 0x657   : > { %1413 = vperm.xlu1 %3659, %v1403_v20   ;;  %1408 = vperm.xlu0 %3658, %v1402_v32  }
 0x65b   : > { %1423 = vperm.xlu1 %3659, %v1405_v36   ;;  %1418 = vperm.xlu0 %3658, %v1404_v34  }
 0x6a9   : > { %v1272_v41 = vpop.permute.xlu1 %1271  ;;  %v1270_v42 = vpop.permute.xlu0 %1269 }
 0x6aa   : > { %v1273_v43 = vsel %vm375_vm1, %v1270_v42, %v1272_v41  ;;  %v1274_v44 = vsel %vm375_vm1, %v1272_v41, %v1270_v42 }
 0x6ab   : > { %v1275_v54 = vmul.f32 %v1274_v44, %v4075_v27  ;;  %v1276_v1 = vmul.f32 %v1273_v43, %v4069_v25 }
 0x6ad   : > { %v1280_v49 = vpop.permute.xlu1 %1279  ;;  %v1278_v50 = vpop.permute.xlu0 %1277 }
 0x6ae   : > { %v1281_v0 = vsel %vm396_vm0, %v1278_v50, %v1280_v49  ;;  %v1282_v13 = vsel %vm396_vm0, %v1280_v49, %v1278_v50 }
 0x6af   : > { %v1283_v19 = vmul.f32 %v1282_v13, %v4078_v28  ;;  %v1284_v52 = vmul.f32 %v1281_v0, %v4072_v26 }
 0x6b1   : > { %v1333_v39 = vpack.c.bf16 %v1283_v19, %v1275_v54  ;;  %v1288_v9 = vpop.permute.xlu1 %1287  ;;  %v1286_v40 = vpop.permute.xlu0 %1285  ;;  %v1334_v11 = vpack.c.bf16 %v1284_v52, %v1276_v1 }
 0x6b2   : > { %v1289_v14 = vsel %vm418_vm2, %v1286_v40, %v1288_v9  ;;  %v1290_v55 = vsel %vm418_vm2, %v1288_v9, %v1286_v40 }
 0x6b3   : > { %1349 = vmatprep.subr.bf16.mxu0 %v1334_v11  ;;  %v1291_v4 = vmul.f32 %v1290_v55, %v4101_v45  ;;  %v1292_v59 = vmul.f32 %v1289_v14, %v4104_v46 }
 0x6b4   : > { %1350 = vmatpush1.bf16.msra.mxu0 %v1333_v39 }
 0x6b5   : > { %v1296_v58 = vpop.permute.xlu1 %1295  ;;  %v1294_v16 = vpop.permute.xlu0 %1293 }
 0x6b6   : > { %v1297_v62 = vsel %vm440_vm3, %v1294_v16, %v1296_v58  ;;  %v1298_v7 = vsel %vm440_vm3, %v1296_v58, %v1294_v16 }
 0x6b7   : > { %v1299_v12 = vmul.f32 %v1298_v7, %v4107_v47  ;;  %v1300_v10 = vmul.f32 %v1297_v62, %v4110_v48 }
 0x6b9   : > { %v1335_v63 = vpack.c.bf16 %v1299_v12, %v1291_v4  ;;  %v1304_v3 = vpop.permute.xlu1 %1303  ;;  %v1302_v5 = vpop.permute.xlu0 %1301  ;;  %v1336_v6 = vpack.c.bf16 %v1300_v10, %v1292_v59  ;;  %v4648_v12 = vld [vmem:[%s5894_s3] sm:$0xff]   ;;  %v4656_v10 = vld [vmem:[%s5894_s3 + $0x8] sm:$0xff]  }
 0x6ba   : > { %v1305_v8 = vsel %vm462_vm4, %v1302_v5, %v1304_v3  ;;  %v1306_v20 = vsel %vm462_vm4, %v1304_v3, %v1302_v5 }
 0x6bb   : > { %v1307_v32 = vmul.f32 %v1305_v8, %v4125_v56  ;;  %v1308_v36 = vmul.f32 %v1306_v20, %v4128_v57  ;;  %1351 = vmatprep.subr.bf16.mxu0 %v1336_v6 }
 0x6bc   : > { %1352 = vmatpush1.bf16.msra.mxu0 %v1335_v63 }
 0x6bd   : > { %v1337_v34 = vpack.c.bf16 %v1307_v32, %v4533_v17  ;;  %v1312_v41 = vpop.permute.xlu1 %1311  ;;  %v1310_v42 = vpop.permute.xlu0 %1309  ;;  %v1338_v43 = vpack.c.bf16 %v1308_v36, %v4535_v21 }
 0x6be   : > { %v1313_v44 = vsel %vm484_vm5, %v1310_v42, %v1312_v41  ;;  %v1314_v49 = vsel %vm484_vm5, %v1312_v41, %v1310_v42 }
 0x6bf   : > { %1353 = vmatprep.subr.bf16.mxu0 %v1338_v43  ;;  %v1315_v1 = vmul.f32 %v1313_v44, %v4151_v22  ;;  %v1316_v19 = vmul.f32 %v1314_v49, %v4154_v23 }
 0x6c0   : > { %1354 = vmatpush1.bf16.msra.mxu0 %v1337_v34 }
 0x6c1   : > { %v1320_v50 = vpop.permute.xlu1 %1319  ;;  %v1318_v0 = vpop.permute.xlu0 %1317 }
 0x6c2   : > { %v1321_v13 = vsel %vm506_vm6, %v1318_v0, %v1320_v50  ;;  %v1322_v54 = vsel %vm506_vm6, %v1320_v50, %v1318_v0 }
 0x6c3   : > { %v1323_v52 = vmul.f32 %v1321_v13, %v4157_v24  ;;  %v1324_v39 = vmul.f32 %v1322_v54, %v4160_v29 }
 0x6c5   : > { %v1339_v9 = vpack.c.bf16 %v1323_v52, %v1315_v1  ;;  %v1328_v40 = vpop.permute.xlu1 %1327  ;;  %v1326_v11 = vpop.permute.xlu0 %1325  ;;  %v1340_v14 = vpack.c.bf16 %v1324_v39, %v1316_v19 }
 0x6c6   : > { %v1329_v55 = vsel %vm528_vm7, %v1326_v11, %v1328_v40  ;;  %v1330_v58 = vsel %vm528_vm7, %v1328_v40, %v1326_v11 }
 0x6c7   : > { %v1331_v16 = vmul.f32 %v1329_v55, %v4178_v38  ;;  %v1332_v62 = vmul.f32 %v1330_v58, %v4175_v37  ;;  %1355 = vmatprep.subr.bf16.mxu0 %v1340_v14 }
 0x6c8   : > { %1356 = vmatpush1.bf16.msra.mxu0 %v1339_v9 }
 0x6c9   : > { %v1341_v7 = vpack.c.bf16 %v1331_v16, %v1331_v16  ;;  %v1342_v4 = vpack.c.bf16 %v1332_v62, %v1332_v62 }
 0x6cb   : > { %3529 = vmatprep.subr.msk.bf16.mxu0 %vm593_vm8, %v1342_v4  ;;  %v1344_v59 = vsel %vm593_vm8, %v1341_v7, 0 }
 0x6cc   : > { %1358 = vmatpush1.bf16.msra.mxu0 %v1344_v59 }
 0x6cf   : > { %3530 = vmatmul.mubr.msk.bf16.vlgmr.msra.gmra.mrb[24].mxu0 %vm586_vm9, %v4648_v12 }
 0x6d0   : > { %1391 = vmatprep.mubr.bf16.mxu0 %v3807_v2 }
 0x6d6   : > { %v1409_v6 = vpop.permute.xlu0 %1408  ;;  %v1414_v41 = vpop.permute.xlu1 %1413 }
 0x6d7   : > { %3531 = vmatmul.mubr.msk.bf16.gmra.mrb[28].mxu0 %vm586_vm9, %v4656_v10 }
 0x6d8   : > { %1478 = vmatprep.mubr.bf16.mxu0 %v3807_v2 }
 0x6da   : > { %v1419_v9 = vpop.permute.xlu0 %1418  ;;  %v1424_v62 = vpop.permute.xlu1 %1423 }
 0x7a2   : > { %v1383_v63 = vpop.f32.mrb[24].mxu0 }
 0x7a3   : > { %v1384_v3 = vadd.f32 %v1383_v63, %v4210_v61  ;;  %v1385_v5 = vpop.f32.mrb[25].mxu0 }
 0x7a4   : > { %v1386_v8 = vadd.f32 %v1385_v5, %v4210_v61  ;;  %v1387_v20 = vpop.f32.mrb[26].mxu0 }
 0x7a5   : > { %v1426_v32 = vadd.f32 %v1409_v6, %v1384_v3  ;;  %v1388_v36 = vadd.f32 %v1387_v20, %v4208_v60  ;;  %v1389_v34 = vpop.f32.mrb[27].mxu0 }
 0x7a6   : > { %v1427_v42 = vadd.f32 %v1409_v6, %v1386_v8  ;;  %v1390_v43 = vadd.f32 %v1389_v34, %v4208_v60  ;;  %v4680_v34 = vld [vmem:[%s5897_s6 + $0x8] sm:$0xff]  }
 0x7a7   : > { %v1428_v44 = vadd.f32 %v1414_v41, %v1388_v36  ;;  %v1434_v50 = vmax.f32 %v1426_v32, 0.0  ;;  %v4672_v36 = vld [vmem:[%s5897_s6] sm:$0xff]  }
 0x7a8   : > { %v1429_v49 = vadd.f32 %v1414_v41, %v1390_v43  ;;  %v1435_v13 = vmax.f32 %v1427_v42, 0.0  ;;  %v4688_v41 = vld [vmem:[%s5897_s6 + $0x10] sm:$0xff]   ;;  %v4696_v42 = vld [vmem:[%s5897_s6 + $0x18] sm:$0xff]   ;;  %v4704_v43 = vld [vmem:[%s5897_s6 + $0x20] ss:$0 sps:$4 sm:$0xff]  }
 0x7a9   : > { %v1436_v0 = vmax.f32 %v1428_v44, 0.0 }
 0x7aa   : > { %v1437_v54 = vmax.f32 %v1429_v49, 0.0  ;;  %v1393_v1 = vpop.f32.mrb[28].mxu0 }
 0x7ab   : > { %v1442_v19 = vpack.c.bf16 %v1436_v0, %v1434_v50  ;;  %v1394_v52 = vadd.f32 %v1393_v1, %v4215_v15  ;;  %v1395_v39 = vpop.f32.mrb[29].mxu0 }
 0x7ac   : > { %v1396_v40 = vadd.f32 %v1395_v39, %v4215_v15  ;;  %v1397_v11 = vpop.f32.mrb[30].mxu0  ;;  %v1443_v14 = vpack.c.bf16 %v1437_v54, %v1435_v13 }
 0x7ad   : > { %v1430_v55 = vadd.f32 %v1419_v9, %v1394_v52  ;;  %v1398_v58 = vadd.f32 %v1397_v11, %v4218_v30  ;;  %v1399_v16 = vpop.f32.mrb[31].mxu0 }
 0x7ae   : > { %v1431_v7 = vadd.f32 %v1419_v9, %v1396_v40  ;;  %v1400_v4 = vadd.f32 %v1399_v16, %v4218_v30  ;;  %1446 = vmatprep.subr.bf16.mxu0 %v1443_v14 }
 0x7af   : > { %v1432_v59 = vadd.f32 %v1424_v62, %v1398_v58  ;;  %1447 = vmatpush1.bf16.msra.mxu0 %v1442_v19  ;;  %v1438_v3 = vmax.f32 %v1430_v55, 0.0 }
 0x7b0   : > { %v1433_v63 = vadd.f32 %v1424_v62, %v1400_v4  ;;  %v1439_v6 = vmax.f32 %v1431_v7, 0.0 }
 0x7b1   : > { %v1440_v5 = vmax.f32 %v1432_v59, 0.0 }
 0x7b2   : > { %v1441_v8 = vmax.f32 %v1433_v63, 0.0 }
 0x7b3   : > { %v1444_v20 = vpack.c.bf16 %v1440_v5, %v1438_v3 }
 0x7b4   : > { %v1445_v32 = vpack.c.bf16 %v1441_v8, %v1439_v6 }
 0x7b6   : > { %1448 = vmatprep.subr.bf16.mxu0 %v1445_v32 }
 0x7b7   : > { %1449 = vmatpush1.bf16.msra.mxu0 %v1444_v20 }
 0x7ba   : > { %3532 = vmatmul.mubr.msk.bf16.vlgmr.msra.gmra.mrb[32].mxu0 %vm720_vm10, %v4672_v36 }
 0x7bb   : > { %1488 = vmatprep.mubr.bf16.mxu0 %v3807_v2 }
 0x7c2   : > { %3533 = vmatmul.mubr.msk.bf16.gmra.mrb[36].mxu0 %vm720_vm10, %v4680_v34 }
 0x7c3   : > { %1498 = vmatprep.mubr.bf16.mxu0 %v3807_v2 }
 0x7ca   : > { %3534 = vmatmul.mubr.msk.bf16.gmra.mrb[40].mxu0 %vm720_vm10, %v4688_v41 }
 0x7cb   : > { %1508 = vmatprep.mubr.bf16.mxu0 %v3807_v2 }
 0x7d2   : > { %3535 = vmatmul.mubr.msk.bf16.gmra.mrb[44].mxu0 %vm720_vm10, %v4696_v42 }
 0x7d3   : > { %1518 = vmatprep.mubr.bf16.mxu0 %v3807_v2 }
 0x7da   : > { %3536 = vmatmul.mubr.msk.bf16.gmra.mrb[48].mxu0 %vm720_vm10, %v4704_v43 }
 0x7db   : > { %2087 = vmatprep.mubr.bf16.mxu0 %v3807_v2 }
 0x88d   : > { %v1480_v44 = vpop.f32.mrb[32].mxu0 }
 0x88e   : > { %v1482_v49 = vpop.f32.mrb[33].mxu0  ;;  %1527 = vrot.lane.b32.xlu0 %v1480_v44, %s5931_s13 }
 0x88f   : > { %1529 = vrot.lane.b32.xlu1 %v1482_v49, %s5931_s13  ;;  %v1484_v50 = vpop.f32.mrb[34].mxu0 }
 0x890   : > { %v1486_v0 = vpop.f32.mrb[35].mxu0 }
 0x892   : > { %1535 = vrot.lane.b32.xlu0 %v1484_v50, %s5932_s24 }
 0x893   : > { %1537 = vrot.lane.b32.xlu1 %v1486_v0, %s5932_s24 }
 0x895   : > { %v1490_v13 = vpop.f32.mrb[36].mxu0 }
 0x896   : > { %v1492_v54 = vpop.f32.mrb[37].mxu0  ;;  %1545 = vrot.lane.b32.xlu0 %v1490_v13, %s5926_s10 }
 0x897   : > { %1547 = vrot.lane.b32.xlu1 %v1492_v54, %s5926_s10  ;;  %v1494_v1 = vpop.f32.mrb[38].mxu0 }
 0x898   : > { %v1496_v19 = vpop.f32.mrb[39].mxu0 }
 0x89a   : > { %1555 = vrot.lane.b32.xlu0 %v1494_v1, %s5927_s19 }
 0x89b   : > { %1557 = vrot.lane.b32.xlu1 %v1496_v19, %s5927_s19 }
 0x89d   : > { %v1500_v52 = vpop.f32.mrb[40].mxu0 }
 0x89e   : > { %v1502_v39 = vpop.f32.mrb[41].mxu0 }
 0x89f   : > { %v1504_v9 = vpop.f32.mrb[42].mxu0 }
 0x8a0   : > { %v1506_v40 = vpop.f32.mrb[43].mxu0  ;;  %1567 = vrot.lane.b32.xlu0 %v1504_v9, %s5928_s12 }
 0x8a1   : > { %1569 = vrot.lane.b32.xlu1 %v1506_v40, %s5928_s12 }
 0x8a5   : > { %v1510_v11 = vpop.f32.mrb[44].mxu0 }
 0x8a6   : > { %v1512_v14 = vpop.f32.mrb[45].mxu0  ;;  %1577 = vrot.lane.b32.xlu0 %v1510_v11, %s5929_s21 }
 0x8a7   : > { %1579 = vrot.lane.b32.xlu1 %v1512_v14, %s5929_s21  ;;  %v1514_v55 = vpop.f32.mrb[46].mxu0 }
 0x8a8   : > { %v1516_v58 = vpop.f32.mrb[47].mxu0 }
 0x8aa   : > { %1587 = vrot.lane.b32.xlu0 %v1514_v55, %s5930_s23 }
 0x8ab   : > { %1589 = vrot.lane.b32.xlu1 %v1516_v58, %s5930_s23 }
 0x8ad   : > { %v1520_v16 = vpop.f32.mrb[48].mxu0 }
 0x8ae   : > { %v1522_v62 = vpop.f32.mrb[49].mxu0  ;;  %1597 = vrot.lane.b32.xlu0 %v1520_v16, %s3809_s26 }
 0x8af   : > { %1599 = vrot.lane.b32.xlu1 %v1522_v62, %s3809_s26  ;;  %v1524_v7 = vpop.f32.mrb[50].mxu0 }
 0x8b0   : > { %v1525_v4 = vpop.f32.mrb[51].mxu0 }
 0x900   : > { %v1528_v59 = vpop.permute.xlu0 %1527 }
 0x901   : > { %v1530_v63 = vpop.permute.xlu1 %1529 }
 0x902   : > { %v1531_v50 = vsel %vm375_vm1, %v1528_v59, %v1530_v63  ;;  %v1532_v0 = vsel %vm375_vm1, %v1530_v63, %v1528_v59 }
 0x903   : > { %v1533_v11 = vmul.f32 %v1532_v0, %v4075_v27  ;;  %v1534_v14 = vmul.f32 %v1531_v50, %v4069_v25 }
 0x904   : > { %v1536_v3 = vpop.permute.xlu0 %1535 }
 0x905   : > { %v1538_v5 = vpop.permute.xlu1 %1537 }
 0x906   : > { %v1539_v20 = vsel %vm396_vm0, %v1536_v3, %v1538_v5  ;;  %v1540_v32 = vsel %vm396_vm0, %v1538_v5, %v1536_v3 }
 0x907   : > { %v1541_v1 = vmul.f32 %v1540_v32, %v4078_v28  ;;  %v1542_v19 = vmul.f32 %v1539_v20, %v4072_v26 }
 0x908   : > { %v1546_v6 = vpop.permute.xlu0 %1545 }
 0x909   : > { %v1548_v8 = vpop.permute.xlu1 %1547  ;;  %v1543_v62 = vadd.f32 %v1541_v1, %v1533_v11  ;;  %v1544_v7 = vadd.f32 %v1542_v19, %v1534_v14 }
 0x90a   : > { %v1549_v13 = vsel %vm418_vm2, %v1546_v6, %v1548_v8  ;;  %v1550_v54 = vsel %vm418_vm2, %v1548_v8, %v1546_v6 }
 0x90b   : > { %v1551_v55 = vmul.f32 %v1550_v54, %v4101_v45  ;;  %v1552_v58 = vmul.f32 %v1549_v13, %v4104_v46 }
 0x90c   : > { %v1556_v44 = vpop.permute.xlu0 %1555 }
 0x90d   : > { %v1558_v49 = vpop.permute.xlu1 %1557  ;;  %v1553_v3 = vadd.f32 %v1551_v55, %v1543_v62  ;;  %v1554_v5 = vadd.f32 %v1552_v58, %v1544_v7 }
 0x90e   : > { %v1559_v9 = vsel %vm440_vm3, %v1556_v44, %v1558_v49  ;;  %v1560_v40 = vsel %vm440_vm3, %v1558_v49, %v1556_v44 }
 0x90f   : > { %v1561_v4 = vmul.f32 %v1560_v40, %v4107_v47  ;;  %v1562_v59 = vmul.f32 %v1559_v9, %v4110_v48 }
 0x911   : > { %v1563_v32 = vadd.f32 %v1561_v4, %v1553_v3  ;;  %v1564_v44 = vadd.f32 %v1562_v59, %v1554_v5 }
 0x912   : > { %v1568_v16 = vpop.permute.xlu0 %1567 }
 0x913   : > { %v1570_v63 = vpop.permute.xlu1 %1569  ;;  %v1565_v19 = vadd.f32 %v1563_v32, %v1500_v52  ;;  %v1566_v9 = vadd.f32 %v1564_v44, %v1502_v39 }
 0x914   : > { %v1571_v6 = vsel %vm462_vm4, %v1568_v16, %v1570_v63  ;;  %v1572_v8 = vsel %vm462_vm4, %v1570_v63, %v1568_v16 }
 0x915   : > { %v1573_v13 = vmul.f32 %v1571_v6, %v4125_v56  ;;  %v1574_v54 = vmul.f32 %v1572_v8, %v4128_v57 }
 0x917   : > { %v1575_v16 = vadd.f32 %v1573_v13, %v1565_v19  ;;  %v1576_v62 = vadd.f32 %v1574_v54, %v1566_v9  ;;  %v3537_v13 = vld [vmem:[%s3964_s25 + $0x20] sm:$0xff]  ;;  %v3538_v54 = vld [vmem:[%s3964_s25 + $0x28] sm:$0xff] }
 0x918   : > { %v1578_v20 = vpop.permute.xlu0 %1577  ;;  %v1618_v9 = vmul.f32 0.0143142855, %v3537_v13 }
 0x919   : > { %v1580_v49 = vpop.permute.xlu1 %1579 }
 0x91a   : > { %v1581_v50 = vsel %vm484_vm5, %v1578_v20, %v1580_v49  ;;  %v1582_v0 = vsel %vm484_vm5, %v1580_v49, %v1578_v20 }
 0x91b   : > { %v1583_v40 = vmul.f32 %v1581_v50, %v4151_v22  ;;  %v1584_v11 = vmul.f32 %v1582_v0, %v4154_v23 }
 0x91c   : > { %v1588_v1 = vpop.permute.xlu0 %1587 }
 0x91d   : > { %v1590_v14 = vpop.permute.xlu1 %1589  ;;  %v1585_v39 = vadd.f32 %v1583_v40, %v1575_v16  ;;  %v1586_v59 = vadd.f32 %v1584_v11, %v1576_v62  ;;  %v1619_v40 = vmul.f32 0.0143142855, %v3538_v54 }
 0x91e   : > { %v1591_v55 = vsel %vm506_vm6, %v1588_v1, %v1590_v14  ;;  %v1592_v58 = vsel %vm506_vm6, %v1590_v14, %v1588_v1 }
 0x91f   : > { %v1593_v7 = vmul.f32 %v1591_v55, %v4157_v24  ;;  %v1594_v4 = vmul.f32 %v1592_v58, %v4160_v29 }
 0x920   : > { %v1598_v52 = vpop.permute.xlu0 %1597 }
 0x921   : > { %v1600_v63 = vpop.permute.xlu1 %1599  ;;  %v1595_v6 = vadd.f32 %v1593_v7, %v1585_v39  ;;  %v1596_v8 = vadd.f32 %v1594_v4, %v1586_v59  ;;  %v1758_v7 = vmul.f32 0.5, %v4584_v35  ;;  %v1757_v4 = vmul.f32 0.5, %v4590_v33 }
 0x922   : > { %v1601_v3 = vsel %vm528_vm7, %v1598_v52, %v1600_v63  ;;  %v1602_v5 = vsel %vm528_vm7, %v1600_v63, %v1598_v52 }
 0x923   : > { %v1603_v20 = vmul.f32 %v1601_v3, %v4178_v38  ;;  %v1604_v32 = vmul.f32 %v1602_v5, %v4175_v37 }
 0x925   : > { %v1605_v44 = vadd.f32 %v1603_v20, %v1595_v6  ;;  %v1606_v49 = vadd.f32 %v1604_v32, %v1596_v8 }
 0x927   : > { %v1607_v50 = vadd.f32 %v1605_v44, %v4280_v53  ;;  %v1608_v0 = vadd.f32 %v1606_v49, %v4280_v53 }
 0x929   : > { %v1609_v1 = vmul.f32 0.08458971, %v1607_v50  ;;  %v1610_v19 = vmul.f32 0.08458971, %v1608_v0 }
 0x92b   : > { %v1611_v11 = vsub.f32 %v4533_v17, %v1609_v1  ;;  %v1612_v14 = vsub.f32 %v4535_v21, %v1610_v19  ;;  %v1756_v17 = vmul.f32 0.5, %v4572_v51  ;;  %v1755_v21 = vmul.f32 0.5, %v4578_v31 }
 0x92d   : > { %v1613_v55 = vmul.f32 1.0072349, %v1611_v11  ;;  %v1614_v58 = vmul.f32 1.0072349, %v1612_v14 }
 0x92f   : > { %v4779_v16 = vadd.f32 %v1618_v9, %v1613_v55  ;;  %v4781_v62 = vadd.f32 %v1619_v40, %v1614_v58 }
 0x931   : > { %1624 = vrot.lane.b32.xlu1 %v4781_v62, %s5931_s13  ;;  %1622 = vrot.lane.b32.xlu0 %v4779_v16, %s5931_s13 }
 0x935   : > { %1632 = vrot.lane.b32.xlu1 %v4781_v62, %s5932_s24  ;;  %1630 = vrot.lane.b32.xlu0 %v4779_v16, %s5932_s24 }
 0x939   : > { %1640 = vrot.lane.b32.xlu1 %v4781_v62, %s5926_s10  ;;  %1638 = vrot.lane.b32.xlu0 %v4779_v16, %s5926_s10 }
 0x93d   : > { %1648 = vrot.lane.b32.xlu1 %v4781_v62, %s5927_s19  ;;  %1646 = vrot.lane.b32.xlu0 %v4779_v16, %s5927_s19 }
 0x941   : > { %1656 = vrot.lane.b32.xlu1 %v4781_v62, %s5928_s12  ;;  %1654 = vrot.lane.b32.xlu0 %v4779_v16, %s5928_s12 }
 0x945   : > { %1664 = vrot.lane.b32.xlu1 %v4781_v62, %s5929_s21  ;;  %1662 = vrot.lane.b32.xlu0 %v4779_v16, %s5929_s21 }
 0x949   : > { %1672 = vrot.lane.b32.xlu1 %v4781_v62, %s5930_s23  ;;  %1670 = vrot.lane.b32.xlu0 %v4779_v16, %s5930_s23 }
 0x94d   : > { %1680 = vrot.lane.b32.xlu1 %v4781_v62, %s3809_s26  ;;  %1678 = vrot.lane.b32.xlu0 %v4779_v16, %s3809_s26 }
 0x951   : > { %1766 = vperm.xlu1 %3659, %v1756_v17   ;;  %1761 = vperm.xlu0 %3658, %v1755_v21  }
 0x955   : > { %1776 = vperm.xlu1 %3659, %v1758_v7   ;;  %1771 = vperm.xlu0 %3658, %v1757_v4  }
 0x9a3   : > { %v1625_v52 = vpop.permute.xlu1 %1624  ;;  %v1623_v39 = vpop.permute.xlu0 %1622 }
 0x9a4   : > { %v1626_v59 = vsel %vm375_vm1, %v1623_v39, %v1625_v52  ;;  %v1627_v63 = vsel %vm375_vm1, %v1625_v52, %v1623_v39 }
 0x9a5   : > { %v1628_v33 = vmul.f32 %v1627_v63, %v4075_v27  ;;  %v1629_v5 = vmul.f32 %v1626_v59, %v4069_v25 }
 0x9a7   : > { %v1633_v3 = vpop.permute.xlu1 %1632  ;;  %v1631_v51 = vpop.permute.xlu0 %1630 }
 0x9a8   : > { %v1634_v31 = vsel %vm396_vm0, %v1631_v51, %v1633_v3  ;;  %v1635_v35 = vsel %vm396_vm0, %v1633_v3, %v1631_v51 }
 0x9a9   : > { %v1636_v6 = vmul.f32 %v1635_v35, %v4078_v28  ;;  %v1637_v8 = vmul.f32 %v1634_v31, %v4072_v26 }
 0x9ab   : > { %v1686_v20 = vpack.c.bf16 %v1636_v6, %v1628_v33  ;;  %v1641_v32 = vpop.permute.xlu1 %1640  ;;  %v1639_v44 = vpop.permute.xlu0 %1638  ;;  %v1687_v49 = vpack.c.bf16 %v1637_v8, %v1629_v5 }
 0x9ac   : > { %v1642_v50 = vsel %vm418_vm2, %v1639_v44, %v1641_v32  ;;  %v1643_v0 = vsel %vm418_vm2, %v1641_v32, %v1639_v44 }
 0x9ad   : > { %1702 = vmatprep.subr.bf16.mxu1 %v1687_v49  ;;  %v1644_v9 = vmul.f32 %v1643_v0, %v4101_v45  ;;  %v1645_v40 = vmul.f32 %v1642_v50, %v4104_v46 }
 0x9ae   : > { %1703 = vmatpush1.bf16.msra.mxu1 %v1686_v20 }
 0x9af   : > { %v1649_v13 = vpop.permute.xlu1 %1648  ;;  %v1647_v54 = vpop.permute.xlu0 %1646 }
 0x9b0   : > { %v1650_v1 = vsel %vm440_vm3, %v1647_v54, %v1649_v13  ;;  %v1651_v19 = vsel %vm440_vm3, %v1649_v13, %v1647_v54 }
 0x9b1   : > { %v1652_v11 = vmul.f32 %v1651_v19, %v4107_v47  ;;  %v1653_v14 = vmul.f32 %v1650_v1, %v4110_v48 }
 0x9b3   : > { %v1688_v55 = vpack.c.bf16 %v1652_v11, %v1644_v9  ;;  %v1657_v58 = vpop.permute.xlu1 %1656  ;;  %v1655_v17 = vpop.permute.xlu0 %1654  ;;  %v1689_v21 = vpack.c.bf16 %v1653_v14, %v1645_v40 }
 0x9b4   : > { %v1658_v7 = vsel %vm462_vm4, %v1655_v17, %v1657_v58  ;;  %v1659_v4 = vsel %vm462_vm4, %v1657_v58, %v1655_v17 }
 0x9b5   : > { %v1660_v52 = vmul.f32 %v1658_v7, %v4125_v56  ;;  %v1661_v39 = vmul.f32 %v1659_v4, %v4128_v57  ;;  %1704 = vmatprep.subr.bf16.mxu1 %v1689_v21 }
 0x9b6   : > { %1705 = vmatpush1.bf16.msra.mxu1 %v1688_v55 }
 0x9b7   : > { %v1690_v59 = vpack.c.bf16 %v1660_v52, %v4779_v16  ;;  %v1665_v63 = vpop.permute.xlu1 %1664  ;;  %v1663_v3 = vpop.permute.xlu0 %1662  ;;  %v1691_v51 = vpack.c.bf16 %v1661_v39, %v4781_v62 }
 0x9b8   : > { %v1666_v31 = vsel %vm484_vm5, %v1663_v3, %v1665_v63  ;;  %v1667_v35 = vsel %vm484_vm5, %v1665_v63, %v1663_v3 }
 0x9b9   : > { %1706 = vmatprep.subr.bf16.mxu1 %v1691_v51  ;;  %v1668_v20 = vmul.f32 %v1666_v31, %v4151_v22  ;;  %v1669_v32 = vmul.f32 %v1667_v35, %v4154_v23 }
 0x9ba   : > { %1707 = vmatpush1.bf16.msra.mxu1 %v1690_v59 }
 0x9bb   : > { %v1673_v33 = vpop.permute.xlu1 %1672  ;;  %v1671_v5 = vpop.permute.xlu0 %1670 }
 0x9bc   : > { %v1674_v6 = vsel %vm506_vm6, %v1671_v5, %v1673_v33  ;;  %v1675_v8 = vsel %vm506_vm6, %v1673_v33, %v1671_v5 }
 0x9bd   : > { %v1676_v44 = vmul.f32 %v1674_v6, %v4157_v24  ;;  %v1677_v49 = vmul.f32 %v1675_v8, %v4160_v29 }
 0x9bf   : > { %v1692_v50 = vpack.c.bf16 %v1676_v44, %v1668_v20  ;;  %v1681_v0 = vpop.permute.xlu1 %1680  ;;  %v1679_v13 = vpop.permute.xlu0 %1678  ;;  %v1693_v54 = vpack.c.bf16 %v1677_v49, %v1669_v32 }
 0x9c0   : > { %v1682_v1 = vsel %vm528_vm7, %v1679_v13, %v1681_v0  ;;  %v1683_v19 = vsel %vm528_vm7, %v1681_v0, %v1679_v13 }
 0x9c1   : > { %v1684_v9 = vmul.f32 %v1682_v1, %v4178_v38  ;;  %v1685_v40 = vmul.f32 %v1683_v19, %v4175_v37  ;;  %1708 = vmatprep.subr.bf16.mxu1 %v1693_v54 }
 0x9c2   : > { %1709 = vmatpush1.bf16.msra.mxu1 %v1692_v50 }
 0x9c3   : > { %v1694_v11 = vpack.c.bf16 %v1684_v9, %v1684_v9  ;;  %v1695_v14 = vpack.c.bf16 %v1685_v40, %v1685_v40 }
 0x9c5   : > { %3539 = vmatprep.subr.msk.bf16.mxu1 %vm593_vm8, %v1695_v14  ;;  %v1697_v55 = vsel %vm593_vm8, %v1694_v11, 0 }
 0x9c6   : > { %1711 = vmatpush1.bf16.msra.mxu1 %v1697_v55 }
 0x9c9   : > { %3540 = vmatmul.mubr.msk.bf16.vlgmr.msra.gmra.mrb[32].mxu1 %vm586_vm9, %v4648_v12 }
 0x9ca   : > { %1744 = vmatprep.mubr.bf16.mxu1 %v3807_v2 }
 0x9d0   : > { %v1762_v7 = vpop.permute.xlu0 %1761  ;;  %v1767_v12 = vpop.permute.xlu1 %1766 }
 0x9d1   : > { %3541 = vmatmul.mubr.msk.bf16.gmra.mrb[36].mxu1 %vm586_vm9, %v4656_v10 }
 0x9d2   : > { %1831 = vmatprep.mubr.bf16.mxu1 %v3807_v2 }
 0x9d4   : > { %v1772_v49 = vpop.permute.xlu0 %1771  ;;  %v1777_v9 = vpop.permute.xlu1 %1776 }
 0xa9c   : > { %v1736_v58 = vpop.f32.mrb[32].mxu1 }
 0xa9d   : > { %v1737_v17 = vadd.f32 %v1736_v58, %v4210_v61  ;;  %v1738_v21 = vpop.f32.mrb[33].mxu1 }
 0xa9e   : > { %v1739_v4 = vadd.f32 %v1738_v21, %v4210_v61  ;;  %v1740_v52 = vpop.f32.mrb[34].mxu1 }
 0xa9f   : > { %v1779_v39 = vadd.f32 %v1762_v7, %v1737_v17  ;;  %v1741_v59 = vadd.f32 %v1740_v52, %v4208_v60  ;;  %v1742_v63 = vpop.f32.mrb[35].mxu1 }
 0xaa0   : > { %v1780_v3 = vadd.f32 %v1762_v7, %v1739_v4  ;;  %v1743_v51 = vadd.f32 %v1742_v63, %v4208_v60 }
 0xaa1   : > { %v1781_v31 = vadd.f32 %v1767_v12, %v1741_v59  ;;  %v1787_v35 = vmax.f32 %v1779_v39, 0.0 }
 0xaa2   : > { %v1782_v10 = vadd.f32 %v1767_v12, %v1743_v51  ;;  %v1788_v5 = vmax.f32 %v1780_v3, 0.0 }
 0xaa3   : > { %v1789_v33 = vmax.f32 %v1781_v31, 0.0 }
 0xaa4   : > { %v1790_v6 = vmax.f32 %v1782_v10, 0.0  ;;  %v1746_v8 = vpop.f32.mrb[36].mxu1 }
 0xaa5   : > { %v1795_v20 = vpack.c.bf16 %v1789_v33, %v1787_v35  ;;  %v1747_v32 = vadd.f32 %v1746_v8, %v4215_v15  ;;  %v1748_v44 = vpop.f32.mrb[37].mxu1 }
 0xaa6   : > { %v1749_v50 = vadd.f32 %v1748_v44, %v4215_v15  ;;  %v1750_v0 = vpop.f32.mrb[38].mxu1  ;;  %v1796_v13 = vpack.c.bf16 %v1790_v6, %v1788_v5 }
 0xaa7   : > { %v1783_v54 = vadd.f32 %v1772_v49, %v1747_v32  ;;  %v1751_v1 = vadd.f32 %v1750_v0, %v4218_v30  ;;  %v1752_v19 = vpop.f32.mrb[39].mxu1 }
 0xaa8   : > { %v1784_v40 = vadd.f32 %v1772_v49, %v1749_v50  ;;  %v1753_v11 = vadd.f32 %v1752_v19, %v4218_v30  ;;  %1799 = vmatprep.subr.bf16.mxu1 %v1796_v13 }
 0xaa9   : > { %v1785_v14 = vadd.f32 %v1777_v9, %v1751_v1  ;;  %1800 = vmatpush1.bf16.msra.mxu1 %v1795_v20  ;;  %v1791_v58 = vmax.f32 %v1783_v54, 0.0 }
 0xaaa   : > { %v1786_v55 = vadd.f32 %v1777_v9, %v1753_v11  ;;  %v1792_v21 = vmax.f32 %v1784_v40, 0.0 }
 0xaab   : > { %v1793_v17 = vmax.f32 %v1785_v14, 0.0 }
 0xaac   : > { %v1794_v7 = vmax.f32 %v1786_v55, 0.0 }
 0xaad   : > { %v1797_v4 = vpack.c.bf16 %v1793_v17, %v1791_v58 }
 0xaae   : > { %v1798_v52 = vpack.c.bf16 %v1794_v7, %v1792_v21 }
 0xab0   : > { %1801 = vmatprep.subr.bf16.mxu1 %v1798_v52 }
 0xab1   : > { %1802 = vmatpush1.bf16.msra.mxu1 %v1797_v4 }
 0xab4   : > { %3542 = vmatmul.mubr.msk.bf16.vlgmr.msra.gmra.mrb[40].mxu1 %vm720_vm10, %v4672_v36 }
 0xab5   : > { %1841 = vmatprep.mubr.bf16.mxu1 %v3807_v2 }
 0xabc   : > { %3543 = vmatmul.mubr.msk.bf16.gmra.mrb[44].mxu1 %vm720_vm10, %v4680_v34 }
 0xabd   : > { %1851 = vmatprep.mubr.bf16.mxu1 %v3807_v2 }
 0xac4   : > { %3544 = vmatmul.mubr.msk.bf16.gmra.mrb[48].mxu1 %vm720_vm10, %v4688_v41 }
 0xac5   : > { %1861 = vmatprep.mubr.bf16.mxu1 %v3807_v2 }
 0xacc   : > { %3545 = vmatmul.mubr.msk.bf16.gmra.mrb[52].mxu1 %vm720_vm10, %v4696_v42 }
 0xacd   : > { %1871 = vmatprep.mubr.bf16.mxu1 %v3807_v2 }
 0xad4   : > { %3546 = vmatmul.mubr.msk.bf16.gmra.mrb[56].mxu1 %vm720_vm10, %v4704_v43 }
 0xad5   : > { %2440 = vmatprep.mubr.bf16.mxu1 %v3807_v2 }
 0xb87   : > { %v1833_v36 = vpop.f32.mrb[40].mxu1 }
 0xb88   : > { %v1835_v39 = vpop.f32.mrb[41].mxu1  ;;  %1880 = vrot.lane.b32.xlu0 %v1833_v36, %s5931_s13 }
 0xb89   : > { %1882 = vrot.lane.b32.xlu1 %v1835_v39, %s5931_s13  ;;  %v1837_v34 = vpop.f32.mrb[42].mxu1 }
 0xb8a   : > { %v1839_v41 = vpop.f32.mrb[43].mxu1 }
 0xb8c   : > { %1888 = vrot.lane.b32.xlu0 %v1837_v34, %s5932_s24 }
 0xb8d   : > { %1890 = vrot.lane.b32.xlu1 %v1839_v41, %s5932_s24 }
 0xb8f   : > { %v1843_v42 = vpop.f32.mrb[44].mxu1 }
 0xb90   : > { %v1845_v59 = vpop.f32.mrb[45].mxu1  ;;  %1898 = vrot.lane.b32.xlu0 %v1843_v42, %s5926_s10 }
 0xb91   : > { %1900 = vrot.lane.b32.xlu1 %v1845_v59, %s5926_s10  ;;  %v1847_v43 = vpop.f32.mrb[46].mxu1 }
 0xb92   : > { %v1849_v63 = vpop.f32.mrb[47].mxu1 }
 0xb94   : > { %1908 = vrot.lane.b32.xlu0 %v1847_v43, %s5927_s19 }
 0xb95   : > { %1910 = vrot.lane.b32.xlu1 %v1849_v63, %s5927_s19 }
 0xb97   : > { %v1853_v12 = vpop.f32.mrb[48].mxu1 }
 0xb98   : > { %v1855_v3 = vpop.f32.mrb[49].mxu1 }
 0xb99   : > { %v1857_v51 = vpop.f32.mrb[50].mxu1 }
 0xb9a   : > { %v1859_v31 = vpop.f32.mrb[51].mxu1  ;;  %1920 = vrot.lane.b32.xlu0 %v1857_v51, %s5928_s12 }
 0xb9b   : > { %1922 = vrot.lane.b32.xlu1 %v1859_v31, %s5928_s12 }
 0xb9f   : > { %v1863_v10 = vpop.f32.mrb[52].mxu1 }
 0xba0   : > { %v1865_v35 = vpop.f32.mrb[53].mxu1  ;;  %1930 = vrot.lane.b32.xlu0 %v1863_v10, %s5929_s21 }
 0xba1   : > { %1932 = vrot.lane.b32.xlu1 %v1865_v35, %s5929_s21  ;;  %v1867_v33 = vpop.f32.mrb[54].mxu1 }
 0xba2   : > { %v1869_v5 = vpop.f32.mrb[55].mxu1 }
 0xba4   : > { %1940 = vrot.lane.b32.xlu0 %v1867_v33, %s5930_s23 }
 0xba5   : > { %1942 = vrot.lane.b32.xlu1 %v1869_v5, %s5930_s23 }
 0xba7   : > { %v1873_v6 = vpop.f32.mrb[56].mxu1 }
 0xba8   : > { %v1875_v8 = vpop.f32.mrb[57].mxu1  ;;  %1950 = vrot.lane.b32.xlu0 %v1873_v6, %s3809_s26 }
 0xba9   : > { %1952 = vrot.lane.b32.xlu1 %v1875_v8, %s3809_s26  ;;  %v1877_v20 = vpop.f32.mrb[58].mxu1 }
 0xbaa   : > { %v1878_v32 = vpop.f32.mrb[59].mxu1 }
 0xbfa   : > { %v1881_v44 = vpop.permute.xlu0 %1880 }
 0xbfb   : > { %v1883_v49 = vpop.permute.xlu1 %1882 }
 0xbfc   : > { %v1884_v11 = vsel %vm375_vm1, %v1881_v44, %v1883_v49  ;;  %v1885_v14 = vsel %vm375_vm1, %v1883_v49, %v1881_v44 }
 0xbfd   : > { %v1886_v52 = vmul.f32 %v1885_v14, %v4075_v27  ;;  %v1887_v36 = vmul.f32 %v1884_v11, %v4069_v25 }
 0xbfe   : > { %v1889_v50 = vpop.permute.xlu0 %1888 }
 0xbff   : > { %v1891_v0 = vpop.permute.xlu1 %1890 }
 0xc00   : > { %v1892_v1 = vsel %vm396_vm0, %v1889_v50, %v1891_v0  ;;  %v1893_v19 = vsel %vm396_vm0, %v1891_v0, %v1889_v50 }
 0xc01   : > { %v1894_v17 = vmul.f32 %v1893_v19, %v4078_v28  ;;  %v1895_v21 = vmul.f32 %v1892_v1, %v4072_v26 }
 0xc02   : > { %v1899_v13 = vpop.permute.xlu0 %1898 }
 0xc03   : > { %v1901_v54 = vpop.permute.xlu1 %1900  ;;  %v1896_v42 = vadd.f32 %v1894_v17, %v1886_v52  ;;  %v1897_v59 = vadd.f32 %v1895_v21, %v1887_v36 }
 0xc04   : > { %v1902_v55 = vsel %vm418_vm2, %v1899_v13, %v1901_v54  ;;  %v1903_v58 = vsel %vm418_vm2, %v1901_v54, %v1899_v13 }
 0xc05   : > { %v1904_v39 = vmul.f32 %v1903_v58, %v4101_v45  ;;  %v1905_v34 = vmul.f32 %v1902_v55, %v4104_v46 }
 0xc06   : > { %v1909_v9 = vpop.permute.xlu0 %1908 }
 0xc07   : > { %v1911_v40 = vpop.permute.xlu1 %1910  ;;  %v1906_v31 = vadd.f32 %v1904_v39, %v1896_v42  ;;  %v1907_v10 = vadd.f32 %v1905_v34, %v1897_v59 }
 0xc08   : > { %v1912_v7 = vsel %vm440_vm3, %v1909_v9, %v1911_v40  ;;  %v1913_v4 = vsel %vm440_vm3, %v1911_v40, %v1909_v9 }
 0xc09   : > { %v1914_v43 = vmul.f32 %v1913_v4, %v4107_v47  ;;  %v1915_v63 = vmul.f32 %v1912_v7, %v4110_v48 }
 0xc0b   : > { %v1916_v6 = vadd.f32 %v1914_v43, %v1906_v31  ;;  %v1917_v8 = vadd.f32 %v1915_v63, %v1907_v10  ;;  %v3548_v31 = vld [vmem:[%s3964_s25 + $0x38] sm:$0xff] }
 0xc0c   : > { %v1921_v41 = vpop.permute.xlu0 %1920 }
 0xc0d   : > { %v1923_v51 = vpop.permute.xlu1 %1922  ;;  %v1918_v13 = vadd.f32 %v1916_v6, %v1853_v12  ;;  %v1919_v54 = vadd.f32 %v1917_v8, %v1855_v3 }
 0xc0e   : > { %v1924_v35 = vsel %vm462_vm4, %v1921_v41, %v1923_v51  ;;  %v1925_v33 = vsel %vm462_vm4, %v1923_v51, %v1921_v41  ;;  %v3547_v51 = vld [vmem:[%s3964_s25 + $0x30] sm:$0xff] }
 0xc0f   : > { %v1926_v49 = vmul.f32 %v1924_v35, %v4125_v56  ;;  %v1927_v50 = vmul.f32 %v1925_v33, %v4128_v57  ;;  %v1971_v33 = vmul.f32 0.011471429, %v3547_v51 }
 0xc11   : > { %v1928_v14 = vadd.f32 %v1926_v49, %v1918_v13  ;;  %v1929_v55 = vadd.f32 %v1927_v50, %v1919_v54  ;;  %v5015_v50 = vld [vmem:[%s5896_s5] sm:$0xff]  ;;  %v5021_v13 = vld [vmem:[%s5896_s5 + $0x18] sm:$0xff] }
 0xc12   : > { %v1931_v5 = vpop.permute.xlu0 %1930  ;;  %v2111_v54 = vmul.f32 0.375, %v5021_v13 }
 0xc13   : > { %v1933_v20 = vpop.permute.xlu1 %1932 }
 0xc14   : > { %v1934_v32 = vsel %vm484_vm5, %v1931_v5, %v1933_v20  ;;  %v1935_v44 = vsel %vm484_vm5, %v1933_v20, %v1931_v5  ;;  %v1972_v5 = vmul.f32 0.011471429, %v3548_v31 }
 0xc15   : > { %v1936_v1 = vmul.f32 %v1934_v32, %v4151_v22  ;;  %v1937_v19 = vmul.f32 %v1935_v44, %v4154_v23 }
 0xc16   : > { %v1941_v0 = vpop.permute.xlu0 %1940 }
 0xc17   : > { %v1943_v9 = vpop.permute.xlu1 %1942  ;;  %v1938_v3 = vadd.f32 %v1936_v1, %v1928_v14  ;;  %v1939_v21 = vadd.f32 %v1937_v19, %v1929_v55  ;;  %v5027_v1 = vld [vmem:[%s5896_s5 + $0x10] sm:$0xff] }
 0xc18   : > { %v1944_v40 = vsel %vm506_vm6, %v1941_v0, %v1943_v9  ;;  %v1945_v11 = vsel %vm506_vm6, %v1943_v9, %v1941_v0  ;;  %v2108_v0 = vmul.f32 0.375, %v5015_v50  ;;  %v2110_v19 = vmul.f32 0.375, %v5027_v1 }
 0xc19   : > { %v1946_v58 = vmul.f32 %v1944_v40, %v4157_v24  ;;  %v1947_v17 = vmul.f32 %v1945_v11, %v4160_v29 }
 0xc1a   : > { %v1951_v12 = vpop.permute.xlu0 %1950 }
 0xc1b   : > { %v1953_v7 = vpop.permute.xlu1 %1952  ;;  %v1948_v36 = vadd.f32 %v1946_v58, %v1938_v3  ;;  %v1949_v39 = vadd.f32 %v1947_v17, %v1939_v21 }
 0xc1c   : > { %v1954_v4 = vsel %vm528_vm7, %v1951_v12, %v1953_v7  ;;  %v1955_v52 = vsel %vm528_vm7, %v1953_v7, %v1951_v12 }
 0xc1d   : > { %v1956_v34 = vmul.f32 %v1954_v4, %v4178_v38  ;;  %v1957_v41 = vmul.f32 %v1955_v52, %v4175_v37 }
 0xc1f   : > { %v1958_v42 = vadd.f32 %v1956_v34, %v1948_v36  ;;  %v1959_v59 = vadd.f32 %v1957_v41, %v1949_v39 }
 0xc21   : > { %v1960_v43 = vadd.f32 %v1958_v42, %v4280_v53  ;;  %v1961_v63 = vadd.f32 %v1959_v59, %v4280_v53 }
 0xc23   : > { %v1962_v10 = vmul.f32 0.08705682, %v1960_v43  ;;  %v1963_v35 = vmul.f32 0.08705682, %v1961_v63 }
 0xc25   : > { %v1964_v6 = vsub.f32 %v4779_v16, %v1962_v10  ;;  %v1965_v8 = vsub.f32 %v4781_v62, %v1963_v35  ;;  %v5009_v16 = vld [vmem:[%s5896_s5 + $0x8] sm:$0xff] }
 0xc26   : > { %v2109_v62 = vmul.f32 0.375, %v5009_v16 }
 0xc27   : > { %v1966_v20 = vmul.f32 1.0057856, %v1964_v6  ;;  %v1967_v32 = vmul.f32 1.0057856, %v1965_v8 }
 0xc29   : > { %v4970_v44 = vadd.f32 %v1971_v33, %v1966_v20  ;;  %v4972_v49 = vadd.f32 %v1972_v5, %v1967_v32 }
 0xc2b   : > { %1977 = vrot.lane.b32.xlu1 %v4972_v49, %s5931_s13  ;;  %1975 = vrot.lane.b32.xlu0 %v4970_v44, %s5931_s13 }
 0xc2f   : > { %1985 = vrot.lane.b32.xlu1 %v4972_v49, %s5932_s24  ;;  %1983 = vrot.lane.b32.xlu0 %v4970_v44, %s5932_s24 }
 0xc33   : > { %1993 = vrot.lane.b32.xlu1 %v4972_v49, %s5926_s10  ;;  %1991 = vrot.lane.b32.xlu0 %v4970_v44, %s5926_s10 }
 0xc37   : > { %2001 = vrot.lane.b32.xlu1 %v4972_v49, %s5927_s19  ;;  %1999 = vrot.lane.b32.xlu0 %v4970_v44, %s5927_s19 }
 0xc3b   : > { %2009 = vrot.lane.b32.xlu1 %v4972_v49, %s5928_s12  ;;  %2007 = vrot.lane.b32.xlu0 %v4970_v44, %s5928_s12 }
 0xc3f   : > { %2017 = vrot.lane.b32.xlu1 %v4972_v49, %s5929_s21  ;;  %2015 = vrot.lane.b32.xlu0 %v4970_v44, %s5929_s21 }
 0xc43   : > { %2025 = vrot.lane.b32.xlu1 %v4972_v49, %s5930_s23  ;;  %2023 = vrot.lane.b32.xlu0 %v4970_v44, %s5930_s23 }
 0xc47   : > { %2033 = vrot.lane.b32.xlu1 %v4972_v49, %s3809_s26  ;;  %2031 = vrot.lane.b32.xlu0 %v4970_v44, %s3809_s26 }
 0xc4b   : > { %2119 = vperm.xlu1 %3659, %v2109_v62   ;;  %2114 = vperm.xlu0 %3658, %v2108_v0  }
 0xc4f   : > { %2129 = vperm.xlu1 %3659, %v2111_v54   ;;  %2124 = vperm.xlu0 %3658, %v2110_v19  }
 0xc9d   : > { %v1978_v9 = vpop.permute.xlu1 %1977  ;;  %v1976_v40 = vpop.permute.xlu0 %1975 }
 0xc9e   : > { %v1979_v11 = vsel %vm375_vm1, %v1976_v40, %v1978_v9  ;;  %v1980_v14 = vsel %vm375_vm1, %v1978_v9, %v1976_v40 }
 0xc9f   : > { %v1981_v3 = vmul.f32 %v1980_v14, %v4075_v27  ;;  %v1982_v21 = vmul.f32 %v1979_v11, %v4069_v25 }
 0xca1   : > { %v1986_v55 = vpop.permute.xlu1 %1985  ;;  %v1984_v58 = vpop.permute.xlu0 %1983 }
 0xca2   : > { %v1987_v17 = vsel %vm396_vm0, %v1984_v58, %v1986_v55  ;;  %v1988_v12 = vsel %vm396_vm0, %v1986_v55, %v1984_v58 }
 0xca3   : > { %v1989_v7 = vmul.f32 %v1988_v12, %v4078_v28  ;;  %v1990_v4 = vmul.f32 %v1987_v17, %v4072_v26 }
 0xca5   : > { %v2039_v52 = vpack.c.bf16 %v1989_v7, %v1981_v3  ;;  %v1994_v36 = vpop.permute.xlu1 %1993  ;;  %v1992_v39 = vpop.permute.xlu0 %1991  ;;  %v2040_v34 = vpack.c.bf16 %v1990_v4, %v1982_v21 }
 0xca6   : > { %v1995_v41 = vsel %vm418_vm2, %v1992_v39, %v1994_v36  ;;  %v1996_v42 = vsel %vm418_vm2, %v1994_v36, %v1992_v39 }
 0xca7   : > { %2055 = vmatprep.subr.bf16.mxu0 %v2040_v34  ;;  %v1997_v31 = vmul.f32 %v1996_v42, %v4101_v45  ;;  %v1998_v10 = vmul.f32 %v1995_v41, %v4104_v46 }
 0xca8   : > { %2056 = vmatpush1.bf16.msra.mxu0 %v2039_v52 }
 0xca9   : > { %v2002_v59 = vpop.permute.xlu1 %2001  ;;  %v2000_v43 = vpop.permute.xlu0 %1999 }
 0xcaa   : > { %v2003_v63 = vsel %vm440_vm3, %v2000_v43, %v2002_v59  ;;  %v2004_v51 = vsel %vm440_vm3, %v2002_v59, %v2000_v43 }
 0xcab   : > { %v2005_v35 = vmul.f32 %v2004_v51, %v4107_v47  ;;  %v2006_v33 = vmul.f32 %v2003_v63, %v4110_v48 }
 0xcad   : > { %v2041_v5 = vpack.c.bf16 %v2005_v35, %v1997_v31  ;;  %v2010_v6 = vpop.permute.xlu1 %2009  ;;  %v2008_v8 = vpop.permute.xlu0 %2007  ;;  %v2042_v20 = vpack.c.bf16 %v2006_v33, %v1998_v10  ;;  %v5085_v35 = vld [vmem:[%s5894_s3] sm:$0xff]   ;;  %v5093_v33 = vld [vmem:[%s5894_s3 + $0x8] sm:$0xff]  }
 0xcae   : > { %v2011_v32 = vsel %vm462_vm4, %v2008_v8, %v2010_v6  ;;  %v2012_v62 = vsel %vm462_vm4, %v2010_v6, %v2008_v8 }
 0xcaf   : > { %v2013_v0 = vmul.f32 %v2011_v32, %v4125_v56  ;;  %v2014_v54 = vmul.f32 %v2012_v62, %v4128_v57  ;;  %2057 = vmatprep.subr.bf16.mxu0 %v2042_v20 }
 0xcb0   : > { %2058 = vmatpush1.bf16.msra.mxu0 %v2041_v5 }
 0xcb1   : > { %v2043_v19 = vpack.c.bf16 %v2013_v0, %v4970_v44  ;;  %v2018_v9 = vpop.permute.xlu1 %2017  ;;  %v2016_v40 = vpop.permute.xlu0 %2015  ;;  %v2044_v11 = vpack.c.bf16 %v2014_v54, %v4972_v49 }
 0xcb2   : > { %v2019_v14 = vsel %vm484_vm5, %v2016_v40, %v2018_v9  ;;  %v2020_v55 = vsel %vm484_vm5, %v2018_v9, %v2016_v40 }
 0xcb3   : > { %2059 = vmatprep.subr.bf16.mxu0 %v2044_v11  ;;  %v2021_v21 = vmul.f32 %v2019_v14, %v4151_v22  ;;  %v2022_v7 = vmul.f32 %v2020_v55, %v4154_v23 }
 0xcb4   : > { %2060 = vmatpush1.bf16.msra.mxu0 %v2043_v19 }
 0xcb5   : > { %v2026_v58 = vpop.permute.xlu1 %2025  ;;  %v2024_v17 = vpop.permute.xlu0 %2023 }
 0xcb6   : > { %v2027_v12 = vsel %vm506_vm6, %v2024_v17, %v2026_v58  ;;  %v2028_v3 = vsel %vm506_vm6, %v2026_v58, %v2024_v17 }
 0xcb7   : > { %v2029_v4 = vmul.f32 %v2027_v12, %v4157_v24  ;;  %v2030_v52 = vmul.f32 %v2028_v3, %v4160_v29 }
 0xcb9   : > { %v2045_v36 = vpack.c.bf16 %v2029_v4, %v2021_v21  ;;  %v2034_v39 = vpop.permute.xlu1 %2033  ;;  %v2032_v34 = vpop.permute.xlu0 %2031  ;;  %v2046_v41 = vpack.c.bf16 %v2030_v52, %v2022_v7 }
 0xcba   : > { %v2035_v42 = vsel %vm528_vm7, %v2032_v34, %v2034_v39  ;;  %v2036_v59 = vsel %vm528_vm7, %v2034_v39, %v2032_v34 }
 0xcbb   : > { %v2037_v43 = vmul.f32 %v2035_v42, %v4178_v38  ;;  %v2038_v63 = vmul.f32 %v2036_v59, %v4175_v37  ;;  %2061 = vmatprep.subr.bf16.mxu0 %v2046_v41 }
 0xcbc   : > { %2062 = vmatpush1.bf16.msra.mxu0 %v2045_v36 }
 0xcbd   : > { %v2047_v51 = vpack.c.bf16 %v2037_v43, %v2037_v43  ;;  %v2048_v31 = vpack.c.bf16 %v2038_v63, %v2038_v63 }
 0xcbf   : > { %3549 = vmatprep.subr.msk.bf16.mxu0 %vm593_vm8, %v2048_v31  ;;  %v2050_v10 = vsel %vm593_vm8, %v2047_v51, 0 }
 0xcc0   : > { %2064 = vmatpush1.bf16.msra.mxu0 %v2050_v10 }
 0xcc3   : > { %3550 = vmatmul.mubr.msk.bf16.vlgmr.msra.gmra.mrb[52].mxu0 %vm586_vm9, %v5085_v35 }
 0xcc4   : > { %2097 = vmatprep.mubr.bf16.mxu0 %v3807_v2 }
 0xcca   : > { %v2115_v20 = vpop.permute.xlu0 %2114  ;;  %v2120_v9 = vpop.permute.xlu1 %2119 }
 0xccb   : > { %3551 = vmatmul.mubr.msk.bf16.gmra.mrb[56].mxu0 %vm586_vm9, %v5093_v33 }
 0xccc   : > { %2184 = vmatprep.mubr.bf16.mxu0 %v3807_v2 }
 0xcce   : > { %v2125_v36 = vpop.permute.xlu0 %2124  ;;  %v2130_v63 = vpop.permute.xlu1 %2129 }
 0xd96   : > { %v2089_v5 = vpop.f32.mrb[52].mxu0 }
 0xd97   : > { %v2090_v6 = vadd.f32 %v2089_v5, %v4210_v61  ;;  %v2091_v8 = vpop.f32.mrb[53].mxu0 }
 0xd98   : > { %v2092_v32 = vadd.f32 %v2091_v8, %v4210_v61  ;;  %v2093_v62 = vpop.f32.mrb[54].mxu0 }
 0xd99   : > { %v2132_v0 = vadd.f32 %v2115_v20, %v2090_v6  ;;  %v2094_v54 = vadd.f32 %v2093_v62, %v4208_v60  ;;  %v2095_v19 = vpop.f32.mrb[55].mxu0 }
 0xd9a   : > { %v2133_v40 = vadd.f32 %v2115_v20, %v2092_v32  ;;  %v2096_v11 = vadd.f32 %v2095_v19, %v4208_v60  ;;  %v5117_v19 = vld [vmem:[%s5897_s6 + $0x8] sm:$0xff]  }
 0xd9b   : > { %v2134_v14 = vadd.f32 %v2120_v9, %v2094_v54  ;;  %v2140_v58 = vmax.f32 %v2132_v0, 0.0  ;;  %v5109_v54 = vld [vmem:[%s5897_s6] sm:$0xff]  }
 0xd9c   : > { %v2135_v55 = vadd.f32 %v2120_v9, %v2096_v11  ;;  %v2141_v12 = vmax.f32 %v2133_v40, 0.0  ;;  %v5125_v9 = vld [vmem:[%s5897_s6 + $0x10] sm:$0xff]   ;;  %v5133_v40 = vld [vmem:[%s5897_s6 + $0x18] sm:$0xff]   ;;  %v5141_v11 = vld [vmem:[%s5897_s6 + $0x20] ss:$0 sps:$4 sm:$0xff]  }
 0xd9d   : > { %v2142_v17 = vmax.f32 %v2134_v14, 0.0 }
 0xd9e   : > { %v2143_v3 = vmax.f32 %v2135_v55, 0.0  ;;  %v2099_v21 = vpop.f32.mrb[56].mxu0 }
 0xd9f   : > { %v2148_v7 = vpack.c.bf16 %v2142_v17, %v2140_v58  ;;  %v2100_v4 = vadd.f32 %v2099_v21, %v4215_v15  ;;  %v2101_v52 = vpop.f32.mrb[57].mxu0 }
 0xda0   : > { %v2102_v39 = vadd.f32 %v2101_v52, %v4215_v15  ;;  %v2103_v34 = vpop.f32.mrb[58].mxu0  ;;  %v2149_v41 = vpack.c.bf16 %v2143_v3, %v2141_v12 }
 0xda1   : > { %v2136_v42 = vadd.f32 %v2125_v36, %v2100_v4  ;;  %v2104_v59 = vadd.f32 %v2103_v34, %v4218_v30  ;;  %v2105_v43 = vpop.f32.mrb[59].mxu0 }
 0xda2   : > { %v2137_v51 = vadd.f32 %v2125_v36, %v2102_v39  ;;  %v2106_v31 = vadd.f32 %v2105_v43, %v4218_v30  ;;  %2152 = vmatprep.subr.bf16.mxu0 %v2149_v41 }
 0xda3   : > { %v2138_v10 = vadd.f32 %v2130_v63, %v2104_v59  ;;  %2153 = vmatpush1.bf16.msra.mxu0 %v2148_v7  ;;  %v2144_v6 = vmax.f32 %v2136_v42, 0.0 }
 0xda4   : > { %v2139_v5 = vadd.f32 %v2130_v63, %v2106_v31  ;;  %v2145_v20 = vmax.f32 %v2137_v51, 0.0 }
 0xda5   : > { %v2146_v8 = vmax.f32 %v2138_v10, 0.0 }
 0xda6   : > { %v2147_v32 = vmax.f32 %v2139_v5, 0.0 }
 0xda7   : > { %v2150_v62 = vpack.c.bf16 %v2146_v8, %v2144_v6 }
 0xda8   : > { %v2151_v0 = vpack.c.bf16 %v2147_v32, %v2145_v20 }
 0xdaa   : > { %2154 = vmatprep.subr.bf16.mxu0 %v2151_v0 }
 0xdab   : > { %2155 = vmatpush1.bf16.msra.mxu0 %v2150_v62 }
 0xdae   : > { %3552 = vmatmul.mubr.msk.bf16.vlgmr.msra.gmra.mrb[60].mxu0 %vm720_vm10, %v5109_v54 }
 0xdaf   : > { %2194 = vmatprep.mubr.bf16.mxu0 %v3807_v2 }
 0xdb6   : > { %3553 = vmatmul.mubr.msk.bf16.gmra.mrb[64].mxu0 %vm720_vm10, %v5117_v19 }
 0xdb7   : > { %2204 = vmatprep.mubr.bf16.mxu0 %v3807_v2 }
 0xdbe   : > { %3554 = vmatmul.mubr.msk.bf16.gmra.mrb[68].mxu0 %vm720_vm10, %v5125_v9 }
 0xdbf   : > { %2214 = vmatprep.mubr.bf16.mxu0 %v3807_v2 }
 0xdc6   : > { %3555 = vmatmul.mubr.msk.bf16.gmra.mrb[72].mxu0 %vm720_vm10, %v5133_v40 }
 0xdc7   : > { %2224 = vmatprep.mubr.bf16.mxu0 %v3807_v2 }
 0xdce   : > { %3556 = vmatmul.mubr.msk.bf16.gmra.mrb[76].mxu0 %vm720_vm10, %v5141_v11 }
 0xdcf   : > { %2793 = vmatprep.mubr.bf16.mxu0 %v3807_v2 }
 0xe81   : > { %v2186_v14 = vpop.f32.mrb[60].mxu0 }
 0xe82   : > { %v2188_v55 = vpop.f32.mrb[61].mxu0  ;;  %2233 = vrot.lane.b32.xlu0 %v2186_v14, %s5931_s13 }
 0xe83   : > { %2235 = vrot.lane.b32.xlu1 %v2188_v55, %s5931_s13  ;;  %v2190_v58 = vpop.f32.mrb[62].mxu0 }
 0xe84   : > { %v2192_v17 = vpop.f32.mrb[63].mxu0 }
 0xe86   : > { %2241 = vrot.lane.b32.xlu0 %v2190_v58, %s5932_s24 }
 0xe87   : > { %2243 = vrot.lane.b32.xlu1 %v2192_v17, %s5932_s24 }
 0xe89   : > { %v2196_v12 = vpop.f32.mrb[64].mxu0 }
 0xe8a   : > { %v2198_v3 = vpop.f32.mrb[65].mxu0  ;;  %2251 = vrot.lane.b32.xlu0 %v2196_v12, %s5926_s10 }
 0xe8b   : > { %2253 = vrot.lane.b32.xlu1 %v2198_v3, %s5926_s10  ;;  %v2200_v21 = vpop.f32.mrb[66].mxu0 }
 0xe8c   : > { %v2202_v7 = vpop.f32.mrb[67].mxu0 }
 0xe8e   : > { %2261 = vrot.lane.b32.xlu0 %v2200_v21, %s5927_s19 }
 0xe8f   : > { %2263 = vrot.lane.b32.xlu1 %v2202_v7, %s5927_s19 }
 0xe91   : > { %v2206_v4 = vpop.f32.mrb[68].mxu0 }
 0xe92   : > { %v2208_v52 = vpop.f32.mrb[69].mxu0 }
 0xe93   : > { %v2210_v36 = vpop.f32.mrb[70].mxu0 }
 0xe94   : > { %v2212_v39 = vpop.f32.mrb[71].mxu0  ;;  %2273 = vrot.lane.b32.xlu0 %v2210_v36, %s5928_s12 }
 0xe95   : > { %2275 = vrot.lane.b32.xlu1 %v2212_v39, %s5928_s12 }
 0xe99   : > { %v2216_v34 = vpop.f32.mrb[72].mxu0 }
 0xe9a   : > { %v2218_v41 = vpop.f32.mrb[73].mxu0  ;;  %2283 = vrot.lane.b32.xlu0 %v2216_v34, %s5929_s21 }
 0xe9b   : > { %2285 = vrot.lane.b32.xlu1 %v2218_v41, %s5929_s21  ;;  %v2220_v42 = vpop.f32.mrb[74].mxu0 }
 0xe9c   : > { %v2222_v59 = vpop.f32.mrb[75].mxu0 }
 0xe9e   : > { %2293 = vrot.lane.b32.xlu0 %v2220_v42, %s5930_s23 }
 0xe9f   : > { %2295 = vrot.lane.b32.xlu1 %v2222_v59, %s5930_s23 }
 0xea1   : > { %v2226_v43 = vpop.f32.mrb[76].mxu0 }
 0xea2   : > { %v2228_v63 = vpop.f32.mrb[77].mxu0  ;;  %2303 = vrot.lane.b32.xlu0 %v2226_v43, %s3809_s26 }
 0xea3   : > { %2305 = vrot.lane.b32.xlu1 %v2228_v63, %s3809_s26  ;;  %v2230_v51 = vpop.f32.mrb[78].mxu0 }
 0xea4   : > { %v2231_v31 = vpop.f32.mrb[79].mxu0 }
 0xef4   : > { %v2234_v10 = vpop.permute.xlu0 %2233 }
 0xef5   : > { %v2236_v5 = vpop.permute.xlu1 %2235 }
 0xef6   : > { %v2237_v58 = vsel %vm375_vm1, %v2234_v10, %v2236_v5  ;;  %v2238_v17 = vsel %vm375_vm1, %v2236_v5, %v2234_v10 }
 0xef7   : > { %v2239_v34 = vmul.f32 %v2238_v17, %v4075_v27  ;;  %v2240_v41 = vmul.f32 %v2237_v58, %v4069_v25 }
 0xef8   : > { %v2242_v6 = vpop.permute.xlu0 %2241 }
 0xef9   : > { %v2244_v8 = vpop.permute.xlu1 %2243 }
 0xefa   : > { %v2245_v62 = vsel %vm396_vm0, %v2242_v6, %v2244_v8  ;;  %v2246_v0 = vsel %vm396_vm0, %v2244_v8, %v2242_v6 }
 0xefb   : > { %v2247_v21 = vmul.f32 %v2246_v0, %v4078_v28  ;;  %v2248_v7 = vmul.f32 %v2245_v62, %v4072_v26 }
 0xefc   : > { %v2252_v20 = vpop.permute.xlu0 %2251 }
 0xefd   : > { %v2254_v32 = vpop.permute.xlu1 %2253  ;;  %v2249_v63 = vadd.f32 %v2247_v21, %v2239_v34  ;;  %v2250_v51 = vadd.f32 %v2248_v7, %v2240_v41 }
 0xefe   : > { %v2255_v12 = vsel %vm418_vm2, %v2252_v20, %v2254_v32  ;;  %v2256_v3 = vsel %vm418_vm2, %v2254_v32, %v2252_v20 }
 0xeff   : > { %v2257_v42 = vmul.f32 %v2256_v3, %v4101_v45  ;;  %v2258_v59 = vmul.f32 %v2255_v12, %v4104_v46 }
 0xf00   : > { %v2262_v14 = vpop.permute.xlu0 %2261 }
 0xf01   : > { %v2264_v55 = vpop.permute.xlu1 %2263  ;;  %v2259_v6 = vadd.f32 %v2257_v42, %v2249_v63  ;;  %v2260_v8 = vadd.f32 %v2258_v59, %v2250_v51 }
 0xf02   : > { %v2265_v36 = vsel %vm440_vm3, %v2262_v14, %v2264_v55  ;;  %v2266_v39 = vsel %vm440_vm3, %v2264_v55, %v2262_v14 }
 0xf03   : > { %v2267_v31 = vmul.f32 %v2266_v39, %v4107_v47  ;;  %v2268_v10 = vmul.f32 %v2265_v36, %v4110_v48 }
 0xf05   : > { %v2269_v0 = vadd.f32 %v2267_v31, %v2259_v6  ;;  %v2270_v14 = vadd.f32 %v2268_v10, %v2260_v8 }
 0xf06   : > { %v2274_v43 = vpop.permute.xlu0 %2273 }
 0xf07   : > { %v2276_v5 = vpop.permute.xlu1 %2275  ;;  %v2271_v7 = vadd.f32 %v2269_v0, %v2206_v4  ;;  %v2272_v36 = vadd.f32 %v2270_v14, %v2208_v52 }
 0xf08   : > { %v2277_v20 = vsel %vm462_vm4, %v2274_v43, %v2276_v5  ;;  %v2278_v32 = vsel %vm462_vm4, %v2276_v5, %v2274_v43 }
 0xf09   : > { %v2279_v12 = vmul.f32 %v2277_v20, %v4125_v56  ;;  %v2280_v3 = vmul.f32 %v2278_v32, %v4128_v57 }
 0xf0b   : > { %v2281_v43 = vadd.f32 %v2279_v12, %v2271_v7  ;;  %v2282_v63 = vadd.f32 %v2280_v3, %v2272_v36  ;;  %v3557_v12 = vld [vmem:[%s3964_s25 + $0x40] sm:$0xff]  ;;  %v3558_v3 = vld [vmem:[%s3964_s25 + $0x48] sm:$0xff] }
 0xf0c   : > { %v2284_v62 = vpop.permute.xlu0 %2283  ;;  %v2324_v36 = vmul.f32 0.008628571, %v3557_v12 }
 0xf0d   : > { %v2286_v55 = vpop.permute.xlu1 %2285 }
 0xf0e   : > { %v2287_v58 = vsel %vm484_vm5, %v2284_v62, %v2286_v55  ;;  %v2288_v17 = vsel %vm484_vm5, %v2286_v55, %v2284_v62 }
 0xf0f   : > { %v2289_v39 = vmul.f32 %v2287_v58, %v4151_v22  ;;  %v2290_v34 = vmul.f32 %v2288_v17, %v4154_v23 }
 0xf10   : > { %v2294_v21 = vpop.permute.xlu0 %2293 }
 0xf11   : > { %v2296_v41 = vpop.permute.xlu1 %2295  ;;  %v2291_v52 = vadd.f32 %v2289_v39, %v2281_v43  ;;  %v2292_v10 = vadd.f32 %v2290_v34, %v2282_v63  ;;  %v2325_v39 = vmul.f32 0.008628571, %v3558_v3 }
 0xf12   : > { %v2297_v42 = vsel %vm506_vm6, %v2294_v21, %v2296_v41  ;;  %v2298_v59 = vsel %vm506_vm6, %v2296_v41, %v2294_v21 }
 0xf13   : > { %v2299_v51 = vmul.f32 %v2297_v42, %v4157_v24  ;;  %v2300_v31 = vmul.f32 %v2298_v59, %v4160_v29 }
 0xf14   : > { %v2304_v4 = vpop.permute.xlu0 %2303 }
 0xf15   : > { %v2306_v5 = vpop.permute.xlu1 %2305  ;;  %v2301_v20 = vadd.f32 %v2299_v51, %v2291_v52  ;;  %v2302_v32 = vadd.f32 %v2300_v31, %v2292_v10  ;;  %v2464_v51 = vmul.f32 0.25, %v5021_v13  ;;  %v2463_v31 = vmul.f32 0.25, %v5027_v1 }
 0xf16   : > { %v2307_v6 = vsel %vm528_vm7, %v2304_v4, %v2306_v5  ;;  %v2308_v8 = vsel %vm528_vm7, %v2306_v5, %v2304_v4 }
 0xf17   : > { %v2309_v62 = vmul.f32 %v2307_v6, %v4178_v38  ;;  %v2310_v0 = vmul.f32 %v2308_v8, %v4175_v37 }
 0xf19   : > { %v2311_v14 = vadd.f32 %v2309_v62, %v2301_v20  ;;  %v2312_v55 = vadd.f32 %v2310_v0, %v2302_v32 }
 0xf1b   : > { %v2313_v58 = vadd.f32 %v2311_v14, %v4280_v53  ;;  %v2314_v17 = vadd.f32 %v2312_v55, %v4280_v53 }
 0xf1d   : > { %v2315_v21 = vmul.f32 0.09192476, %v2313_v58  ;;  %v2316_v7 = vmul.f32 0.09192476, %v2314_v17 }
 0xf1f   : > { %v2317_v34 = vsub.f32 %v4970_v44, %v2315_v21  ;;  %v2318_v41 = vsub.f32 %v4972_v49, %v2316_v7  ;;  %v2462_v44 = vmul.f32 0.25, %v5009_v16  ;;  %v2461_v49 = vmul.f32 0.25, %v5015_v50 }
 0xf21   : > { %v2319_v42 = vmul.f32 1.0043424, %v2317_v34  ;;  %v2320_v59 = vmul.f32 1.0043424, %v2318_v41 }
 0xf23   : > { %v5216_v43 = vadd.f32 %v2324_v36, %v2319_v42  ;;  %v5218_v63 = vadd.f32 %v2325_v39, %v2320_v59 }
 0xf25   : > { %2330 = vrot.lane.b32.xlu1 %v5218_v63, %s5931_s13  ;;  %2328 = vrot.lane.b32.xlu0 %v5216_v43, %s5931_s13 }
 0xf29   : > { %2338 = vrot.lane.b32.xlu1 %v5218_v63, %s5932_s24  ;;  %2336 = vrot.lane.b32.xlu0 %v5216_v43, %s5932_s24 }
 0xf2d   : > { %2346 = vrot.lane.b32.xlu1 %v5218_v63, %s5926_s10  ;;  %2344 = vrot.lane.b32.xlu0 %v5216_v43, %s5926_s10 }
 0xf31   : > { %2354 = vrot.lane.b32.xlu1 %v5218_v63, %s5927_s19  ;;  %2352 = vrot.lane.b32.xlu0 %v5216_v43, %s5927_s19 }
 0xf35   : > { %2362 = vrot.lane.b32.xlu1 %v5218_v63, %s5928_s12  ;;  %2360 = vrot.lane.b32.xlu0 %v5216_v43, %s5928_s12 }
 0xf39   : > { %2370 = vrot.lane.b32.xlu1 %v5218_v63, %s5929_s21  ;;  %2368 = vrot.lane.b32.xlu0 %v5216_v43, %s5929_s21 }
 0xf3d   : > { %2378 = vrot.lane.b32.xlu1 %v5218_v63, %s5930_s23  ;;  %2376 = vrot.lane.b32.xlu0 %v5216_v43, %s5930_s23 }
 0xf41   : > { %2386 = vrot.lane.b32.xlu1 %v5218_v63, %s3809_s26  ;;  %2384 = vrot.lane.b32.xlu0 %v5216_v43, %s3809_s26 }
 0xf45   : > { %2472 = vperm.xlu1 %3659, %v2462_v44   ;;  %2467 = vperm.xlu0 %3658, %v2461_v49  }
 0xf49   : > { %2482 = vperm.xlu1 %3659, %v2464_v51   ;;  %2477 = vperm.xlu0 %3658, %v2463_v31  }
 0xf97   : > { %v2331_v4 = vpop.permute.xlu1 %2330  ;;  %v2329_v52 = vpop.permute.xlu0 %2328 }
 0xf98   : > { %v2332_v10 = vsel %vm375_vm1, %v2329_v52, %v2331_v4  ;;  %v2333_v5 = vsel %vm375_vm1, %v2331_v4, %v2329_v52 }
 0xf99   : > { %v2334_v1 = vmul.f32 %v2333_v5, %v4075_v27  ;;  %v2335_v8 = vmul.f32 %v2332_v10, %v4069_v25 }
 0xf9b   : > { %v2339_v6 = vpop.permute.xlu1 %2338  ;;  %v2337_v16 = vpop.permute.xlu0 %2336 }
 0xf9c   : > { %v2340_v50 = vsel %vm396_vm0, %v2337_v16, %v2339_v6  ;;  %v2341_v13 = vsel %vm396_vm0, %v2339_v6, %v2337_v16 }
 0xf9d   : > { %v2342_v20 = vmul.f32 %v2341_v13, %v4078_v28  ;;  %v2343_v32 = vmul.f32 %v2340_v50, %v4072_v26 }
 0xf9f   : > { %v2392_v62 = vpack.c.bf16 %v2342_v20, %v2334_v1  ;;  %v2347_v0 = vpop.permute.xlu1 %2346  ;;  %v2345_v14 = vpop.permute.xlu0 %2344  ;;  %v2393_v55 = vpack.c.bf16 %v2343_v32, %v2335_v8 }
 0xfa0   : > { %v2348_v58 = vsel %vm418_vm2, %v2345_v14, %v2347_v0  ;;  %v2349_v17 = vsel %vm418_vm2, %v2347_v0, %v2345_v14 }
 0xfa1   : > { %2408 = vmatprep.subr.bf16.mxu1 %v2393_v55  ;;  %v2350_v36 = vmul.f32 %v2349_v17, %v4101_v45  ;;  %v2351_v39 = vmul.f32 %v2348_v58, %v4104_v46 }
 0xfa2   : > { %2409 = vmatpush1.bf16.msra.mxu1 %v2392_v62 }
 0xfa3   : > { %v2355_v12 = vpop.permute.xlu1 %2354  ;;  %v2353_v3 = vpop.permute.xlu0 %2352 }
 0xfa4   : > { %v2356_v21 = vsel %vm440_vm3, %v2353_v3, %v2355_v12  ;;  %v2357_v7 = vsel %vm440_vm3, %v2355_v12, %v2353_v3 }
 0xfa5   : > { %v2358_v34 = vmul.f32 %v2357_v7, %v4107_v47  ;;  %v2359_v41 = vmul.f32 %v2356_v21, %v4110_v48 }
 0xfa7   : > { %v2394_v42 = vpack.c.bf16 %v2358_v34, %v2350_v36  ;;  %v2363_v59 = vpop.permute.xlu1 %2362  ;;  %v2361_v44 = vpop.permute.xlu0 %2360  ;;  %v2395_v49 = vpack.c.bf16 %v2359_v41, %v2351_v39 }
 0xfa8   : > { %v2364_v51 = vsel %vm462_vm4, %v2361_v44, %v2363_v59  ;;  %v2365_v31 = vsel %vm462_vm4, %v2363_v59, %v2361_v44 }
 0xfa9   : > { %v2366_v4 = vmul.f32 %v2364_v51, %v4125_v56  ;;  %v2367_v52 = vmul.f32 %v2365_v31, %v4128_v57  ;;  %2410 = vmatprep.subr.bf16.mxu1 %v2395_v49 }
 0xfaa   : > { %2411 = vmatpush1.bf16.msra.mxu1 %v2394_v42 }
 0xfab   : > { %v2396_v10 = vpack.c.bf16 %v2366_v4, %v5216_v43  ;;  %v2371_v5 = vpop.permute.xlu1 %2370  ;;  %v2369_v6 = vpop.permute.xlu0 %2368  ;;  %v2397_v16 = vpack.c.bf16 %v2367_v52, %v5218_v63 }
 0xfac   : > { %v2372_v50 = vsel %vm484_vm5, %v2369_v6, %v2371_v5  ;;  %v2373_v13 = vsel %vm484_vm5, %v2371_v5, %v2369_v6 }
 0xfad   : > { %2412 = vmatprep.subr.bf16.mxu1 %v2397_v16  ;;  %v2374_v62 = vmul.f32 %v2372_v50, %v4151_v22  ;;  %v2375_v0 = vmul.f32 %v2373_v13, %v4154_v23 }
 0xfae   : > { %2413 = vmatpush1.bf16.msra.mxu1 %v2396_v10 }
 0xfaf   : > { %v2379_v1 = vpop.permute.xlu1 %2378  ;;  %v2377_v8 = vpop.permute.xlu0 %2376 }
 0xfb0   : > { %v2380_v20 = vsel %vm506_vm6, %v2377_v8, %v2379_v1  ;;  %v2381_v32 = vsel %vm506_vm6, %v2379_v1, %v2377_v8 }
 0xfb1   : > { %v2382_v14 = vmul.f32 %v2380_v20, %v4157_v24  ;;  %v2383_v55 = vmul.f32 %v2381_v32, %v4160_v29 }
 0xfb3   : > { %v2398_v58 = vpack.c.bf16 %v2382_v14, %v2374_v62  ;;  %v2387_v17 = vpop.permute.xlu1 %2386  ;;  %v2385_v12 = vpop.permute.xlu0 %2384  ;;  %v2399_v3 = vpack.c.bf16 %v2383_v55, %v2375_v0 }
 0xfb4   : > { %v2388_v21 = vsel %vm528_vm7, %v2385_v12, %v2387_v17  ;;  %v2389_v7 = vsel %vm528_vm7, %v2387_v17, %v2385_v12 }
 0xfb5   : > { %v2390_v36 = vmul.f32 %v2388_v21, %v4178_v38  ;;  %v2391_v39 = vmul.f32 %v2389_v7, %v4175_v37  ;;  %2414 = vmatprep.subr.bf16.mxu1 %v2399_v3 }
 0xfb6   : > { %2415 = vmatpush1.bf16.msra.mxu1 %v2398_v58 }
 0xfb7   : > { %v2400_v34 = vpack.c.bf16 %v2390_v36, %v2390_v36  ;;  %v2401_v41 = vpack.c.bf16 %v2391_v39, %v2391_v39 }
 0xfb9   : > { %3559 = vmatprep.subr.msk.bf16.mxu1 %vm593_vm8, %v2401_v41  ;;  %v2403_v42 = vsel %vm593_vm8, %v2400_v34, 0 }
 0xfba   : > { %2417 = vmatpush1.bf16.msra.mxu1 %v2403_v42 }
 0xfbd   : > { %3560 = vmatmul.mubr.msk.bf16.vlgmr.msra.gmra.mrb[60].mxu1 %vm586_vm9, %v5085_v35 }
 0xfbe   : > { %2450 = vmatprep.mubr.bf16.mxu1 %v3807_v2 }
 0xfc4   : > { %v2468_v51 = vpop.permute.xlu0 %2467  ;;  %v2473_v35 = vpop.permute.xlu1 %2472 }
 0xfc5   : > { %3561 = vmatmul.mubr.msk.bf16.gmra.mrb[64].mxu1 %vm586_vm9, %v5093_v33 }
 0xfc6   : > { %2537 = vmatprep.mubr.bf16.mxu1 %v3807_v2 }
 0xfc8   : > { %v2478_v55 = vpop.permute.xlu0 %2477  ;;  %v2483_v36 = vpop.permute.xlu1 %2482 }
0x1090   : > { %v2442_v59 = vpop.f32.mrb[60].mxu1 }
0x1091   : > { %v2443_v44 = vadd.f32 %v2442_v59, %v4210_v61  ;;  %v2444_v49 = vpop.f32.mrb[61].mxu1 }
0x1092   : > { %v2445_v31 = vadd.f32 %v2444_v49, %v4210_v61  ;;  %v2446_v4 = vpop.f32.mrb[62].mxu1 }
0x1093   : > { %v2485_v52 = vadd.f32 %v2468_v51, %v2443_v44  ;;  %v2447_v10 = vadd.f32 %v2446_v4, %v4208_v60  ;;  %v2448_v5 = vpop.f32.mrb[63].mxu1 }
0x1094   : > { %v2486_v6 = vadd.f32 %v2468_v51, %v2445_v31  ;;  %v2449_v16 = vadd.f32 %v2448_v5, %v4208_v60 }
0x1095   : > { %v2487_v50 = vadd.f32 %v2473_v35, %v2447_v10  ;;  %v2493_v13 = vmax.f32 %v2485_v52, 0.0 }
0x1096   : > { %v2488_v33 = vadd.f32 %v2473_v35, %v2449_v16  ;;  %v2494_v8 = vmax.f32 %v2486_v6, 0.0 }
0x1097   : > { %v2495_v1 = vmax.f32 %v2487_v50, 0.0 }
0x1098   : > { %v2496_v20 = vmax.f32 %v2488_v33, 0.0  ;;  %v2452_v32 = vpop.f32.mrb[64].mxu1 }
0x1099   : > { %v2501_v62 = vpack.c.bf16 %v2495_v1, %v2493_v13  ;;  %v2453_v0 = vadd.f32 %v2452_v32, %v4215_v15  ;;  %v2454_v14 = vpop.f32.mrb[65].mxu1 }
0x109a   : > { %v2455_v58 = vadd.f32 %v2454_v14, %v4215_v15  ;;  %v2456_v17 = vpop.f32.mrb[66].mxu1  ;;  %v2502_v12 = vpack.c.bf16 %v2496_v20, %v2494_v8 }
0x109b   : > { %v2489_v3 = vadd.f32 %v2478_v55, %v2453_v0  ;;  %v2457_v21 = vadd.f32 %v2456_v17, %v4218_v30  ;;  %v2458_v7 = vpop.f32.mrb[67].mxu1 }
0x109c   : > { %v2490_v39 = vadd.f32 %v2478_v55, %v2455_v58  ;;  %v2459_v34 = vadd.f32 %v2458_v7, %v4218_v30  ;;  %2505 = vmatprep.subr.bf16.mxu1 %v2502_v12 }
0x109d   : > { %v2491_v41 = vadd.f32 %v2483_v36, %v2457_v21  ;;  %2506 = vmatpush1.bf16.msra.mxu1 %v2501_v62  ;;  %v2497_v59 = vmax.f32 %v2489_v3, 0.0 }
0x109e   : > { %v2492_v42 = vadd.f32 %v2483_v36, %v2459_v34  ;;  %v2498_v49 = vmax.f32 %v2490_v39, 0.0 }
0x109f   : > { %v2499_v44 = vmax.f32 %v2491_v41, 0.0 }
0x10a0   : > { %v2500_v51 = vmax.f32 %v2492_v42, 0.0 }
0x10a1   : > { %v2503_v31 = vpack.c.bf16 %v2499_v44, %v2497_v59 }
0x10a2   : > { %v2504_v4 = vpack.c.bf16 %v2500_v51, %v2498_v49 }
0x10a4   : > { %2507 = vmatprep.subr.bf16.mxu1 %v2504_v4 }
0x10a5   : > { %2508 = vmatpush1.bf16.msra.mxu1 %v2503_v31 }
0x10a8   : > { %3562 = vmatmul.mubr.msk.bf16.vlgmr.msra.gmra.mrb[68].mxu1 %vm720_vm10, %v5109_v54 }
0x10a9   : > { %2547 = vmatprep.mubr.bf16.mxu1 %v3807_v2 }
0x10b0   : > { %3563 = vmatmul.mubr.msk.bf16.gmra.mrb[72].mxu1 %vm720_vm10, %v5117_v19 }
0x10b1   : > { %2557 = vmatprep.mubr.bf16.mxu1 %v3807_v2 }
0x10b8   : > { %3564 = vmatmul.mubr.msk.bf16.gmra.mrb[76].mxu1 %vm720_vm10, %v5125_v9 }
0x10b9   : > { %2567 = vmatprep.mubr.bf16.mxu1 %v3807_v2 }
0x10c0   : > { %3565 = vmatmul.mubr.msk.bf16.gmra.mrb[80].mxu1 %vm720_vm10, %v5133_v40 }
0x10c1   : > { %2577 = vmatprep.mubr.bf16.mxu1 %v3807_v2 }
0x10c8   : > { %3566 = vmatmul.mubr.msk.bf16.gmra.mrb[84].mxu1 %vm720_vm10, %v5141_v11 }
0x10c9   : > { %3146 = vmatprep.mubr.bf16.mxu1 %v3807_v2 }
0x117b   : > { %v2539_v54 = vpop.f32.mrb[68].mxu1 }
0x117c   : > { %v2541_v52 = vpop.f32.mrb[69].mxu1  ;;  %2586 = vrot.lane.b32.xlu0 %v2539_v54, %s5931_s13 }
0x117d   : > { %2588 = vrot.lane.b32.xlu1 %v2541_v52, %s5931_s13  ;;  %v2543_v19 = vpop.f32.mrb[70].mxu1 }
0x117e   : > { %v2545_v9 = vpop.f32.mrb[71].mxu1 }
0x1180   : > { %2594 = vrot.lane.b32.xlu0 %v2543_v19, %s5932_s24 }
0x1181   : > { %2596 = vrot.lane.b32.xlu1 %v2545_v9, %s5932_s24 }
0x1183   : > { %v2549_v40 = vpop.f32.mrb[72].mxu1 }
0x1184   : > { %v2551_v10 = vpop.f32.mrb[73].mxu1  ;;  %2604 = vrot.lane.b32.xlu0 %v2549_v40, %s5926_s10 }
0x1185   : > { %2606 = vrot.lane.b32.xlu1 %v2551_v10, %s5926_s10  ;;  %v2553_v11 = vpop.f32.mrb[74].mxu1 }
0x1186   : > { %v2555_v5 = vpop.f32.mrb[75].mxu1 }
0x1188   : > { %2614 = vrot.lane.b32.xlu0 %v2553_v11, %s5927_s19 }
0x1189   : > { %2616 = vrot.lane.b32.xlu1 %v2555_v5, %s5927_s19 }
0x118b   : > { %v2559_v35 = vpop.f32.mrb[76].mxu1 }
0x118c   : > { %v2561_v6 = vpop.f32.mrb[77].mxu1 }
0x118d   : > { %v2563_v16 = vpop.f32.mrb[78].mxu1 }
0x118e   : > { %v2565_v50 = vpop.f32.mrb[79].mxu1  ;;  %2626 = vrot.lane.b32.xlu0 %v2563_v16, %s5928_s12 }
0x118f   : > { %2628 = vrot.lane.b32.xlu1 %v2565_v50, %s5928_s12 }
0x1193   : > { %v2569_v33 = vpop.f32.mrb[80].mxu1 }
0x1194   : > { %v2571_v13 = vpop.f32.mrb[81].mxu1  ;;  %2636 = vrot.lane.b32.xlu0 %v2569_v33, %s5929_s21 }
0x1195   : > { %2638 = vrot.lane.b32.xlu1 %v2571_v13, %s5929_s21  ;;  %v2573_v1 = vpop.f32.mrb[82].mxu1 }
0x1196   : > { %v2575_v8 = vpop.f32.mrb[83].mxu1 }
0x1198   : > { %2646 = vrot.lane.b32.xlu0 %v2573_v1, %s5930_s23 }
0x1199   : > { %2648 = vrot.lane.b32.xlu1 %v2575_v8, %s5930_s23 }
0x119b   : > { %v2579_v20 = vpop.f32.mrb[84].mxu1 }
0x119c   : > { %v2581_v32 = vpop.f32.mrb[85].mxu1  ;;  %2656 = vrot.lane.b32.xlu0 %v2579_v20, %s3809_s26 }
0x119d   : > { %2658 = vrot.lane.b32.xlu1 %v2581_v32, %s3809_s26  ;;  %v2583_v62 = vpop.f32.mrb[86].mxu1 }
0x119e   : > { %v2584_v0 = vpop.f32.mrb[87].mxu1 }
0x11ee   : > { %v2587_v14 = vpop.permute.xlu0 %2586 }
0x11ef   : > { %v2589_v55 = vpop.permute.xlu1 %2588 }
0x11f0   : > { %v2590_v34 = vsel %vm375_vm1, %v2587_v14, %v2589_v55  ;;  %v2591_v41 = vsel %vm375_vm1, %v2589_v55, %v2587_v14 }
0x11f1   : > { %v2592_v4 = vmul.f32 %v2591_v41, %v4075_v27  ;;  %v2593_v54 = vmul.f32 %v2590_v34, %v4069_v25 }
0x11f2   : > { %v2595_v58 = vpop.permute.xlu0 %2594 }
0x11f3   : > { %v2597_v17 = vpop.permute.xlu1 %2596 }
0x11f4   : > { %v2598_v21 = vsel %vm396_vm0, %v2595_v58, %v2597_v17  ;;  %v2599_v7 = vsel %vm396_vm0, %v2597_v17, %v2595_v58 }
0x11f5   : > { %v2600_v44 = vmul.f32 %v2599_v7, %v4078_v28  ;;  %v2601_v49 = vmul.f32 %v2598_v21, %v4072_v26 }
0x11f6   : > { %v2605_v12 = vpop.permute.xlu0 %2604 }
0x11f7   : > { %v2607_v3 = vpop.permute.xlu1 %2606  ;;  %v2602_v40 = vadd.f32 %v2600_v44, %v2592_v4  ;;  %v2603_v10 = vadd.f32 %v2601_v49, %v2593_v54 }
0x11f8   : > { %v2608_v42 = vsel %vm418_vm2, %v2605_v12, %v2607_v3  ;;  %v2609_v59 = vsel %vm418_vm2, %v2607_v3, %v2605_v12 }
0x11f9   : > { %v2610_v52 = vmul.f32 %v2609_v59, %v4101_v45  ;;  %v2611_v19 = vmul.f32 %v2608_v42, %v4104_v46 }
0x11fa   : > { %v2615_v36 = vpop.permute.xlu0 %2614 }
0x11fb   : > { %v2617_v39 = vpop.permute.xlu1 %2616  ;;  %v2612_v50 = vadd.f32 %v2610_v52, %v2602_v40  ;;  %v2613_v33 = vadd.f32 %v2611_v19, %v2603_v10 }
0x11fc   : > { %v2618_v51 = vsel %vm440_vm3, %v2615_v36, %v2617_v39  ;;  %v2619_v31 = vsel %vm440_vm3, %v2617_v39, %v2615_v36 }
0x11fd   : > { %v2620_v11 = vmul.f32 %v2619_v31, %v4107_v47  ;;  %v2621_v5 = vmul.f32 %v2618_v51, %v4110_v48 }
0x11ff   : > { %v2622_v20 = vadd.f32 %v2620_v11, %v2612_v50  ;;  %v2623_v32 = vadd.f32 %v2621_v5, %v2613_v33  ;;  %v3568_v50 = vld [vmem:[%s3964_s25 + $0x58] sm:$0xff] }
0x1200   : > { %v2627_v9 = vpop.permute.xlu0 %2626 }
0x1201   : > { %v2629_v16 = vpop.permute.xlu1 %2628  ;;  %v2624_v12 = vadd.f32 %v2622_v20, %v2559_v35  ;;  %v2625_v3 = vadd.f32 %v2623_v32, %v2561_v6 }
0x1202   : > { %v2630_v13 = vsel %vm462_vm4, %v2627_v9, %v2629_v16  ;;  %v2631_v1 = vsel %vm462_vm4, %v2629_v16, %v2627_v9  ;;  %v3567_v16 = vld [vmem:[%s3964_s25 + $0x50] sm:$0xff] }
0x1203   : > { %v2632_v55 = vmul.f32 %v2630_v13, %v4125_v56  ;;  %v2633_v58 = vmul.f32 %v2631_v1, %v4128_v57  ;;  %v2677_v1 = vmul.f32 0.0057857144, %v3567_v16 }
0x1205   : > { %v2634_v41 = vadd.f32 %v2632_v55, %v2624_v12  ;;  %v2635_v42 = vadd.f32 %v2633_v58, %v2625_v3  ;;  %v5452_v58 = vld [vmem:[%s5896_s5] sm:$0xff]  ;;  %v5458_v12 = vld [vmem:[%s5896_s5 + $0x18] sm:$0xff] }
0x1206   : > { %v2637_v8 = vpop.permute.xlu0 %2636  ;;  %v2817_v3 = vmul.f32 0.125, %v5458_v12 }
0x1207   : > { %v2639_v62 = vpop.permute.xlu1 %2638 }
0x1208   : > { %v2640_v0 = vsel %vm484_vm5, %v2637_v8, %v2639_v62  ;;  %v2641_v14 = vsel %vm484_vm5, %v2639_v62, %v2637_v8  ;;  %v2678_v8 = vmul.f32 0.0057857144, %v3568_v50 }
0x1209   : > { %v2642_v21 = vmul.f32 %v2640_v0, %v4151_v22  ;;  %v2643_v7 = vmul.f32 %v2641_v14, %v4154_v23 }
0x120a   : > { %v2647_v17 = vpop.permute.xlu0 %2646 }
0x120b   : > { %v2649_v36 = vpop.permute.xlu1 %2648  ;;  %v2644_v6 = vadd.f32 %v2642_v21, %v2634_v41  ;;  %v2645_v49 = vadd.f32 %v2643_v7, %v2635_v42  ;;  %v5464_v21 = vld [vmem:[%s5896_s5 + $0x10] sm:$0xff] }
0x120c   : > { %v2650_v39 = vsel %vm506_vm6, %v2647_v17, %v2649_v36  ;;  %v2651_v34 = vsel %vm506_vm6, %v2649_v36, %v2647_v17  ;;  %v2814_v17 = vmul.f32 0.125, %v5452_v58  ;;  %v2816_v7 = vmul.f32 0.125, %v5464_v21 }
0x120d   : > { %v2652_v59 = vmul.f32 %v2650_v39, %v4157_v24  ;;  %v2653_v44 = vmul.f32 %v2651_v34, %v4160_v29 }
0x120e   : > { %v2657_v35 = vpop.permute.xlu0 %2656 }
0x120f   : > { %v2659_v51 = vpop.permute.xlu1 %2658  ;;  %v2654_v54 = vadd.f32 %v2652_v59, %v2644_v6  ;;  %v2655_v52 = vadd.f32 %v2653_v44, %v2645_v49 }
0x1210   : > { %v2660_v31 = vsel %vm528_vm7, %v2657_v35, %v2659_v51  ;;  %v2661_v4 = vsel %vm528_vm7, %v2659_v51, %v2657_v35 }
0x1211   : > { %v2662_v19 = vmul.f32 %v2660_v31, %v4178_v38  ;;  %v2663_v9 = vmul.f32 %v2661_v4, %v4175_v37 }
0x1213   : > { %v2664_v40 = vadd.f32 %v2662_v19, %v2654_v54  ;;  %v2665_v10 = vadd.f32 %v2663_v9, %v2655_v52 }
0x1215   : > { %v2666_v11 = vadd.f32 %v2664_v40, %v4280_v53  ;;  %v2667_v5 = vadd.f32 %v2665_v10, %v4280_v53 }
0x1217   : > { %v2668_v33 = vmul.f32 0.10489029, %v2666_v11  ;;  %v2669_v13 = vmul.f32 0.10489029, %v2667_v5 }
0x1219   : > { %v2670_v20 = vsub.f32 %v5216_v43, %v2668_v33  ;;  %v2671_v32 = vsub.f32 %v5218_v63, %v2669_v13  ;;  %v5446_v43 = vld [vmem:[%s5896_s5 + $0x8] sm:$0xff] }
0x121a   : > { %v2815_v63 = vmul.f32 0.125, %v5446_v43 }
0x121b   : > { %v2672_v62 = vmul.f32 1.0029055, %v2670_v20  ;;  %v2673_v0 = vmul.f32 1.0029055, %v2671_v32 }
0x121d   : > { %v5407_v14 = vadd.f32 %v2677_v1, %v2672_v62  ;;  %v5409_v55 = vadd.f32 %v2678_v8, %v2673_v0 }
0x121f   : > { %2683 = vrot.lane.b32.xlu1 %v5409_v55, %s5931_s13  ;;  %2681 = vrot.lane.b32.xlu0 %v5407_v14, %s5931_s13 }
0x1223   : > { %2691 = vrot.lane.b32.xlu1 %v5409_v55, %s5932_s24  ;;  %2689 = vrot.lane.b32.xlu0 %v5407_v14, %s5932_s24 }
0x1227   : > { %2699 = vrot.lane.b32.xlu1 %v5409_v55, %s5926_s10  ;;  %2697 = vrot.lane.b32.xlu0 %v5407_v14, %s5926_s10 }
0x122b   : > { %2707 = vrot.lane.b32.xlu1 %v5409_v55, %s5927_s19  ;;  %2705 = vrot.lane.b32.xlu0 %v5407_v14, %s5927_s19 }
0x122f   : > { %2715 = vrot.lane.b32.xlu1 %v5409_v55, %s5928_s12  ;;  %2713 = vrot.lane.b32.xlu0 %v5407_v14, %s5928_s12 }
0x1233   : > { %2723 = vrot.lane.b32.xlu1 %v5409_v55, %s5929_s21  ;;  %2721 = vrot.lane.b32.xlu0 %v5407_v14, %s5929_s21 }
0x1237   : > { %2731 = vrot.lane.b32.xlu1 %v5409_v55, %s5930_s23  ;;  %2729 = vrot.lane.b32.xlu0 %v5407_v14, %s5930_s23 }
0x123b   : > { %2739 = vrot.lane.b32.xlu1 %v5409_v55, %s3809_s26  ;;  %2737 = vrot.lane.b32.xlu0 %v5407_v14, %s3809_s26 }
0x123f   : > { %2825 = vperm.xlu1 %3659, %v2815_v63   ;;  %2820 = vperm.xlu0 %3658, %v2814_v17  }
0x1243   : > { %2835 = vperm.xlu1 %3659, %v2817_v3   ;;  %2830 = vperm.xlu0 %3658, %v2816_v7  }
0x1291   : > { %v2684_v36 = vpop.permute.xlu1 %2683  ;;  %v2682_v39 = vpop.permute.xlu0 %2681 }
0x1292   : > { %v2685_v34 = vsel %vm375_vm1, %v2682_v39, %v2684_v36  ;;  %v2686_v41 = vsel %vm375_vm1, %v2684_v36, %v2682_v39 }
0x1293   : > { %v2687_v6 = vmul.f32 %v2686_v41, %v4075_v27  ;;  %v2688_v49 = vmul.f32 %v2685_v34, %v4069_v25 }
0x1295   : > { %v2692_v42 = vpop.permute.xlu1 %2691  ;;  %v2690_v59 = vpop.permute.xlu0 %2689 }
0x1296   : > { %v2693_v44 = vsel %vm396_vm0, %v2690_v59, %v2692_v42  ;;  %v2694_v35 = vsel %vm396_vm0, %v2692_v42, %v2690_v59 }
0x1297   : > { %v2695_v51 = vmul.f32 %v2694_v35, %v4078_v28  ;;  %v2696_v31 = vmul.f32 %v2693_v44, %v4072_v26 }
0x1299   : > { %v2745_v4 = vpack.c.bf16 %v2695_v51, %v2687_v6  ;;  %v2700_v54 = vpop.permute.xlu1 %2699  ;;  %v2698_v52 = vpop.permute.xlu0 %2697  ;;  %v2746_v19 = vpack.c.bf16 %v2696_v31, %v2688_v49 }
0x129a   : > { %v2701_v9 = vsel %vm418_vm2, %v2698_v52, %v2700_v54  ;;  %v2702_v40 = vsel %vm418_vm2, %v2700_v54, %v2698_v52 }
0x129b   : > { %2761 = vmatprep.subr.bf16.mxu0 %v2746_v19  ;;  %v2703_v50 = vmul.f32 %v2702_v40, %v4101_v45  ;;  %v2704_v33 = vmul.f32 %v2701_v9, %v4104_v46 }
0x129c   : > { %2762 = vmatpush1.bf16.msra.mxu0 %v2745_v4 }
0x129d   : > { %v2708_v10 = vpop.permute.xlu1 %2707  ;;  %v2706_v11 = vpop.permute.xlu0 %2705 }
0x129e   : > { %v2709_v5 = vsel %vm440_vm3, %v2706_v11, %v2708_v10  ;;  %v2710_v16 = vsel %vm440_vm3, %v2708_v10, %v2706_v11 }
0x129f   : > { %v2711_v13 = vmul.f32 %v2710_v16, %v4107_v47  ;;  %v2712_v1 = vmul.f32 %v2709_v5, %v4110_v48 }
0x12a1   : > { %v2747_v8 = vpack.c.bf16 %v2711_v13, %v2703_v50  ;;  %v2716_v20 = vpop.permute.xlu1 %2715  ;;  %v2714_v32 = vpop.permute.xlu0 %2713  ;;  %v2748_v62 = vpack.c.bf16 %v2712_v1, %v2704_v33  ;;  %v5522_v13 = vld [vmem:[%s5894_s3] sm:$0xff]   ;;  %v5530_v1 = vld [vmem:[%s5894_s3 + $0x8] sm:$0xff]  }
0x12a2   : > { %v2717_v0 = vsel %vm462_vm4, %v2714_v32, %v2716_v20  ;;  %v2718_v63 = vsel %vm462_vm4, %v2716_v20, %v2714_v32 }
0x12a3   : > { %v2719_v17 = vmul.f32 %v2717_v0, %v4125_v56  ;;  %v2720_v3 = vmul.f32 %v2718_v63, %v4128_v57  ;;  %2763 = vmatprep.subr.bf16.mxu0 %v2748_v62 }
0x12a4   : > { %2764 = vmatpush1.bf16.msra.mxu0 %v2747_v8 }
0x12a5   : > { %v2749_v7 = vpack.c.bf16 %v2719_v17, %v5407_v14  ;;  %v2724_v36 = vpop.permute.xlu1 %2723  ;;  %v2722_v39 = vpop.permute.xlu0 %2721  ;;  %v2750_v34 = vpack.c.bf16 %v2720_v3, %v5409_v55 }
0x12a6   : > { %v2725_v41 = vsel %vm484_vm5, %v2722_v39, %v2724_v36  ;;  %v2726_v42 = vsel %vm484_vm5, %v2724_v36, %v2722_v39 }
0x12a7   : > { %2765 = vmatprep.subr.bf16.mxu0 %v2750_v34  ;;  %v2727_v49 = vmul.f32 %v2725_v41, %v4151_v22  ;;  %v2728_v51 = vmul.f32 %v2726_v42, %v4154_v23 }
0x12a8   : > { %2766 = vmatpush1.bf16.msra.mxu0 %v2749_v7 }
0x12a9   : > { %v2732_v59 = vpop.permute.xlu1 %2731  ;;  %v2730_v44 = vpop.permute.xlu0 %2729 }
0x12aa   : > { %v2733_v35 = vsel %vm506_vm6, %v2730_v44, %v2732_v59  ;;  %v2734_v6 = vsel %vm506_vm6, %v2732_v59, %v2730_v44 }
0x12ab   : > { %v2735_v31 = vmul.f32 %v2733_v35, %v4157_v24  ;;  %v2736_v4 = vmul.f32 %v2734_v6, %v4160_v29 }
0x12ad   : > { %v2751_v54 = vpack.c.bf16 %v2735_v31, %v2727_v49  ;;  %v2740_v52 = vpop.permute.xlu1 %2739  ;;  %v2738_v19 = vpop.permute.xlu0 %2737  ;;  %v2752_v9 = vpack.c.bf16 %v2736_v4, %v2728_v51 }
0x12ae   : > { %v2741_v40 = vsel %vm528_vm7, %v2738_v19, %v2740_v52  ;;  %v2742_v10 = vsel %vm528_vm7, %v2740_v52, %v2738_v19 }
0x12af   : > { %v2743_v11 = vmul.f32 %v2741_v40, %v4178_v38  ;;  %v2744_v5 = vmul.f32 %v2742_v10, %v4175_v37  ;;  %2767 = vmatprep.subr.bf16.mxu0 %v2752_v9 }
0x12b0   : > { %2768 = vmatpush1.bf16.msra.mxu0 %v2751_v54 }
0x12b1   : > { %v2753_v16 = vpack.c.bf16 %v2743_v11, %v2743_v11  ;;  %v2754_v50 = vpack.c.bf16 %v2744_v5, %v2744_v5 }
0x12b3   : > { %3569 = vmatprep.subr.msk.bf16.mxu0 %vm593_vm8, %v2754_v50  ;;  %v2756_v33 = vsel %vm593_vm8, %v2753_v16, 0 }
0x12b4   : > { %2770 = vmatpush1.bf16.msra.mxu0 %v2756_v33 }
0x12b7   : > { %3570 = vmatmul.mubr.msk.bf16.vlgmr.msra.gmra.mrb[80].mxu0 %vm586_vm9, %v5522_v13 }
0x12b8   : > { %2803 = vmatprep.mubr.bf16.mxu0 %v3807_v2 }
0x12be   : > { %v2821_v62 = vpop.permute.xlu0 %2820  ;;  %v2826_v36 = vpop.permute.xlu1 %2825 }
0x12bf   : > { %3571 = vmatmul.mubr.msk.bf16.gmra.mrb[84].mxu0 %vm586_vm9, %v5530_v1 }
0x12c0   : > { %2890 = vmatprep.mubr.bf16.mxu0 %v3807_v2 }
0x12c2   : > { %v2831_v54 = vpop.permute.xlu0 %2830  ;;  %v2836_v5 = vpop.permute.xlu1 %2835 }
0x138a   : > { %v2795_v8 = vpop.f32.mrb[80].mxu0 }
0x138b   : > { %v2796_v20 = vadd.f32 %v2795_v8, %v4210_v61  ;;  %v2797_v32 = vpop.f32.mrb[81].mxu0 }
0x138c   : > { %v2798_v0 = vadd.f32 %v2797_v32, %v4210_v61  ;;  %v2799_v63 = vpop.f32.mrb[82].mxu0 }
0x138d   : > { %v2838_v17 = vadd.f32 %v2821_v62, %v2796_v20  ;;  %v2800_v3 = vadd.f32 %v2799_v63, %v4208_v60  ;;  %v2801_v7 = vpop.f32.mrb[83].mxu0 }
0x138e   : > { %v2839_v39 = vadd.f32 %v2821_v62, %v2798_v0  ;;  %v2802_v34 = vadd.f32 %v2801_v7, %v4208_v60  ;;  %v5554_v7 = vld [vmem:[%s5897_s6 + $0x8] sm:$0xff]  }
0x138f   : > { %v2840_v41 = vadd.f32 %v2826_v36, %v2800_v3  ;;  %v2846_v59 = vmax.f32 %v2838_v17, 0.0  ;;  %v5546_v3 = vld [vmem:[%s5897_s6] sm:$0xff]  }
0x1390   : > { %v2841_v42 = vadd.f32 %v2826_v36, %v2802_v34  ;;  %v2847_v35 = vmax.f32 %v2839_v39, 0.0  ;;  %v5562_v36 = vld [vmem:[%s5897_s6 + $0x10] sm:$0xff]   ;;  %v5570_v39 = vld [vmem:[%s5897_s6 + $0x18] sm:$0xff]   ;;  %v5578_v34 = vld [vmem:[%s5897_s6 + $0x20] ss:$0 sps:$4 sm:$0xff]  }
0x1391   : > { %v2848_v44 = vmax.f32 %v2840_v41, 0.0 }
0x1392   : > { %v2849_v6 = vmax.f32 %v2841_v42, 0.0  ;;  %v2805_v49 = vpop.f32.mrb[84].mxu0 }
0x1393   : > { %v2854_v51 = vpack.c.bf16 %v2848_v44, %v2846_v59  ;;  %v2806_v31 = vadd.f32 %v2805_v49, %v4215_v15  ;;  %v2807_v4 = vpop.f32.mrb[85].mxu0 }
0x1394   : > { %v2808_v52 = vadd.f32 %v2807_v4, %v4215_v15  ;;  %v2809_v19 = vpop.f32.mrb[86].mxu0  ;;  %v2855_v9 = vpack.c.bf16 %v2849_v6, %v2847_v35 }
0x1395   : > { %v2842_v40 = vadd.f32 %v2831_v54, %v2806_v31  ;;  %v2810_v10 = vadd.f32 %v2809_v19, %v4218_v30  ;;  %v2811_v11 = vpop.f32.mrb[87].mxu0 }
0x1396   : > { %v2843_v16 = vadd.f32 %v2831_v54, %v2808_v52  ;;  %v2812_v50 = vadd.f32 %v2811_v11, %v4218_v30  ;;  %2858 = vmatprep.subr.bf16.mxu0 %v2855_v9 }
0x1397   : > { %v2844_v33 = vadd.f32 %v2836_v5, %v2810_v10  ;;  %2859 = vmatpush1.bf16.msra.mxu0 %v2854_v51  ;;  %v2850_v20 = vmax.f32 %v2842_v40, 0.0 }
0x1398   : > { %v2845_v8 = vadd.f32 %v2836_v5, %v2812_v50  ;;  %v2851_v62 = vmax.f32 %v2843_v16, 0.0 }
0x1399   : > { %v2852_v32 = vmax.f32 %v2844_v33, 0.0 }
0x139a   : > { %v2853_v0 = vmax.f32 %v2845_v8, 0.0 }
0x139b   : > { %v2856_v63 = vpack.c.bf16 %v2852_v32, %v2850_v20 }
0x139c   : > { %v2857_v17 = vpack.c.bf16 %v2853_v0, %v2851_v62 }
0x139e   : > { %2860 = vmatprep.subr.bf16.mxu0 %v2857_v17 }
0x139f   : > { %2861 = vmatpush1.bf16.msra.mxu0 %v2856_v63 }
0x13a2   : > { %3572 = vmatmul.mubr.msk.bf16.vlgmr.msra.gmra.mrb[88].mxu0 %vm720_vm10, %v5546_v3 }
0x13a3   : > { %2900 = vmatprep.mubr.bf16.mxu0 %v3807_v2 }
0x13aa   : > { %3573 = vmatmul.mubr.msk.bf16.gmra.mrb[92].mxu0 %vm720_vm10, %v5554_v7 }
0x13ab   : > { %2910 = vmatprep.mubr.bf16.mxu0 %v3807_v2 }
0x13b2   : > { %3574 = vmatmul.mubr.msk.bf16.gmra.mrb[96].mxu0 %vm720_vm10, %v5562_v36 }
0x13b3   : > { %2920 = vmatprep.mubr.bf16.mxu0 %v3807_v2 }
0x13ba   : > { %3575 = vmatmul.mubr.msk.bf16.gmra.mrb[100].mxu0 %vm720_vm10, %v5570_v39 }
0x13bb   : > { %2930 = vmatprep.mubr.bf16.mxu0 %v3807_v2 }
0x13c2   : > { %3576 = vmatmul.mubr.msk.bf16.gmra.mrb[104].mxu0 %vm720_vm10, %v5578_v34 }
0x1475   : > { %v2892_v41 = vpop.f32.mrb[88].mxu0 }
0x1476   : > { %v2894_v42 = vpop.f32.mrb[89].mxu0  ;;  %2939 = vrot.lane.b32.xlu0 %v2892_v41, %s5931_s13 }
0x1477   : > { %2941 = vrot.lane.b32.xlu1 %v2894_v42, %s5931_s13  ;;  %v2896_v59 = vpop.f32.mrb[90].mxu0 }
0x1478   : > { %v2898_v44 = vpop.f32.mrb[91].mxu0 }
0x147a   : > { %2947 = vrot.lane.b32.xlu0 %v2896_v59, %s5932_s24 }
0x147b   : > { %2949 = vrot.lane.b32.xlu1 %v2898_v44, %s5932_s24 }
0x147d   : > { %v2902_v35 = vpop.f32.mrb[92].mxu0 }
0x147e   : > { %v2904_v6 = vpop.f32.mrb[93].mxu0  ;;  %2957 = vrot.lane.b32.xlu0 %v2902_v35, %s5926_s10 }
0x147f   : > { %2959 = vrot.lane.b32.xlu1 %v2904_v6, %s5926_s10  ;;  %v2906_v49 = vpop.f32.mrb[94].mxu0 }
0x1480   : > { %v2908_v51 = vpop.f32.mrb[95].mxu0 }
0x1482   : > { %2967 = vrot.lane.b32.xlu0 %v2906_v49, %s5927_s19 }
0x1483   : > { %2969 = vrot.lane.b32.xlu1 %v2908_v51, %s5927_s19 }
0x1485   : > { %v2912_v31 = vpop.f32.mrb[96].mxu0 }
0x1486   : > { %v2914_v4 = vpop.f32.mrb[97].mxu0 }
0x1487   : > { %v2916_v54 = vpop.f32.mrb[98].mxu0 }
0x1488   : > { %v2918_v52 = vpop.f32.mrb[99].mxu0  ;;  %2979 = vrot.lane.b32.xlu0 %v2916_v54, %s5928_s12 }
0x1489   : > { %2981 = vrot.lane.b32.xlu1 %v2918_v52, %s5928_s12 }
0x148d   : > { %v2922_v19 = vpop.f32.mrb[100].mxu0 }
0x148e   : > { %v2924_v9 = vpop.f32.mrb[101].mxu0  ;;  %2989 = vrot.lane.b32.xlu0 %v2922_v19, %s5929_s21 }
0x148f   : > { %2991 = vrot.lane.b32.xlu1 %v2924_v9, %s5929_s21  ;;  %v2926_v40 = vpop.f32.mrb[102].mxu0 }
0x1490   : > { %v2928_v10 = vpop.f32.mrb[103].mxu0 }
0x1492   : > { %2999 = vrot.lane.b32.xlu0 %v2926_v40, %s5930_s23 }
0x1493   : > { %3001 = vrot.lane.b32.xlu1 %v2928_v10, %s5930_s23 }
0x1495   : > { %v2932_v11 = vpop.f32.mrb[104].mxu0 }
0x1496   : > { %v2934_v5 = vpop.f32.mrb[105].mxu0  ;;  %3009 = vrot.lane.b32.xlu0 %v2932_v11, %s3809_s26 }
0x1497   : > { %3011 = vrot.lane.b32.xlu1 %v2934_v5, %s3809_s26  ;;  %v2936_v16 = vpop.f32.mrb[106].mxu0 }
0x1498   : > { %v2937_v50 = vpop.f32.mrb[107].mxu0 }
0x14e8   : > { %v2940_v33 = vpop.permute.xlu0 %2939 }
0x14e9   : > { %v2942_v8 = vpop.permute.xlu1 %2941 }
0x14ea   : > { %v2943_v59 = vsel %vm375_vm1, %v2940_v33, %v2942_v8  ;;  %v2944_v44 = vsel %vm375_vm1, %v2942_v8, %v2940_v33 }
0x14eb   : > { %v2945_v19 = vmul.f32 %v2944_v44, %v4075_v27  ;;  %v2946_v9 = vmul.f32 %v2943_v59, %v4069_v25 }
0x14ec   : > { %v2948_v20 = vpop.permute.xlu0 %2947 }
0x14ed   : > { %v2950_v32 = vpop.permute.xlu1 %2949 }
0x14ee   : > { %v2951_v63 = vsel %vm396_vm0, %v2948_v20, %v2950_v32  ;;  %v2952_v17 = vsel %vm396_vm0, %v2950_v32, %v2948_v20 }
0x14ef   : > { %v2953_v49 = vmul.f32 %v2952_v17, %v4078_v28  ;;  %v2954_v51 = vmul.f32 %v2951_v63, %v4072_v26 }
0x14f0   : > { %v2958_v62 = vpop.permute.xlu0 %2957 }
0x14f1   : > { %v2960_v0 = vpop.permute.xlu1 %2959  ;;  %v2955_v5 = vadd.f32 %v2953_v49, %v2945_v19  ;;  %v2956_v16 = vadd.f32 %v2954_v51, %v2946_v9 }
0x14f2   : > { %v2961_v35 = vsel %vm418_vm2, %v2958_v62, %v2960_v0  ;;  %v2962_v6 = vsel %vm418_vm2, %v2960_v0, %v2958_v62 }
0x14f3   : > { %v2963_v40 = vmul.f32 %v2962_v6, %v4101_v45  ;;  %v2964_v10 = vmul.f32 %v2961_v35, %v4104_v46 }
0x14f4   : > { %v2968_v41 = vpop.permute.xlu0 %2967 }
0x14f5   : > { %v2970_v42 = vpop.permute.xlu1 %2969  ;;  %v2965_v20 = vadd.f32 %v2963_v40, %v2955_v5  ;;  %v2966_v32 = vadd.f32 %v2964_v10, %v2956_v16 }
0x14f6   : > { %v2971_v54 = vsel %vm440_vm3, %v2968_v41, %v2970_v42  ;;  %v2972_v52 = vsel %vm440_vm3, %v2970_v42, %v2968_v41 }
0x14f7   : > { %v2973_v50 = vmul.f32 %v2972_v52, %v4107_v47  ;;  %v2974_v33 = vmul.f32 %v2971_v54, %v4110_v48 }
0x14f9   : > { %v2975_v17 = vadd.f32 %v2973_v50, %v2965_v20  ;;  %v2976_v41 = vadd.f32 %v2974_v33, %v2966_v32 }
0x14fa   : > { %v2980_v11 = vpop.permute.xlu0 %2979 }
0x14fb   : > { %v2982_v8 = vpop.permute.xlu1 %2981  ;;  %v2977_v51 = vadd.f32 %v2975_v17, %v2912_v31  ;;  %v2978_v54 = vadd.f32 %v2976_v41, %v2914_v4 }
0x14fc   : > { %v2983_v62 = vsel %vm462_vm4, %v2980_v11, %v2982_v8  ;;  %v2984_v0 = vsel %vm462_vm4, %v2982_v8, %v2980_v11 }
0x14fd   : > { %v2985_v35 = vmul.f32 %v2983_v62, %v4125_v56  ;;  %v2986_v6 = vmul.f32 %v2984_v0, %v4128_v57 }
0x14ff   : > { %v2987_v11 = vadd.f32 %v2985_v35, %v2977_v51  ;;  %v2988_v5 = vadd.f32 %v2986_v6, %v2978_v54  ;;  %v3577_v35 = vld [vmem:[%s3964_s25 + $0x60] sm:$0xff]  ;;  %v3578_v6 = vld [vmem:[%s3964_s25 + $0x68] sm:$0xff] }
0x1500   : > { %v2990_v63 = vpop.permute.xlu0 %2989  ;;  %v3030_v54 = vmul.f32 0.002942857, %v3577_v35 }
0x1501   : > { %v2992_v42 = vpop.permute.xlu1 %2991 }
0x1502   : > { %v2993_v59 = vsel %vm484_vm5, %v2990_v63, %v2992_v42  ;;  %v2994_v44 = vsel %vm484_vm5, %v2992_v42, %v2990_v63 }
0x1503   : > { %v2995_v52 = vmul.f32 %v2993_v59, %v4151_v22  ;;  %v2996_v19 = vmul.f32 %v2994_v44, %v4154_v23 }
0x1504   : > { %v3000_v49 = vpop.permute.xlu0 %2999 }
0x1505   : > { %v3002_v9 = vpop.permute.xlu1 %3001  ;;  %v2997_v4 = vadd.f32 %v2995_v52, %v2987_v11  ;;  %v2998_v33 = vadd.f32 %v2996_v19, %v2988_v5  ;;  %v3031_v52 = vmul.f32 0.002942857, %v3578_v6 }
0x1506   : > { %v3003_v40 = vsel %vm506_vm6, %v3000_v49, %v3002_v9  ;;  %v3004_v10 = vsel %vm506_vm6, %v3002_v9, %v3000_v49 }
0x1507   : > { %v3005_v16 = vmul.f32 %v3003_v40, %v4157_v24  ;;  %v3006_v50 = vmul.f32 %v3004_v10, %v4160_v29 }
0x1508   : > { %v3010_v31 = vpop.permute.xlu0 %3009 }
0x1509   : > { %v3012_v8 = vpop.permute.xlu1 %3011  ;;  %v3007_v62 = vadd.f32 %v3005_v16, %v2997_v4  ;;  %v3008_v0 = vadd.f32 %v3006_v50, %v2998_v33  ;;  %v3170_v16 = vmul.f32 0.0, %v5458_v12  ;;  %v3169_v50 = vmul.f32 0.0, %v5464_v21 }
0x150a   : > { %v3013_v20 = vsel %vm528_vm7, %v3010_v31, %v3012_v8  ;;  %v3014_v32 = vsel %vm528_vm7, %v3012_v8, %v3010_v31 }
0x150b   : > { %v3015_v63 = vmul.f32 %v3013_v20, %v4178_v38  ;;  %v3016_v17 = vmul.f32 %v3014_v32, %v4175_v37 }
0x150d   : > { %v3017_v41 = vadd.f32 %v3015_v63, %v3007_v62  ;;  %v3018_v42 = vadd.f32 %v3016_v17, %v3008_v0 }
0x150f   : > { %v3019_v59 = vadd.f32 %v3017_v41, %v4280_v53  ;;  %v3020_v44 = vadd.f32 %v3018_v42, %v4280_v53 }
0x1511   : > { %v3021_v49 = vmul.f32 0.2942616, %v3019_v59  ;;  %v3022_v51 = vmul.f32 0.2942616, %v3020_v44 }
0x1513   : > { %v3023_v19 = vsub.f32 %v5407_v14, %v3021_v49  ;;  %v3024_v9 = vsub.f32 %v5409_v55, %v3022_v51  ;;  %v3168_v14 = vmul.f32 0.0, %v5446_v43  ;;  %v3167_v55 = vmul.f32 0.0, %v5452_v58 }
0x1515   : > { %v3025_v40 = vmul.f32 1.0014747, %v3023_v19  ;;  %v3026_v10 = vmul.f32 1.0014747, %v3024_v9 }
0x1517   : > { %v5652_v11 = vadd.f32 %v3030_v54, %v3025_v40  ;;  %v5654_v5 = vadd.f32 %v3031_v52, %v3026_v10 }
0x1519   : > { %3036 = vrot.lane.b32.xlu1 %v5654_v5, %s5931_s13  ;;  %3034 = vrot.lane.b32.xlu0 %v5652_v11, %s5931_s13 }
0x151d   : > { %3044 = vrot.lane.b32.xlu1 %v5654_v5, %s5932_s24  ;;  %3042 = vrot.lane.b32.xlu0 %v5652_v11, %s5932_s24 }
0x1521   : > { %3052 = vrot.lane.b32.xlu1 %v5654_v5, %s5926_s10  ;;  %3050 = vrot.lane.b32.xlu0 %v5652_v11, %s5926_s10 }
0x1525   : > { %3060 = vrot.lane.b32.xlu1 %v5654_v5, %s5927_s19  ;;  %3058 = vrot.lane.b32.xlu0 %v5652_v11, %s5927_s19 }
0x1529   : > { %3068 = vrot.lane.b32.xlu1 %v5654_v5, %s5928_s12  ;;  %3066 = vrot.lane.b32.xlu0 %v5652_v11, %s5928_s12 }
0x152d   : > { %3076 = vrot.lane.b32.xlu1 %v5654_v5, %s5929_s21  ;;  %3074 = vrot.lane.b32.xlu0 %v5652_v11, %s5929_s21 }
0x1531   : > { %3084 = vrot.lane.b32.xlu1 %v5654_v5, %s5930_s23  ;;  %3082 = vrot.lane.b32.xlu0 %v5652_v11, %s5930_s23 }
0x1535   : > { %3092 = vrot.lane.b32.xlu1 %v5654_v5, %s3809_s26  ;;  %3090 = vrot.lane.b32.xlu0 %v5652_v11, %s3809_s26 }
0x1539   : > { %3178 = vperm.xlu1 %3659, %v3168_v14   ;;  %3173 = vperm.xlu0 %3658, %v3167_v55  }
0x153d   : > { %3188 = vperm.xlu1 %3659, %v3170_v16   ;;  %3183 = vperm.xlu0 %3658, %v3169_v50  }
0x158b   : > { %v3037_v31 = vpop.permute.xlu1 %3036  ;;  %v3035_v4 = vpop.permute.xlu0 %3034 }
0x158c   : > { %v3038_v33 = vsel %vm375_vm1, %v3035_v4, %v3037_v31  ;;  %v3039_v8 = vsel %vm375_vm1, %v3037_v31, %v3035_v4 }
0x158d   : > { %v3040_v21 = vmul.f32 %v3039_v8, %v4075_v27  ;;  %v3041_v32 = vmul.f32 %v3038_v33, %v4069_v25 }
0x158f   : > { %v3045_v20 = vpop.permute.xlu1 %3044  ;;  %v3043_v43 = vpop.permute.xlu0 %3042 }
0x1590   : > { %v3046_v58 = vsel %vm396_vm0, %v3043_v43, %v3045_v20  ;;  %v3047_v12 = vsel %vm396_vm0, %v3045_v20, %v3043_v43 }
0x1591   : > { %v3048_v62 = vmul.f32 %v3047_v12, %v4078_v28  ;;  %v3049_v0 = vmul.f32 %v3046_v58, %v4072_v26 }
0x1593   : > { %v3098_v63 = vpack.c.bf16 %v3048_v62, %v3040_v21  ;;  %v3053_v17 = vpop.permute.xlu1 %3052  ;;  %v3051_v41 = vpop.permute.xlu0 %3050  ;;  %v3099_v42 = vpack.c.bf16 %v3049_v0, %v3041_v32 }
0x1594   : > { %v3054_v59 = vsel %vm418_vm2, %v3051_v41, %v3053_v17  ;;  %v3055_v44 = vsel %vm418_vm2, %v3053_v17, %v3051_v41 }
0x1595   : > { %3114 = vmatprep.subr.bf16.mxu1 %v3099_v42  ;;  %v3056_v54 = vmul.f32 %v3055_v44, %v4101_v45  ;;  %v3057_v52 = vmul.f32 %v3054_v59, %v4104_v46 }
0x1596   : > { %3115 = vmatpush1.bf16.msra.mxu1 %v3098_v63 }
0x1597   : > { %v3061_v35 = vpop.permute.xlu1 %3060  ;;  %v3059_v6 = vpop.permute.xlu0 %3058 }
0x1598   : > { %v3062_v49 = vsel %vm440_vm3, %v3059_v6, %v3061_v35  ;;  %v3063_v51 = vsel %vm440_vm3, %v3061_v35, %v3059_v6 }
0x1599   : > { %v3064_v19 = vmul.f32 %v3063_v51, %v4107_v47  ;;  %v3065_v9 = vmul.f32 %v3062_v49, %v4110_v48 }
0x159b   : > { %v3100_v40 = vpack.c.bf16 %v3064_v19, %v3056_v54  ;;  %v3069_v10 = vpop.permute.xlu1 %3068  ;;  %v3067_v14 = vpop.permute.xlu0 %3066  ;;  %v3101_v55 = vpack.c.bf16 %v3065_v9, %v3057_v52 }
0x159c   : > { %v3070_v16 = vsel %vm462_vm4, %v3067_v14, %v3069_v10  ;;  %v3071_v50 = vsel %vm462_vm4, %v3069_v10, %v3067_v14 }
0x159d   : > { %v3072_v31 = vmul.f32 %v3070_v16, %v4125_v56  ;;  %v3073_v4 = vmul.f32 %v3071_v50, %v4128_v57  ;;  %3116 = vmatprep.subr.bf16.mxu1 %v3101_v55 }
0x159e   : > { %3117 = vmatpush1.bf16.msra.mxu1 %v3100_v40 }
0x159f   : > { %v3102_v33 = vpack.c.bf16 %v3072_v31, %v5652_v11  ;;  %v3077_v8 = vpop.permute.xlu1 %3076  ;;  %v3075_v20 = vpop.permute.xlu0 %3074  ;;  %v3103_v43 = vpack.c.bf16 %v3073_v4, %v5654_v5 }
0x15a0   : > { %v3078_v58 = vsel %vm484_vm5, %v3075_v20, %v3077_v8  ;;  %v3079_v12 = vsel %vm484_vm5, %v3077_v8, %v3075_v20 }
0x15a1   : > { %3118 = vmatprep.subr.bf16.mxu1 %v3103_v43  ;;  %v3080_v63 = vmul.f32 %v3078_v58, %v4151_v22  ;;  %v3081_v17 = vmul.f32 %v3079_v12, %v4154_v23 }
0x15a2   : > { %3119 = vmatpush1.bf16.msra.mxu1 %v3102_v33 }
0x15a3   : > { %v3085_v21 = vpop.permute.xlu1 %3084  ;;  %v3083_v32 = vpop.permute.xlu0 %3082 }
0x15a4   : > { %v3086_v62 = vsel %vm506_vm6, %v3083_v32, %v3085_v21  ;;  %v3087_v0 = vsel %vm506_vm6, %v3085_v21, %v3083_v32 }
0x15a5   : > { %v3088_v41 = vmul.f32 %v3086_v62, %v4157_v24  ;;  %v3089_v42 = vmul.f32 %v3087_v0, %v4160_v29 }
0x15a7   : > { %v3104_v59 = vpack.c.bf16 %v3088_v41, %v3080_v63  ;;  %v3093_v44 = vpop.permute.xlu1 %3092  ;;  %v3091_v35 = vpop.permute.xlu0 %3090  ;;  %v3105_v6 = vpack.c.bf16 %v3089_v42, %v3081_v17 }
0x15a8   : > { %v3094_v49 = vsel %vm528_vm7, %v3091_v35, %v3093_v44  ;;  %v3095_v51 = vsel %vm528_vm7, %v3093_v44, %v3091_v35 }
0x15a9   : > { %v3096_v54 = vmul.f32 %v3094_v49, %v4178_v38  ;;  %v3097_v52 = vmul.f32 %v3095_v51, %v4175_v37  ;;  %3120 = vmatprep.subr.bf16.mxu1 %v3105_v6 }
0x15aa   : > { %3121 = vmatpush1.bf16.msra.mxu1 %v3104_v59 }
0x15ab   : > { %v3106_v19 = vpack.c.bf16 %v3096_v54, %v3096_v54  ;;  %v3107_v9 = vpack.c.bf16 %v3097_v52, %v3097_v52 }
0x15ad   : > { %3579 = vmatprep.subr.msk.bf16.mxu1 %vm593_vm8, %v3107_v9  ;;  %v3109_v40 = vsel %vm593_vm8, %v3106_v19, 0 }
0x15ae   : > { %3123 = vmatpush1.bf16.msra.mxu1 %v3109_v40 }
0x15b1   : > { %3580 = vmatmul.mubr.msk.bf16.vlgmr.msra.gmra.mrb[88].mxu1 %vm586_vm9, %v5522_v13 }
0x15b2   : > { %3156 = vmatprep.mubr.bf16.mxu1 %v3807_v2 }
0x15b8   : > { %v3174_v16 = vpop.permute.xlu0 %3173  ;;  %v3179_v13 = vpop.permute.xlu1 %3178 }
0x15b9   : > { %3581 = vmatmul.mubr.msk.bf16.gmra.mrb[92].mxu1 %vm586_vm9, %v5530_v1 }
0x15ba   : > { %3243 = vmatprep.mubr.bf16.mxu1 %v3807_v2 }
0x15bc   : > { %v3184_v41 = vpop.permute.xlu0 %3183  ;;  %v3189_v49 = vpop.permute.xlu1 %3188 }
0x1684   : > { %v3148_v10 = vpop.f32.mrb[88].mxu1 }
0x1685   : > { %v3149_v14 = vadd.f32 %v3148_v10, %v4210_v61  ;;  %v3150_v55 = vpop.f32.mrb[89].mxu1 }
0x1686   : > { %v3151_v50 = vadd.f32 %v3150_v55, %v4210_v61  ;;  %v3152_v31 = vpop.f32.mrb[90].mxu1 }
0x1687   : > { %v3191_v4 = vadd.f32 %v3174_v16, %v3149_v14  ;;  %v3153_v33 = vadd.f32 %v3152_v31, %v4208_v60  ;;  %v3154_v8 = vpop.f32.mrb[91].mxu1 }
0x1688   : > { %v3192_v20 = vadd.f32 %v3174_v16, %v3151_v50  ;;  %v3155_v43 = vadd.f32 %v3154_v8, %v4208_v60 }
0x1689   : > { %v3193_v58 = vadd.f32 %v3179_v13, %v3153_v33  ;;  %v3199_v12 = vmax.f32 %v3191_v4, 0.0 }
0x168a   : > { %v3194_v1 = vadd.f32 %v3179_v13, %v3155_v43  ;;  %v3200_v32 = vmax.f32 %v3192_v20, 0.0 }
0x168b   : > { %v3201_v21 = vmax.f32 %v3193_v58, 0.0 }
0x168c   : > { %v3202_v62 = vmax.f32 %v3194_v1, 0.0  ;;  %v3158_v0 = vpop.f32.mrb[92].mxu1 }
0x168d   : > { %v3207_v63 = vpack.c.bf16 %v3201_v21, %v3199_v12  ;;  %v3159_v17 = vadd.f32 %v3158_v0, %v4215_v15  ;;  %v3160_v61 = vpop.f32.mrb[93].mxu1 }
0x168e   : > { %v3161_v42 = vadd.f32 %v3160_v61, %v4215_v15  ;;  %v3162_v59 = vpop.f32.mrb[94].mxu1  ;;  %v3208_v44 = vpack.c.bf16 %v3202_v62, %v3200_v32 }
0x168f   : > { %v3195_v35 = vadd.f32 %v3184_v41, %v3159_v17  ;;  %v3163_v6 = vadd.f32 %v3162_v59, %v4218_v30  ;;  %v3164_v60 = vpop.f32.mrb[95].mxu1 }
0x1690   : > { %v3196_v51 = vadd.f32 %v3184_v41, %v3161_v42  ;;  %v3165_v54 = vadd.f32 %v3164_v60, %v4218_v30  ;;  %3211 = vmatprep.subr.bf16.mxu1 %v3208_v44 }
0x1691   : > { %v3197_v52 = vadd.f32 %v3189_v49, %v3163_v6  ;;  %3212 = vmatpush1.bf16.msra.mxu1 %v3207_v63  ;;  %v3203_v9 = vmax.f32 %v3195_v35, 0.0 }
0x1692   : > { %v3198_v19 = vadd.f32 %v3189_v49, %v3165_v54  ;;  %v3204_v10 = vmax.f32 %v3196_v51, 0.0 }
0x1693   : > { %v3205_v40 = vmax.f32 %v3197_v52, 0.0 }
0x1694   : > { %v3206_v14 = vmax.f32 %v3198_v19, 0.0 }
0x1695   : > { %v3209_v55 = vpack.c.bf16 %v3205_v40, %v3203_v9 }
0x1696   : > { %v3210_v15 = vpack.c.bf16 %v3206_v14, %v3204_v10 }
0x1698   : > { %3213 = vmatprep.subr.bf16.mxu1 %v3210_v15 }
0x1699   : > { %3214 = vmatpush1.bf16.msra.mxu1 %v3209_v55 }
0x169c   : > { %3582 = vmatmul.mubr.msk.bf16.vlgmr.msra.gmra.mrb[96].mxu1 %vm720_vm10, %v5546_v3 }
0x169d   : > { %3253 = vmatprep.mubr.bf16.mxu1 %v3807_v2 }
0x16a4   : > { %3583 = vmatmul.mubr.msk.bf16.gmra.mrb[100].mxu1 %vm720_vm10, %v5554_v7 }
0x16a5   : > { %3263 = vmatprep.mubr.bf16.mxu1 %v3807_v2 }
0x16ac   : > { %3584 = vmatmul.mubr.msk.bf16.gmra.mrb[104].mxu1 %vm720_vm10, %v5562_v36 }
0x16ad   : > { %3273 = vmatprep.mubr.bf16.mxu1 %v3807_v2 }
0x16b4   : > { %3585 = vmatmul.mubr.msk.bf16.gmra.mrb[108].mxu1 %vm720_vm10, %v5570_v39 }
0x16b5   : > { %3283 = vmatprep.mubr.bf16.mxu1 %v3807_v2 }
0x16bc   : > { %3586 = vmatmul.mubr.msk.bf16.gmra.mrb[112].mxu1 %vm720_vm10, %v5578_v34 }
0x176f   : > { %v3245_v30 = vpop.f32.mrb[96].mxu1 }
0x1770   : > { %v3247_v3 = vpop.f32.mrb[97].mxu1  ;;  %3292 = vrot.lane.b32.xlu0 %v3245_v30, %s5931_s13 }
0x1771   : > { %3294 = vrot.lane.b32.xlu1 %v3247_v3, %s5931_s13  ;;  %v3249_v7 = vpop.f32.mrb[98].mxu1  ;;  %s3390_s13 = scalar_lea.sflag [#allocation4], %s3960_s22 }
0x1772   : > { %v3251_v16 = vpop.f32.mrb[99].mxu1 }
0x1774   : > { %3300 = vrot.lane.b32.xlu0 %v3249_v7, %s5932_s24 }
0x1775   : > { %3302 = vrot.lane.b32.xlu1 %v3251_v16, %s5932_s24  ;;  %s3810_s24 = smov [#allocation5]  }
0x1776   : > { %s3734_s1 = sshll.u32 %s3810_s24, 4  ;;  %s3735_s1 = int_to_ptr.vmem [resolvable:$false] %s3734_s1 }
0x1777   : > { %v3255_v36 = vpop.f32.mrb[100].mxu1  ;;  %s3736_s2 = scalar_lea.vmem %s3735_s1, 512 }
0x1778   : > { %v3257_v50 = vpop.f32.mrb[101].mxu1  ;;  %3310 = vrot.lane.b32.xlu0 %v3255_v36, %s5926_s10 }
0x1779   : > { %3312 = vrot.lane.b32.xlu1 %v3257_v50, %s5926_s10  ;;  %v3259_v2 = vpop.f32.mrb[102].mxu1  ;;  %s3596_s10 = sshll.u32 %s3877_s9, 8 }
0x177a   : > { %v3261_v39 = vpop.f32.mrb[103].mxu1 }
0x177c   : > { %3320 = vrot.lane.b32.xlu0 %v3259_v2, %s5927_s19 }
0x177d   : > { %3322 = vrot.lane.b32.xlu1 %v3261_v39, %s5927_s19 }
0x177f   : > { %v3265_v34 = vpop.f32.mrb[104].mxu1 }
0x1780   : > { %v3267_v31 = vpop.f32.mrb[105].mxu1 }
0x1781   : > { %v3269_v4 = vpop.f32.mrb[106].mxu1 }
0x1782   : > { %v3271_v33 = vpop.f32.mrb[107].mxu1  ;;  %3332 = vrot.lane.b32.xlu0 %v3269_v4, %s5928_s12 }
0x1783   : > { %3334 = vrot.lane.b32.xlu1 %v3271_v33, %s5928_s12 }
0x1787   : > { %v3275_v8 = vpop.f32.mrb[108].mxu1 }
0x1788   : > { %v3277_v13 = vpop.f32.mrb[109].mxu1  ;;  %3342 = vrot.lane.b32.xlu0 %v3275_v8, %s5929_s21 }
0x1789   : > { %3344 = vrot.lane.b32.xlu1 %v3277_v13, %s5929_s21  ;;  %v3279_v20 = vpop.f32.mrb[110].mxu1 }
0x178a   : > { %v3281_v43 = vpop.f32.mrb[111].mxu1 }
0x178c   : > { %3352 = vrot.lane.b32.xlu0 %v3279_v20, %s5930_s23 }
0x178d   : > { %3354 = vrot.lane.b32.xlu1 %v3281_v43, %s5930_s23 }
0x178f   : > { %v3285_v58 = vpop.f32.mrb[112].mxu1 }
0x1790   : > { %v3287_v1 = vpop.f32.mrb[113].mxu1  ;;  %3362 = vrot.lane.b32.xlu0 %v3285_v58, %s3809_s26 }
0x1791   : > { %3364 = vrot.lane.b32.xlu1 %v3287_v1, %s3809_s26  ;;  %v3289_v12 = vpop.f32.mrb[114].mxu1  ;;  %s3494_s26 = sshll.u32 %s3960_s22, 4 }
0x1792   : > { %v3290_v21 = vpop.f32.mrb[115].mxu1  ;;  %s338_s19 = scalar_lea.vmem [#allocation5], %s3494_s26 }
0x1793   : > { %s3404_s12 = sshll.u32 %s338_s19, 4  ;;  %s5849_s12 = int_to_ptr.vmem [resolvable:$true] %s3404_s12 }
0x1794   : > { %s3730_s9 = scalar_lea.vmem %s5849_s12, 256  ;;  %p3737_p10 = scmp.lt.s32.totalorder %s5849_s12, %s3735_s1 }
0x1795   : > { %p3731_p6 = scmp.ne.s32.totalorder %s5849_s12, %s3730_s9  ;;  %p3738_p0 = scmp.lt.s32.totalorder %s3736_s2, %s3730_s9 }
0x1797   : > { %p3732_p13 = pnand %p3731_p6, %p5933_p12  ;;  %p3739_p2 = por %p3738_p0, %p3737_p10 }
0x1799   : > { %p3733_p8 = pneg %p3732_p13 }
0x179b   : > { %p3740_p4 = pnand %p3739_p2, %p3733_p8 }
0x17e2   : > { %v3293_v32 = vpop.permute.xlu0 %3292 }
0x17e3   : > { %v3295_v62 = vpop.permute.xlu1 %3294 }
0x17e4   : > { %v3296_v35 = vsel %vm375_vm1, %v3293_v32, %v3295_v62  ;;  %v3297_v6 = vsel %vm375_vm1, %v3295_v62, %v3293_v32 }
0x17e5   : > { %v3298_v9 = vmul.f32 %v3297_v6, %v4075_v27  ;;  %v3299_v40 = vmul.f32 %v3296_v35, %v4069_v25 }
0x17e6   : > { %v3301_v0 = vpop.permute.xlu0 %3300 }
0x17e7   : > { %v3303_v63 = vpop.permute.xlu1 %3302 }
0x17e8   : > { %v3304_v41 = vsel %vm396_vm0, %v3301_v0, %v3303_v63  ;;  %v3305_v42 = vsel %vm396_vm0, %v3303_v63, %v3301_v0 }
0x17e9   : > { %v3306_v51 = vmul.f32 %v3305_v42, %v4078_v28  ;;  %v3307_v54 = vmul.f32 %v3304_v41, %v4072_v26 }
0x17ea   : > { %v3311_v17 = vpop.permute.xlu0 %3310 }
0x17eb   : > { %v3313_v61 = vpop.permute.xlu1 %3312  ;;  %v3308_v15 = vadd.f32 %v3306_v51, %v3298_v9  ;;  %v3309_v30 = vadd.f32 %v3307_v54, %v3299_v40 }
0x17ec   : > { %v3314_v60 = vsel %vm418_vm2, %v3311_v17, %v3313_v61  ;;  %v3315_v49 = vsel %vm418_vm2, %v3313_v61, %v3311_v17 }
0x17ed   : > { %v3316_v10 = vmul.f32 %v3315_v49, %v4101_v45  ;;  %v3317_v14 = vmul.f32 %v3314_v60, %v4104_v46 }
0x17ee   : > { %v3321_v59 = vpop.permute.xlu0 %3320 }
0x17ef   : > { %v3323_v44 = vpop.permute.xlu1 %3322  ;;  %v3318_v7 = vadd.f32 %v3316_v10, %v3308_v15  ;;  %v3319_v16 = vadd.f32 %v3317_v14, %v3309_v30 }
0x17f0   : > { %v3324_v52 = vsel %vm440_vm3, %v3321_v59, %v3323_v44  ;;  %v3325_v19 = vsel %vm440_vm3, %v3323_v44, %v3321_v59  ;;  %v3587_v59 = vld [vmem:[%s3964_s25 + $0x70] sm:$0xff]  ;;  %v3588_v44 = vld [vmem:[%s3964_s25 + $0x78] sm:$0xff]  ;;  %s5847_s25 = scalar_lea.hbm %s5899_s8, %s3596_s10 }
0x17f1   : > { %v3326_v28 = vmul.f32 %v3325_v19, %v4107_v47  ;;  %v3327_v26 = vmul.f32 %v3324_v52, %v4110_v48  ;;  %v3383_v18 = vmul.f32 0.0, %v3587_v59  ;;  %v3384_v60 = vmul.f32 0.0, %v3588_v44 }
0x17f3   : > { %v3328_v45 = vadd.f32 %v3326_v28, %v3318_v7  ;;  %v3329_v50 = vadd.f32 %v3327_v26, %v3319_v16 }
0x17f4   : > { %v3333_v55 = vpop.permute.xlu0 %3332 }
0x17f5   : > { %v3335_v3 = vpop.permute.xlu1 %3334  ;;  %v3330_v33 = vadd.f32 %v3328_v45, %v3265_v34  ;;  %v3331_v8 = vadd.f32 %v3329_v50, %v3267_v31 }
0x17f6   : > { %v3336_v36 = vsel %vm462_vm4, %v3333_v55, %v3335_v3  ;;  %v3337_v25 = vsel %vm462_vm4, %v3335_v3, %v3333_v55 }
0x17f7   : > { %v3338_v48 = vmul.f32 %v3336_v36, %v4125_v56  ;;  %v3339_v39 = vmul.f32 %v3337_v25, %v4128_v57 }
0x17f9   : > { %v3340_v12 = vadd.f32 %v3338_v48, %v3330_v33  ;;  %v3341_v21 = vadd.f32 %v3339_v39, %v3331_v8 }
0x17fa   : > { %v3343_v27 = vpop.permute.xlu0 %3342 }
0x17fb   : > { %v3345_v46 = vpop.permute.xlu1 %3344 }
0x17fc   : > { %v3346_v2 = vsel %vm484_vm5, %v3343_v27, %v3345_v46  ;;  %v3347_v47 = vsel %vm484_vm5, %v3345_v46, %v3343_v27 }
0x17fd   : > { %v3348_v13 = vmul.f32 %v3346_v2, %v4151_v22  ;;  %v3349_v20 = vmul.f32 %v3347_v47, %v4154_v23 }
0x17fe   : > { %v3353_v4 = vpop.permute.xlu0 %3352 }
0x17ff   : > { %v3355_v43 = vpop.permute.xlu1 %3354  ;;  %v3350_v22 = vadd.f32 %v3348_v13, %v3340_v12  ;;  %v3351_v31 = vadd.f32 %v3349_v20, %v3341_v21 }
0x1800   : > { %v3356_v58 = vsel %vm506_vm6, %v3353_v4, %v3355_v43  ;;  %v3357_v1 = vsel %vm506_vm6, %v3355_v43, %v3353_v4 }
0x1801   : > { %v3358_v56 = vmul.f32 %v3356_v58, %v4157_v24  ;;  %v3359_v57 = vmul.f32 %v3357_v1, %v4160_v29 }
0x1802   : > { %v3363_v34 = vpop.permute.xlu0 %3362 }
0x1803   : > { %v3365_v23 = vpop.permute.xlu1 %3364  ;;  %v3360_v0 = vadd.f32 %v3358_v56, %v3350_v22  ;;  %v3361_v63 = vadd.f32 %v3359_v57, %v3351_v31 }
0x1804   : > { %v3366_v32 = vsel %vm528_vm7, %v3363_v34, %v3365_v23  ;;  %v3367_v62 = vsel %vm528_vm7, %v3365_v23, %v3363_v34 }
0x1805   : > { %v3368_v17 = vmul.f32 %v3366_v32, %v4178_v38  ;;  %v3369_v24 = vmul.f32 %v3367_v62, %v4175_v37 }
0x1807   : > { %v3370_v29 = vadd.f32 %v3368_v17, %v3360_v0  ;;  %v3371_v61 = vadd.f32 %v3369_v24, %v3361_v63 }
0x1809   : > { %v3372_v41 = vadd.f32 %v3370_v29, %v4280_v53  ;;  %v3373_v42 = vadd.f32 %v3371_v61, %v4280_v53 }
0x180b   : > { %v3374_v35 = vmul.f32 0.0, %v3372_v41  ;;  %v3375_v6 = vmul.f32 0.0, %v3373_v42 }
0x180d   : > { %v3376_v49 = vsub.f32 %v5652_v11, %v3374_v35  ;;  %v3377_v38 = vsub.f32 %v5654_v5, %v3375_v6 }
0x180f   : > { %v3378_v37 = vmul.f32 1.0000501, %v3376_v49  ;;  %v3379_v51 = vmul.f32 1.0000501, %v3377_v38 }
0x1811   : > { %v3385_v54 = vadd.f32 %v3383_v18, %v3378_v37  ;;  %v3386_v52 = vadd.f32 %v3384_v60, %v3379_v51 }
0x1813   : > { %3387 = vst [vmem:[%s338_s19] sm:$0xff] %v3385_v54  ;;  %3388 = vst [vmem:[%s338_s19 + $0x8] sm:$0xff] %v3386_v52 }
0x1814   : > { %3743 = shalt.err (!%p3740_p4)
}
0x1815   : > { %s3744_s22 = scalar_lea.hbm %s5847_s25, 256  ;;  %s3748_s20 = scalar_lea.hbm %s5899_s8, 512 }
0x1816   : > { %p3745_p5 = scmp.ne.s32.totalorder %s5847_s25, %s3744_s22  ;;  %p3749_p1 = scmp.lt.u32.totalorder %s5847_s25, %s5899_s8 }
0x1817   : > { %p3750_p3 = scmp.lt.u32.totalorder %s3748_s20, %s3744_s22  ;;  %p3752_p6 = scmp.lt.u32.totalorder %s3744_s22, %s5847_s25 }
0x1818   : > { %p3746_p7 = pnand %p3745_p5, %p5933_p12 }
0x1819   : > { %p3751_p11 = por %p3750_p3, %p3749_p1 }
0x181a   : > { %p3747_p9 = pneg %p3746_p7 }
0x181b   : > { %p3753_p13 = por %p3752_p6, %p3751_p11 }
0x181d   : > { %p3754_p8 = pnand %p3753_p13, %p3747_p9 }
0x181f   : > { %3757 = shalt.err (!%p3754_p8)
}
0x1820   : > { %3603 = dma.vmem_to_hbm [thread:$0]  (%p5933_p12), %s5849_s12, 256, %s5847_s25, %s3390_s13  }
0x1821 PF: > { %s3416_s10 = sand.u32 1, %s3784_s27   ;;  %p5934_p10 = scmp.ne.s32.totalorder %s5921_s18, 0 }
0x1822   : > { %p5935_p0 = scmp.ge.s32.totalorder %s3796_s30, 2  ;;  %s3417_s19 = scalar_lea.sflag [#allocation4], %s3416_s10 }
0x1824   : > { %p3610_p2 = pnand %p5935_p0, %p5934_p10 }
0x1826   : > { %3779 = dma.done.wait (!%p3610_p2), %s3417_s19, 256  }
0x1827   : > { %3781 = vsyncadd (!%p3610_p2), %s3417_s19, 4294967040  ;;  %p21_p4 = scmp.ge.s32.totalorder %s3881_s11, 4   ;;  %s5936_s27 = smov %s3788_s28 }
0x1828   : > { %s5937_s28 = smov %s3792_s29  ;;  %s5938_s29 = smov %s3893_s14 }
0x1829   : > { %s5939_s30 = smov %s3881_s11  ;;  %23 = sbr.rel (!%p21_p4) target bundleno = 9 (0x9), region = 114 }
0x1830   :  { %3422 = vsyncpa [#allocation3], 1 }
0x1831   :  { %3424 = vsyncpa [#allocation3 + $0x1], 1 }
0x1832   :  { %3425 = vsyncpa [#allocation4], 1 }
0x1833   :  { %3427 = vsyncpa [#allocation4 + $0x1], 1 }

</bundles_post_ra>
